<compile_context>
chip_gen: v5e
topology: v5e:2x2
jax: 0.10.0
libtpu: 0.0.40
codegen_flags: <defaults>
</compile_context>

<pallas_src>
import numpy as np
import jax
import jax.numpy as jnp
from jax.experimental import pallas as pl
from jax.experimental.pallas import tpu as pltpu

# ------------------------------- configuration -------------------------------
B = 2
C_IN = 128                       # in_channels == out_channels -> residual add active
C_OUT = 128
EXPANSION = 0.5
C_HID = int(C_OUT * EXPANSION)   # 64
H = W = 16
BN_EPS = 1e-5


# ------------------------------- Pallas kernel --------------------------------
def _bottleneck_kernel(x_ref, w0_ref, b0_ref, w1_ref, w2_ref, b2_ref,
                       w3_ref, b3_ref, o_ref, pad_ref, acc_ref):
    # Zero the halo buffer once per grid step: each depthwise conv rewrites only the
    # interior, so the 1-pixel border stays zero (= conv padding of 1).
    pad_ref[...] = jnp.zeros_like(pad_ref)

    def dwconv3x3(inp, w_ref, bias):
        """Depthwise 3x3, stride 1, pad 1.  BN scale is pre-folded into w_ref (9, C)."""
        pad_ref[1:H + 1, 1:W + 1, :] = inp
        acc_ref[...] = pad_ref[0:H, 0:W, :] * w_ref[0]
        for k in range(1, 9):
            dy, dx = k // 3, k % 3
            acc_ref[...] = acc_ref[...] + pad_ref[dy:dy + H, dx:dx + W, :] * w_ref[k]
        return acc_ref[...] + bias

    def silu(v):
        return v * (1.0 / (1.0 + jnp.exp(-v)))

    x = x_ref[0]                                            # (H, W, C) channels-last

    # conv0: depthwise 3x3 + folded BN (no activation)
    y = dwconv3x3(x, w0_ref, b0_ref[0])

    # conv1 (1x1 + SiLU) and conv2 (1x1 + folded BN) as (H*W, C) x (C, C') MXU matmuls.
    t = y.reshape(H * W, C_IN)
    h = jnp.dot(t, w1_ref[...], preferred_element_type=jnp.float32)
    h = silu(h)
    y2 = jnp.dot(h, w2_ref[...], preferred_element_type=jnp.float32) + b2_ref[0]

    # conv3: depthwise 3x3 + folded BN
    y3 = dwconv3x3(y2.reshape(H, W, C_OUT), w3_ref, b3_ref[0])

    # shortcut add (use_add: in_ch == out_ch) + final SiLU
    z = y3 + x
    o_ref[0] = silu(z)


# ------------------------------ wrapper / folding ------------------------------
def bottleneck_forward_pallas(x_nchw, params):
    Bb, C, Hh, Ww = x_nchw.shape
    x = jnp.transpose(x_nchw, (0, 2, 3, 1))                 # NHWC: channels -> lanes

    def fold(bn):
        s = bn["g"] * jax.lax.rsqrt(bn["v"] + BN_EPS)
        return s, bn["b"] - bn["m"] * s

    s0, b0 = fold(params["bn0"])
    s2, b2 = fold(params["bn2"])
    s3, b3 = fold(params["bn3"])

    # Depthwise weights: (C, 1, 3, 3) -> tap-major (9, C), BN scale folded per channel.
    w0 = jnp.transpose(params["dw0_w"][:, 0], (1, 2, 0)).reshape(9, C) * s0[None, :]
    w3 = jnp.transpose(params["dw3_w"][:, 0], (1, 2, 0)).reshape(9, C) * s3[None, :]
    # 1x1 weights as (C_in, C_out) matmul operands; BN2 scale folded into columns.
    w1 = jnp.transpose(params["w1"])                        # (C_IN, C_HID)
    w2 = jnp.transpose(params["w2"]) * s2[None, :]          # (C_HID, C_OUT)

    out_nhwc = pl.pallas_call(
        _bottleneck_kernel,
        out_shape=jax.ShapeDtypeStruct((Bb, Hh, Ww, C), jnp.float32),
        grid=(Bb,),
        in_specs=[
            pl.BlockSpec((1, Hh, Ww, C), lambda b: (b, 0, 0, 0)),   # x (one image)
            pl.BlockSpec((9, C), lambda b: (0, 0)),                 # dw0 (BN folded)
            pl.BlockSpec((1, C), lambda b: (0, 0)),                 # bn0 bias
            pl.BlockSpec((C, C_HID), lambda b: (0, 0)),             # conv1 W^T
            pl.BlockSpec((C_HID, C), lambda b: (0, 0)),             # conv2 W^T (BN folded)
            pl.BlockSpec((1, C), lambda b: (0, 0)),                 # bn2 bias
            pl.BlockSpec((9, C), lambda b: (0, 0)),                 # dw3 (BN folded)
            pl.BlockSpec((1, C), lambda b: (0, 0)),                 # bn3 bias
        ],
        out_specs=pl.BlockSpec((1, Hh, Ww, C), lambda b: (b, 0, 0, 0)),
        scratch_shapes=[
            pltpu.VMEM((Hh + 2, Ww + 2, C), jnp.float32),   # zero-padded halo buffer
            pltpu.VMEM((Hh, Ww, C), jnp.float32),           # depthwise accumulator
        ],
        compiler_params=pltpu.CompilerParams(
            dimension_semantics=("parallel",)),
    )(x, w0, b0.reshape(1, C), w1, w2, b2.reshape(1, C), w3, b3.reshape(1, C))

    return jnp.transpose(out_nhwc, (0, 3, 1, 2))            # back to NCHW


# --------------------------- pure-JAX reference (check) ------------------------
def bottleneck_forward_ref(x, params):
    dn = ("NCHW", "OIHW", "NCHW")
    hp = jax.lax.Precision.HIGHEST

    def bn(y, p):
        sh = (1, -1, 1, 1)
        return ((y - p["m"].reshape(sh)) * jax.lax.rsqrt(p["v"].reshape(sh) + BN_EPS)
                * p["g"].reshape(sh) + p["b"].reshape(sh))

    def silu(y):
        return y * jax.nn.sigmoid(y)

    y = jax.lax.conv_general_dilated(x, params["dw0_w"], (1, 1), [(1, 1), (1, 1)],
                                     dimension_numbers=dn,
                                     feature_group_count=C_IN, precision=hp)
    y = bn(y, params["bn0"])
    y = jax.lax.conv_general_dilated(y, params["w1"].reshape(C_HID, C_IN, 1, 1),
                                     (1, 1), [(0, 0), (0, 0)],
                                     dimension_numbers=dn, precision=hp)
    y = silu(y)
    y = jax.lax.conv_general_dilated(y, params["w2"].reshape(C_OUT, C_HID, 1, 1),
                                     (1, 1), [(0, 0), (0, 0)],
                                     dimension_numbers=dn, precision=hp)
    y = bn(y, params["bn2"])
    y = jax.lax.conv_general_dilated(y, params["dw3_w"], (1, 1), [(1, 1), (1, 1)],
                                     dimension_numbers=dn,
                                     feature_group_count=C_OUT, precision=hp)
    y = bn(y, params["bn3"])
    y = y + x                      # use_add: shortcut and in_channels == out_channels
    return silu(y)


# ------------------------------ parameter creation -----------------------------
def make_params():
    key = jax.random.PRNGKey(0)
    k = jax.random.split(key, 8)

    def nrm(kk, shape, scale):
        return (scale * jax.random.normal(kk, shape)).astype(jnp.float32)

    def make_bn(kk, c):
        k1, k2, k3, k4 = jax.random.split(kk, 4)
        return {
            "g": (1.0 + 0.1 * jax.random.normal(k1, (c,))).astype(jnp.float32),
            "b": (0.1 * jax.random.normal(k2, (c,))).astype(jnp.float32),
            "m": (0.1 * jax.random.normal(k3, (c,))).astype(jnp.float32),
            "v": (0.5 + jax.random.uniform(k4, (c,))).astype(jnp.float32),
        }

    return {
        "dw0_w": nrm(k[0], (C_IN, 1, 3, 3), 0.2),
        "bn0": make_bn(k[1], C_IN),
        "w1": nrm(k[2], (C_HID, C_IN), 0.08),
        "w2": nrm(k[3], (C_OUT, C_HID), 0.08),
        "bn2": make_bn(k[4], C_OUT),
        "dw3_w": nrm(k[5], (C_OUT, 1, 3, 3), 0.2),
        "bn3": make_bn(k[6], C_OUT),
    }


# ------------------------------------- main -------------------------------------
if __name__ == "__main__":
    params = make_params()
    x = jax.random.normal(jax.random.PRNGKey(0), (B, C_IN, H, W), jnp.float32)

    fwd = jax.jit(bottleneck_forward_pallas)
    out = jax.block_until_ready(fwd(x, params))

    ref = bottleneck_forward_ref(x, params)
    np.testing.assert_allclose(np.asarray(out), np.asarray(ref), rtol=2e-3, atol=2e-3)
    assert out.shape == (B, C_OUT, H, W)

    print("KERNEL_OK")
</pallas_src>

<mosaic_0001>
module attributes {stable_mosaic.version = 11 : i64} {
  func.func @_bottleneck_kernel(%arg0: i32, %arg1: memref<1x16x16x128xf32, #tpu.memory_space<vmem>>, %arg2: memref<9x128xf32, #tpu.memory_space<vmem>>, %arg3: memref<1x128xf32, #tpu.memory_space<vmem>>, %arg4: memref<128x64xf32, #tpu.memory_space<vmem>>, %arg5: memref<64x128xf32, #tpu.memory_space<vmem>>, %arg6: memref<1x128xf32, #tpu.memory_space<vmem>>, %arg7: memref<9x128xf32, #tpu.memory_space<vmem>>, %arg8: memref<1x128xf32, #tpu.memory_space<vmem>>, %arg9: memref<1x16x16x128xf32, #tpu.memory_space<vmem>>, %arg10: memref<18x18x128xf32, #tpu.memory_space<vmem>>, %arg11: memref<16x16x128xf32, #tpu.memory_space<vmem>>) attributes {dimension_semantics = [#tpu.dimension_semantics<parallel>], iteration_bounds = array<i64: 2>, scalar_prefetch = 0 : i64, scratch_operands = 2 : i64, tpu.core_type = #tpu.core_type<tc>, window_params = [{transform_indices = @transform_0, window_bounds = array<i64: 1, 16, 16, 128>}, {pipeline_mode = #tpu.pipeline_mode<synchronous>, transform_indices = @transform_1, window_bounds = array<i64: 9, 128>}, {pipeline_mode = #tpu.pipeline_mode<synchronous>, transform_indices = @transform_2, window_bounds = array<i64: 1, 128>}, {pipeline_mode = #tpu.pipeline_mode<synchronous>, transform_indices = @transform_3, window_bounds = array<i64: 128, 64>}, {pipeline_mode = #tpu.pipeline_mode<synchronous>, transform_indices = @transform_4, window_bounds = array<i64: 64, 128>}, {pipeline_mode = #tpu.pipeline_mode<synchronous>, transform_indices = @transform_5, window_bounds = array<i64: 1, 128>}, {pipeline_mode = #tpu.pipeline_mode<synchronous>, transform_indices = @transform_6, window_bounds = array<i64: 9, 128>}, {pipeline_mode = #tpu.pipeline_mode<synchronous>, transform_indices = @transform_7, window_bounds = array<i64: 1, 128>}, {transform_indices = @transform_8, window_bounds = array<i64: 1, 16, 16, 128>}]} {
    %cst = arith.constant 0.000000e+00 : f32
    %0 = vector.broadcast %cst : f32 to vector<18x18x128xf32>
    %c0 = arith.constant 0 : index
    %c0_0 = arith.constant 0 : index
    %c0_1 = arith.constant 0 : index
    %1 = vector.load %arg10[%c0, %c0_0, %c0_1] : memref<18x18x128xf32, #tpu.memory_space<vmem>>, vector<18x18x128xf32>
    tpu.vector_store %arg10[%c0, %c0_0, %c0_1], %0 {strides = array<i32>} : memref<18x18x128xf32, #tpu.memory_space<vmem>>, vector<18x18x128xf32>,
    %c0_2 = arith.constant 0 : index
    %c0_3 = arith.constant 0 : index
    %c0_4 = arith.constant 0 : index
    %c0_5 = arith.constant 0 : index
    %2 = vector.load %arg1[%c0_2, %c0_3, %c0_4, %c0_5] : memref<1x16x16x128xf32, #tpu.memory_space<vmem>>, vector<1x16x16x128xf32>
    %3 = vector.shape_cast %2 : vector<1x16x16x128xf32> to vector<16x16x128xf32>
    %c0_6 = arith.constant 0 : index
    %c0_7 = arith.constant 0 : index
    %4 = vector.load %arg3[%c0_6, %c0_7] : memref<1x128xf32, #tpu.memory_space<vmem>>, vector<1x128xf32>
    %5 = vector.shape_cast %4 : vector<1x128xf32> to vector<128xf32>
    %c1 = arith.constant 1 : index
    %c1_8 = arith.constant 1 : index
    %c0_9 = arith.constant 0 : index
    %6 = vector.load %arg10[%c1, %c1_8, %c0_9] : memref<18x18x128xf32, #tpu.memory_space<vmem>>, vector<16x16x128xf32>
    tpu.vector_store %arg10[%c1, %c1_8, %c0_9], %3 {strides = array<i32>} : memref<18x18x128xf32, #tpu.memory_space<vmem>>, vector<16x16x128xf32>,
    %c0_10 = arith.constant 0 : index
    %c0_11 = arith.constant 0 : index
    %c0_12 = arith.constant 0 : index
    %7 = vector.load %arg10[%c0_10, %c0_11, %c0_12] : memref<18x18x128xf32, #tpu.memory_space<vmem>>, vector<16x16x128xf32>
    %c0_13 = arith.constant 0 : index
    %c0_14 = arith.constant 0 : index
    %8 = vector.load %arg2[%c0_13, %c0_14] : memref<9x128xf32, #tpu.memory_space<vmem>>, vector<1x128xf32>
    %9 = vector.shape_cast %8 : vector<1x128xf32> to vector<128xf32>
    %10 = vector.shape_cast %9 : vector<128xf32> to vector<1x1x128xf32>
    %11 = vector.broadcast %10 : vector<1x1x128xf32> to vector<16x16x128xf32>
    %12 = arith.mulf %7, %11 : vector<16x16x128xf32>
    %c0_15 = arith.constant 0 : index
    %c0_16 = arith.constant 0 : index
    %c0_17 = arith.constant 0 : index
    %13 = vector.load %arg11[%c0_15, %c0_16, %c0_17] : memref<16x16x128xf32, #tpu.memory_space<vmem>>, vector<16x16x128xf32>
    tpu.vector_store %arg11[%c0_15, %c0_16, %c0_17], %12 {strides = array<i32>} : memref<16x16x128xf32, #tpu.memory_space<vmem>>, vector<16x16x128xf32>,
    %c0_18 = arith.constant 0 : index
    %c0_19 = arith.constant 0 : index
    %c0_20 = arith.constant 0 : index
    %14 = vector.load %arg11[%c0_18, %c0_19, %c0_20] : memref<16x16x128xf32, #tpu.memory_space<vmem>>, vector<16x16x128xf32>
    %c0_21 = arith.constant 0 : index
    %c1_22 = arith.constant 1 : index
    %c0_23 = arith.constant 0 : index
    %15 = vector.load %arg10[%c0_21, %c1_22, %c0_23] : memref<18x18x128xf32, #tpu.memory_space<vmem>>, vector<16x16x128xf32>
    %c1_24 = arith.constant 1 : index
    %c0_25 = arith.constant 0 : index
    %16 = vector.load %arg2[%c1_24, %c0_25] : memref<9x128xf32, #tpu.memory_space<vmem>>, vector<1x128xf32>
    %17 = vector.shape_cast %16 : vector<1x128xf32> to vector<128xf32>
    %18 = vector.shape_cast %17 : vector<128xf32> to vector<1x1x128xf32>
    %19 = vector.broadcast %18 : vector<1x1x128xf32> to vector<16x16x128xf32>
    %20 = arith.mulf %15, %19 : vector<16x16x128xf32>
    %21 = arith.addf %14, %20 : vector<16x16x128xf32>
    %c0_26 = arith.constant 0 : index
    %c0_27 = arith.constant 0 : index
    %c0_28 = arith.constant 0 : index
    %22 = vector.load %arg11[%c0_26, %c0_27, %c0_28] : memref<16x16x128xf32, #tpu.memory_space<vmem>>, vector<16x16x128xf32>
    tpu.vector_store %arg11[%c0_26, %c0_27, %c0_28], %21 {strides = array<i32>} : memref<16x16x128xf32, #tpu.memory_space<vmem>>, vector<16x16x128xf32>,
    %c0_29 = arith.constant 0 : index
    %c0_30 = arith.constant 0 : index
    %c0_31 = arith.constant 0 : index
    %23 = vector.load %arg11[%c0_29, %c0_30, %c0_31] : memref<16x16x128xf32, #tpu.memory_space<vmem>>, vector<16x16x128xf32>
    %c0_32 = arith.constant 0 : index
    %c2 = arith.constant 2 : index
    %c0_33 = arith.constant 0 : index
    %24 = vector.load %arg10[%c0_32, %c2, %c0_33] : memref<18x18x128xf32, #tpu.memory_space<vmem>>, vector<16x16x128xf32>
    %c2_34 = arith.constant 2 : index
    %c0_35 = arith.constant 0 : index
    %25 = vector.load %arg2[%c2_34, %c0_35] : memref<9x128xf32, #tpu.memory_space<vmem>>, vector<1x128xf32>
    %26 = vector.shape_cast %25 : vector<1x128xf32> to vector<128xf32>
    %27 = vector.shape_cast %26 : vector<128xf32> to vector<1x1x128xf32>
    %28 = vector.broadcast %27 : vector<1x1x128xf32> to vector<16x16x128xf32>
    %29 = arith.mulf %24, %28 : vector<16x16x128xf32>
    %30 = arith.addf %23, %29 : vector<16x16x128xf32>
    %c0_36 = arith.constant 0 : index
    %c0_37 = arith.constant 0 : index
    %c0_38 = arith.constant 0 : index
    %31 = vector.load %arg11[%c0_36, %c0_37, %c0_38] : memref<16x16x128xf32, #tpu.memory_space<vmem>>, vector<16x16x128xf32>
    tpu.vector_store %arg11[%c0_36, %c0_37, %c0_38], %30 {strides = array<i32>} : memref<16x16x128xf32, #tpu.memory_space<vmem>>, vector<16x16x128xf32>,
    %c0_39 = arith.constant 0 : index
    %c0_40 = arith.constant 0 : index
    %c0_41 = arith.constant 0 : index
    %32 = vector.load %arg11[%c0_39, %c0_40, %c0_41] : memref<16x16x128xf32, #tpu.memory_space<vmem>>, vector<16x16x128xf32>
    %c1_42 = arith.constant 1 : index
    %c0_43 = arith.constant 0 : index
    %c0_44 = arith.constant 0 : index
    %33 = vector.load %arg10[%c1_42, %c0_43, %c0_44] : memref<18x18x128xf32, #tpu.memory_space<vmem>>, vector<16x16x128xf32>
    %c3 = arith.constant 3 : index
    %c0_45 = arith.constant 0 : index
    %34 = vector.load %arg2[%c3, %c0_45] : memref<9x128xf32, #tpu.memory_space<vmem>>, vector<1x128xf32>
    %35 = vector.shape_cast %34 : vector<1x128xf32> to vector<128xf32>
    %36 = vector.shape_cast %35 : vector<128xf32> to vector<1x1x128xf32>
    %37 = vector.broadcast %36 : vector<1x1x128xf32> to vector<16x16x128xf32>
    %38 = arith.mulf %33, %37 : vector<16x16x128xf32>
    %39 = arith.addf %32, %38 : vector<16x16x128xf32>
    %c0_46 = arith.constant 0 : index
    %c0_47 = arith.constant 0 : index
    %c0_48 = arith.constant 0 : index
    %40 = vector.load %arg11[%c0_46, %c0_47, %c0_48] : memref<16x16x128xf32, #tpu.memory_space<vmem>>, vector<16x16x128xf32>
    tpu.vector_store %arg11[%c0_46, %c0_47, %c0_48], %39 {strides = array<i32>} : memref<16x16x128xf32, #tpu.memory_space<vmem>>, vector<16x16x128xf32>,
    %c0_49 = arith.constant 0 : index
    %c0_50 = arith.constant 0 : index
    %c0_51 = arith.constant 0 : index
    %41 = vector.load %arg11[%c0_49, %c0_50, %c0_51] : memref<16x16x128xf32, #tpu.memory_space<vmem>>, vector<16x16x128xf32>
    %c1_52 = arith.constant 1 : index
    %c1_53 = arith.constant 1 : index
    %c0_54 = arith.constant 0 : index
    %42 = vector.load %arg10[%c1_52, %c1_53, %c0_54] : memref<18x18x128xf32, #tpu.memory_space<vmem>>, vector<16x16x128xf32>
    %c4 = arith.constant 4 : index
    %c0_55 = arith.constant 0 : index
    %43 = vector.load %arg2[%c4, %c0_55] : memref<9x128xf32, #tpu.memory_space<vmem>>, vector<1x128xf32>
    %44 = vector.shape_cast %43 : vector<1x128xf32> to vector<128xf32>
    %45 = vector.shape_cast %44 : vector<128xf32> to vector<1x1x128xf32>
    %46 = vector.broadcast %45 : vector<1x1x128xf32> to vector<16x16x128xf32>
    %47 = arith.mulf %42, %46 : vector<16x16x128xf32>
    %48 = arith.addf %41, %47 : vector<16x16x128xf32>
    %c0_56 = arith.constant 0 : index
    %c0_57 = arith.constant 0 : index
    %c0_58 = arith.constant 0 : index
    %49 = vector.load %arg11[%c0_56, %c0_57, %c0_58] : memref<16x16x128xf32, #tpu.memory_space<vmem>>, vector<16x16x128xf32>
    tpu.vector_store %arg11[%c0_56, %c0_57, %c0_58], %48 {strides = array<i32>} : memref<16x16x128xf32, #tpu.memory_space<vmem>>, vector<16x16x128xf32>,
    %c0_59 = arith.constant 0 : index
    %c0_60 = arith.constant 0 : index
    %c0_61 = arith.constant 0 : index
    %50 = vector.load %arg11[%c0_59, %c0_60, %c0_61] : memref<16x16x128xf32, #tpu.memory_space<vmem>>, vector<16x16x128xf32>
    %c1_62 = arith.constant 1 : index
    %c2_63 = arith.constant 2 : index
    %c0_64 = arith.constant 0 : index
    %51 = vector.load %arg10[%c1_62, %c2_63, %c0_64] : memref<18x18x128xf32, #tpu.memory_space<vmem>>, vector<16x16x128xf32>
    %c5 = arith.constant 5 : index
    %c0_65 = arith.constant 0 : index
    %52 = vector.load %arg2[%c5, %c0_65] : memref<9x128xf32, #tpu.memory_space<vmem>>, vector<1x128xf32>
    %53 = vector.shape_cast %52 : vector<1x128xf32> to vector<128xf32>
    %54 = vector.shape_cast %53 : vector<128xf32> to vector<1x1x128xf32>
    %55 = vector.broadcast %54 : vector<1x1x128xf32> to vector<16x16x128xf32>
    %56 = arith.mulf %51, %55 : vector<16x16x128xf32>
    %57 = arith.addf %50, %56 : vector<16x16x128xf32>
    %c0_66 = arith.constant 0 : index
    %c0_67 = arith.constant 0 : index
    %c0_68 = arith.constant 0 : index
    %58 = vector.load %arg11[%c0_66, %c0_67, %c0_68] : memref<16x16x128xf32, #tpu.memory_space<vmem>>, vector<16x16x128xf32>
    tpu.vector_store %arg11[%c0_66, %c0_67, %c0_68], %57 {strides = array<i32>} : memref<16x16x128xf32, #tpu.memory_space<vmem>>, vector<16x16x128xf32>,
    %c0_69 = arith.constant 0 : index
    %c0_70 = arith.constant 0 : index
    %c0_71 = arith.constant 0 : index
    %59 = vector.load %arg11[%c0_69, %c0_70, %c0_71] : memref<16x16x128xf32, #tpu.memory_space<vmem>>, vector<16x16x128xf32>
    %c2_72 = arith.constant 2 : index
    %c0_73 = arith.constant 0 : index
    %c0_74 = arith.constant 0 : index
    %60 = vector.load %arg10[%c2_72, %c0_73, %c0_74] : memref<18x18x128xf32, #tpu.memory_space<vmem>>, vector<16x16x128xf32>
    %c6 = arith.constant 6 : index
    %c0_75 = arith.constant 0 : index
    %61 = vector.load %arg2[%c6, %c0_75] : memref<9x128xf32, #tpu.memory_space<vmem>>, vector<1x128xf32>
    %62 = vector.shape_cast %61 : vector<1x128xf32> to vector<128xf32>
    %63 = vector.shape_cast %62 : vector<128xf32> to vector<1x1x128xf32>
    %64 = vector.broadcast %63 : vector<1x1x128xf32> to vector<16x16x128xf32>
    %65 = arith.mulf %60, %64 : vector<16x16x128xf32>
    %66 = arith.addf %59, %65 : vector<16x16x128xf32>
    %c0_76 = arith.constant 0 : index
    %c0_77 = arith.constant 0 : index
    %c0_78 = arith.constant 0 : index
    %67 = vector.load %arg11[%c0_76, %c0_77, %c0_78] : memref<16x16x128xf32, #tpu.memory_space<vmem>>, vector<16x16x128xf32>
    tpu.vector_store %arg11[%c0_76, %c0_77, %c0_78], %66 {strides = array<i32>} : memref<16x16x128xf32, #tpu.memory_space<vmem>>, vector<16x16x128xf32>,
    %c0_79 = arith.constant 0 : index
    %c0_80 = arith.constant 0 : index
    %c0_81 = arith.constant 0 : index
    %68 = vector.load %arg11[%c0_79, %c0_80, %c0_81] : memref<16x16x128xf32, #tpu.memory_space<vmem>>, vector<16x16x128xf32>
    %c2_82 = arith.constant 2 : index
    %c1_83 = arith.constant 1 : index
    %c0_84 = arith.constant 0 : index
    %69 = vector.load %arg10[%c2_82, %c1_83, %c0_84] : memref<18x18x128xf32, #tpu.memory_space<vmem>>, vector<16x16x128xf32>
    %c7 = arith.constant 7 : index
    %c0_85 = arith.constant 0 : index
    %70 = vector.load %arg2[%c7, %c0_85] : memref<9x128xf32, #tpu.memory_space<vmem>>, vector<1x128xf32>
    %71 = vector.shape_cast %70 : vector<1x128xf32> to vector<128xf32>
    %72 = vector.shape_cast %71 : vector<128xf32> to vector<1x1x128xf32>
    %73 = vector.broadcast %72 : vector<1x1x128xf32> to vector<16x16x128xf32>
    %74 = arith.mulf %69, %73 : vector<16x16x128xf32>
    %75 = arith.addf %68, %74 : vector<16x16x128xf32>
    %c0_86 = arith.constant 0 : index
    %c0_87 = arith.constant 0 : index
    %c0_88 = arith.constant 0 : index
    %76 = vector.load %arg11[%c0_86, %c0_87, %c0_88] : memref<16x16x128xf32, #tpu.memory_space<vmem>>, vector<16x16x128xf32>
    tpu.vector_store %arg11[%c0_86, %c0_87, %c0_88], %75 {strides = array<i32>} : memref<16x16x128xf32, #tpu.memory_space<vmem>>, vector<16x16x128xf32>,
    %c0_89 = arith.constant 0 : index
    %c0_90 = arith.constant 0 : index
    %c0_91 = arith.constant 0 : index
    %77 = vector.load %arg11[%c0_89, %c0_90, %c0_91] : memref<16x16x128xf32, #tpu.memory_space<vmem>>, vector<16x16x128xf32>
    %c2_92 = arith.constant 2 : index
    %c2_93 = arith.constant 2 : index
    %c0_94 = arith.constant 0 : index
    %78 = vector.load %arg10[%c2_92, %c2_93, %c0_94] : memref<18x18x128xf32, #tpu.memory_space<vmem>>, vector<16x16x128xf32>
    %c8 = arith.constant 8 : index
    %c0_95 = arith.constant 0 : index
    %79 = vector.load %arg2[%c8, %c0_95] : memref<9x128xf32, #tpu.memory_space<vmem>>, vector<1x128xf32>
    %80 = vector.shape_cast %79 : vector<1x128xf32> to vector<128xf32>
    %81 = vector.shape_cast %80 : vector<128xf32> to vector<1x1x128xf32>
    %82 = vector.broadcast %81 : vector<1x1x128xf32> to vector<16x16x128xf32>
    %83 = arith.mulf %78, %82 : vector<16x16x128xf32>
    %84 = arith.addf %77, %83 : vector<16x16x128xf32>
    %c0_96 = arith.constant 0 : index
    %c0_97 = arith.constant 0 : index
    %c0_98 = arith.constant 0 : index
    %85 = vector.load %arg11[%c0_96, %c0_97, %c0_98] : memref<16x16x128xf32, #tpu.memory_space<vmem>>, vector<16x16x128xf32>
    tpu.vector_store %arg11[%c0_96, %c0_97, %c0_98], %84 {strides = array<i32>} : memref<16x16x128xf32, #tpu.memory_space<vmem>>, vector<16x16x128xf32>,
    %c0_99 = arith.constant 0 : index
    %c0_100 = arith.constant 0 : index
    %c0_101 = arith.constant 0 : index
    %86 = vector.load %arg11[%c0_99, %c0_100, %c0_101] : memref<16x16x128xf32, #tpu.memory_space<vmem>>, vector<16x16x128xf32>
    %87 = vector.shape_cast %5 : vector<128xf32> to vector<1x1x128xf32>
    %88 = vector.broadcast %87 : vector<1x1x128xf32> to vector<16x16x128xf32>
    %89 = arith.addf %86, %88 : vector<16x16x128xf32>
    %90 = vector.shape_cast %89 : vector<16x16x128xf32> to vector<256x128xf32>
    %c0_102 = arith.constant 0 : index
    %c0_103 = arith.constant 0 : index
    %91 = vector.load %arg4[%c0_102, %c0_103] : memref<128x64xf32, #tpu.memory_space<vmem>>, vector<128x64xf32>
    %cst_104 = arith.constant dense<0.000000e+00> : vector<256x64xf32>
    %92 = tpu.matmul %90, %91, %cst_104 {dimension_numbers = #tpu.dot_dimension_numbers<[1], [0], [0], [1], [0, 0, 1, 1], [], []>} : vector<256x128xf32>, vector<128x64xf32>, vector<256x64xf32> -> vector<256x64xf32>
    %cst_105 = arith.constant 0.000000e+00 : f32
    %93 = vector.broadcast %cst_105 : f32 to vector<256x64xf32>
    %94 = arith.subf %93, %92 : vector<256x64xf32>
    %95 = math.exp %94 : vector<256x64xf32>
    %cst_106 = arith.constant 1.000000e+00 : f32
    %96 = vector.broadcast %cst_106 : f32 to vector<256x64xf32>
    %97 = arith.addf %96, %95 : vector<256x64xf32>
    %cst_107 = arith.constant 1.000000e+00 : f32
    %98 = vector.broadcast %cst_107 : f32 to vector<256x64xf32>
    %99 = arith.divf %98, %97 : vector<256x64xf32>
    %100 = arith.mulf %92, %99 : vector<256x64xf32>
    %c0_108 = arith.constant 0 : index
    %c0_109 = arith.constant 0 : index
    %101 = vector.load %arg5[%c0_108, %c0_109] : memref<64x128xf32, #tpu.memory_space<vmem>>, vector<64x128xf32>
    %cst_110 = arith.constant dense<0.000000e+00> : vector<256x128xf32>
    %102 = tpu.matmul %100, %101, %cst_110 {dimension_numbers = #tpu.dot_dimension_numbers<[1], [0], [0], [1], [0, 0, 1, 1], [], []>} : vector<256x64xf32>, vector<64x128xf32>, vector<256x128xf32> -> vector<256x128xf32>
    %c0_111 = arith.constant 0 : index
    %c0_112 = arith.constant 0 : index
    %103 = vector.load %arg6[%c0_111, %c0_112] : memref<1x128xf32, #tpu.memory_space<vmem>>, vector<1x128xf32>
    %104 = vector.shape_cast %103 : vector<1x128xf32> to vector<128xf32>
    %105 = vector.shape_cast %104 : vector<128xf32> to vector<1x128xf32>
    %106 = vector.broadcast %105 : vector<1x128xf32> to vector<256x128xf32>
    %107 = arith.addf %102, %106 : vector<256x128xf32>
    %108 = vector.shape_cast %107 : vector<256x128xf32> to vector<16x16x128xf32>
    %c0_113 = arith.constant 0 : index
    %c0_114 = arith.constant 0 : index
    %109 = vector.load %arg8[%c0_113, %c0_114] : memref<1x128xf32, #tpu.memory_space<vmem>>, vector<1x128xf32>
    %110 = vector.shape_cast %109 : vector<1x128xf32> to vector<128xf32>
    %c1_115 = arith.constant 1 : index
    %c1_116 = arith.constant 1 : index
    %c0_117 = arith.constant 0 : index
    %111 = vector.load %arg10[%c1_115, %c1_116, %c0_117] : memref<18x18x128xf32, #tpu.memory_space<vmem>>, vector<16x16x128xf32>
    tpu.vector_store %arg10[%c1_115, %c1_116, %c0_117], %108 {strides = array<i32>} : memref<18x18x128xf32, #tpu.memory_space<vmem>>, vector<16x16x128xf32>,
    %c0_118 = arith.constant 0 : index
    %c0_119 = arith.constant 0 : index
    %c0_120 = arith.constant 0 : index
    %112 = vector.load %arg10[%c0_118, %c0_119, %c0_120] : memref<18x18x128xf32, #tpu.memory_space<vmem>>, vector<16x16x128xf32>
    %c0_121 = arith.constant 0 : index
    %c0_122 = arith.constant 0 : index
    %113 = vector.load %arg7[%c0_121, %c0_122] : memref<9x128xf32, #tpu.memory_space<vmem>>, vector<1x128xf32>
    %114 = vector.shape_cast %113 : vector<1x128xf32> to vector<128xf32>
    %115 = vector.shape_cast %114 : vector<128xf32> to vector<1x1x128xf32>
    %116 = vector.broadcast %115 : vector<1x1x128xf32> to vector<16x16x128xf32>
    %117 = arith.mulf %112, %116 : vector<16x16x128xf32>
    %c0_123 = arith.constant 0 : index
    %c0_124 = arith.constant 0 : index
    %c0_125 = arith.constant 0 : index
    %118 = vector.load %arg11[%c0_123, %c0_124, %c0_125] : memref<16x16x128xf32, #tpu.memory_space<vmem>>, vector<16x16x128xf32>
    tpu.vector_store %arg11[%c0_123, %c0_124, %c0_125], %117 {strides = array<i32>} : memref<16x16x128xf32, #tpu.memory_space<vmem>>, vector<16x16x128xf32>,
    %c0_126 = arith.constant 0 : index
    %c0_127 = arith.constant 0 : index
    %c0_128 = arith.constant 0 : index
    %119 = vector.load %arg11[%c0_126, %c0_127, %c0_128] : memref<16x16x128xf32, #tpu.memory_space<vmem>>, vector<16x16x128xf32>
    %c0_129 = arith.constant 0 : index
    %c1_130 = arith.constant 1 : index
    %c0_131 = arith.constant 0 : index
    %120 = vector.load %arg10[%c0_129, %c1_130, %c0_131] : memref<18x18x128xf32, #tpu.memory_space<vmem>>, vector<16x16x128xf32>
    %c1_132 = arith.constant 1 : index
    %c0_133 = arith.constant 0 : index
    %121 = vector.load %arg7[%c1_132, %c0_133] : memref<9x128xf32, #tpu.memory_space<vmem>>, vector<1x128xf32>
    %122 = vector.shape_cast %121 : vector<1x128xf32> to vector<128xf32>
    %123 = vector.shape_cast %122 : vector<128xf32> to vector<1x1x128xf32>
    %124 = vector.broadcast %123 : vector<1x1x128xf32> to vector<16x16x128xf32>
    %125 = arith.mulf %120, %124 : vector<16x16x128xf32>
    %126 = arith.addf %119, %125 : vector<16x16x128xf32>
    %c0_134 = arith.constant 0 : index
    %c0_135 = arith.constant 0 : index
    %c0_136 = arith.constant 0 : index
    %127 = vector.load %arg11[%c0_134, %c0_135, %c0_136] : memref<16x16x128xf32, #tpu.memory_space<vmem>>, vector<16x16x128xf32>
    tpu.vector_store %arg11[%c0_134, %c0_135, %c0_136], %126 {strides = array<i32>} : memref<16x16x128xf32, #tpu.memory_space<vmem>>, vector<16x16x128xf32>,
    %c0_137 = arith.constant 0 : index
    %c0_138 = arith.constant 0 : index
    %c0_139 = arith.constant 0 : index
    %128 = vector.load %arg11[%c0_137, %c0_138, %c0_139] : memref<16x16x128xf32, #tpu.memory_space<vmem>>, vector<16x16x128xf32>
    %c0_140 = arith.constant 0 : index
    %c2_141 = arith.constant 2 : index
    %c0_142 = arith.constant 0 : index
    %129 = vector.load %arg10[%c0_140, %c2_141, %c0_142] : memref<18x18x128xf32, #tpu.memory_space<vmem>>, vector<16x16x128xf32>
    %c2_143 = arith.constant 2 : index
    %c0_144 = arith.constant 0 : index
    %130 = vector.load %arg7[%c2_143, %c0_144] : memref<9x128xf32, #tpu.memory_space<vmem>>, vector<1x128xf32>
    %131 = vector.shape_cast %130 : vector<1x128xf32> to vector<128xf32>
    %132 = vector.shape_cast %131 : vector<128xf32> to vector<1x1x128xf32>
    %133 = vector.broadcast %132 : vector<1x1x128xf32> to vector<16x16x128xf32>
    %134 = arith.mulf %129, %133 : vector<16x16x128xf32>
    %135 = arith.addf %128, %134 : vector<16x16x128xf32>
    %c0_145 = arith.constant 0 : index
    %c0_146 = arith.constant 0 : index
    %c0_147 = arith.constant 0 : index
    %136 = vector.load %arg11[%c0_145, %c0_146, %c0_147] : memref<16x16x128xf32, #tpu.memory_space<vmem>>, vector<16x16x128xf32>
    tpu.vector_store %arg11[%c0_145, %c0_146, %c0_147], %135 {strides = array<i32>} : memref<16x16x128xf32, #tpu.memory_space<vmem>>, vector<16x16x128xf32>,
    %c0_148 = arith.constant 0 : index
    %c0_149 = arith.constant 0 : index
    %c0_150 = arith.constant 0 : index
    %137 = vector.load %arg11[%c0_148, %c0_149, %c0_150] : memref<16x16x128xf32, #tpu.memory_space<vmem>>, vector<16x16x128xf32>
    %c1_151 = arith.constant 1 : index
    %c0_152 = arith.constant 0 : index
    %c0_153 = arith.constant 0 : index
    %138 = vector.load %arg10[%c1_151, %c0_152, %c0_153] : memref<18x18x128xf32, #tpu.memory_space<vmem>>, vector<16x16x128xf32>
    %c3_154 = arith.constant 3 : index
    %c0_155 = arith.constant 0 : index
    %139 = vector.load %arg7[%c3_154, %c0_155] : memref<9x128xf32, #tpu.memory_space<vmem>>, vector<1x128xf32>
    %140 = vector.shape_cast %139 : vector<1x128xf32> to vector<128xf32>
    %141 = vector.shape_cast %140 : vector<128xf32> to vector<1x1x128xf32>
    %142 = vector.broadcast %141 : vector<1x1x128xf32> to vector<16x16x128xf32>
    %143 = arith.mulf %138, %142 : vector<16x16x128xf32>
    %144 = arith.addf %137, %143 : vector<16x16x128xf32>
    %c0_156 = arith.constant 0 : index
    %c0_157 = arith.constant 0 : index
    %c0_158 = arith.constant 0 : index
    %145 = vector.load %arg11[%c0_156, %c0_157, %c0_158] : memref<16x16x128xf32, #tpu.memory_space<vmem>>, vector<16x16x128xf32>
    tpu.vector_store %arg11[%c0_156, %c0_157, %c0_158], %144 {strides = array<i32>} : memref<16x16x128xf32, #tpu.memory_space<vmem>>, vector<16x16x128xf32>,
    %c0_159 = arith.constant 0 : index
    %c0_160 = arith.constant 0 : index
    %c0_161 = arith.constant 0 : index
    %146 = vector.load %arg11[%c0_159, %c0_160, %c0_161] : memref<16x16x128xf32, #tpu.memory_space<vmem>>, vector<16x16x128xf32>
    %c1_162 = arith.constant 1 : index
    %c1_163 = arith.constant 1 : index
    %c0_164 = arith.constant 0 : index
    %147 = vector.load %arg10[%c1_162, %c1_163, %c0_164] : memref<18x18x128xf32, #tpu.memory_space<vmem>>, vector<16x16x128xf32>
    %c4_165 = arith.constant 4 : index
    %c0_166 = arith.constant 0 : index
    %148 = vector.load %arg7[%c4_165, %c0_166] : memref<9x128xf32, #tpu.memory_space<vmem>>, vector<1x128xf32>
    %149 = vector.shape_cast %148 : vector<1x128xf32> to vector<128xf32>
    %150 = vector.shape_cast %149 : vector<128xf32> to vector<1x1x128xf32>
    %151 = vector.broadcast %150 : vector<1x1x128xf32> to vector<16x16x128xf32>
    %152 = arith.mulf %147, %151 : vector<16x16x128xf32>
    %153 = arith.addf %146, %152 : vector<16x16x128xf32>
    %c0_167 = arith.constant 0 : index
    %c0_168 = arith.constant 0 : index
    %c0_169 = arith.constant 0 : index
    %154 = vector.load %arg11[%c0_167, %c0_168, %c0_169] : memref<16x16x128xf32, #tpu.memory_space<vmem>>, vector<16x16x128xf32>
    tpu.vector_store %arg11[%c0_167, %c0_168, %c0_169], %153 {strides = array<i32>} : memref<16x16x128xf32, #tpu.memory_space<vmem>>, vector<16x16x128xf32>,
    %c0_170 = arith.constant 0 : index
    %c0_171 = arith.constant 0 : index
    %c0_172 = arith.constant 0 : index
    %155 = vector.load %arg11[%c0_170, %c0_171, %c0_172] : memref<16x16x128xf32, #tpu.memory_space<vmem>>, vector<16x16x128xf32>
    %c1_173 = arith.constant 1 : index
    %c2_174 = arith.constant 2 : index
    %c0_175 = arith.constant 0 : index
    %156 = vector.load %arg10[%c1_173, %c2_174, %c0_175] : memref<18x18x128xf32, #tpu.memory_space<vmem>>, vector<16x16x128xf32>
    %c5_176 = arith.constant 5 : index
    %c0_177 = arith.constant 0 : index
    %157 = vector.load %arg7[%c5_176, %c0_177] : memref<9x128xf32, #tpu.memory_space<vmem>>, vector<1x128xf32>
    %158 = vector.shape_cast %157 : vector<1x128xf32> to vector<128xf32>
    %159 = vector.shape_cast %158 : vector<128xf32> to vector<1x1x128xf32>
    %160 = vector.broadcast %159 : vector<1x1x128xf32> to vector<16x16x128xf32>
    %161 = arith.mulf %156, %160 : vector<16x16x128xf32>
    %162 = arith.addf %155, %161 : vector<16x16x128xf32>
    %c0_178 = arith.constant 0 : index
    %c0_179 = arith.constant 0 : index
    %c0_180 = arith.constant 0 : index
    %163 = vector.load %arg11[%c0_178, %c0_179, %c0_180] : memref<16x16x128xf32, #tpu.memory_space<vmem>>, vector<16x16x128xf32>
    tpu.vector_store %arg11[%c0_178, %c0_179, %c0_180], %162 {strides = array<i32>} : memref<16x16x128xf32, #tpu.memory_space<vmem>>, vector<16x16x128xf32>,
    %c0_181 = arith.constant 0 : index
    %c0_182 = arith.constant 0 : index
    %c0_183 = arith.constant 0 : index
    %164 = vector.load %arg11[%c0_181, %c0_182, %c0_183] : memref<16x16x128xf32, #tpu.memory_space<vmem>>, vector<16x16x128xf32>
    %c2_184 = arith.constant 2 : index
    %c0_185 = arith.constant 0 : index
    %c0_186 = arith.constant 0 : index
    %165 = vector.load %arg10[%c2_184, %c0_185, %c0_186] : memref<18x18x128xf32, #tpu.memory_space<vmem>>, vector<16x16x128xf32>
    %c6_187 = arith.constant 6 : index
    %c0_188 = arith.constant 0 : index
    %166 = vector.load %arg7[%c6_187, %c0_188] : memref<9x128xf32, #tpu.memory_space<vmem>>, vector<1x128xf32>
    %167 = vector.shape_cast %166 : vector<1x128xf32> to vector<128xf32>
    %168 = vector.shape_cast %167 : vector<128xf32> to vector<1x1x128xf32>
    %169 = vector.broadcast %168 : vector<1x1x128xf32> to vector<16x16x128xf32>
    %170 = arith.mulf %165, %169 : vector<16x16x128xf32>
    %171 = arith.addf %164, %170 : vector<16x16x128xf32>
    %c0_189 = arith.constant 0 : index
    %c0_190 = arith.constant 0 : index
    %c0_191 = arith.constant 0 : index
    %172 = vector.load %arg11[%c0_189, %c0_190, %c0_191] : memref<16x16x128xf32, #tpu.memory_space<vmem>>, vector<16x16x128xf32>
    tpu.vector_store %arg11[%c0_189, %c0_190, %c0_191], %171 {strides = array<i32>} : memref<16x16x128xf32, #tpu.memory_space<vmem>>, vector<16x16x128xf32>,
    %c0_192 = arith.constant 0 : index
    %c0_193 = arith.constant 0 : index
    %c0_194 = arith.constant 0 : index
    %173 = vector.load %arg11[%c0_192, %c0_193, %c0_194] : memref<16x16x128xf32, #tpu.memory_space<vmem>>, vector<16x16x128xf32>
    %c2_195 = arith.constant 2 : index
    %c1_196 = arith.constant 1 : index
    %c0_197 = arith.constant 0 : index
    %174 = vector.load %arg10[%c2_195, %c1_196, %c0_197] : memref<18x18x128xf32, #tpu.memory_space<vmem>>, vector<16x16x128xf32>
    %c7_198 = arith.constant 7 : index
    %c0_199 = arith.constant 0 : index
    %175 = vector.load %arg7[%c7_198, %c0_199] : memref<9x128xf32, #tpu.memory_space<vmem>>, vector<1x128xf32>
    %176 = vector.shape_cast %175 : vector<1x128xf32> to vector<128xf32>
    %177 = vector.shape_cast %176 : vector<128xf32> to vector<1x1x128xf32>
    %178 = vector.broadcast %177 : vector<1x1x128xf32> to vector<16x16x128xf32>
    %179 = arith.mulf %174, %178 : vector<16x16x128xf32>
    %180 = arith.addf %173, %179 : vector<16x16x128xf32>
    %c0_200 = arith.constant 0 : index
    %c0_201 = arith.constant 0 : index
    %c0_202 = arith.constant 0 : index
    %181 = vector.load %arg11[%c0_200, %c0_201, %c0_202] : memref<16x16x128xf32, #tpu.memory_space<vmem>>, vector<16x16x128xf32>
    tpu.vector_store %arg11[%c0_200, %c0_201, %c0_202], %180 {strides = array<i32>} : memref<16x16x128xf32, #tpu.memory_space<vmem>>, vector<16x16x128xf32>,
    %c0_203 = arith.constant 0 : index
    %c0_204 = arith.constant 0 : index
    %c0_205 = arith.constant 0 : index
    %182 = vector.load %arg11[%c0_203, %c0_204, %c0_205] : memref<16x16x128xf32, #tpu.memory_space<vmem>>, vector<16x16x128xf32>
    %c2_206 = arith.constant 2 : index
    %c2_207 = arith.constant 2 : index
    %c0_208 = arith.constant 0 : index
    %183 = vector.load %arg10[%c2_206, %c2_207, %c0_208] : memref<18x18x128xf32, #tpu.memory_space<vmem>>, vector<16x16x128xf32>
    %c8_209 = arith.constant 8 : index
    %c0_210 = arith.constant 0 : index
    %184 = vector.load %arg7[%c8_209, %c0_210] : memref<9x128xf32, #tpu.memory_space<vmem>>, vector<1x128xf32>
    %185 = vector.shape_cast %184 : vector<1x128xf32> to vector<128xf32>
    %186 = vector.shape_cast %185 : vector<128xf32> to vector<1x1x128xf32>
    %187 = vector.broadcast %186 : vector<1x1x128xf32> to vector<16x16x128xf32>
    %188 = arith.mulf %183, %187 : vector<16x16x128xf32>
    %189 = arith.addf %182, %188 : vector<16x16x128xf32>
    %c0_211 = arith.constant 0 : index
    %c0_212 = arith.constant 0 : index
    %c0_213 = arith.constant 0 : index
    %190 = vector.load %arg11[%c0_211, %c0_212, %c0_213] : memref<16x16x128xf32, #tpu.memory_space<vmem>>, vector<16x16x128xf32>
    tpu.vector_store %arg11[%c0_211, %c0_212, %c0_213], %189 {strides = array<i32>} : memref<16x16x128xf32, #tpu.memory_space<vmem>>, vector<16x16x128xf32>,
    %c0_214 = arith.constant 0 : index
    %c0_215 = arith.constant 0 : index
    %c0_216 = arith.constant 0 : index
    %191 = vector.load %arg11[%c0_214, %c0_215, %c0_216] : memref<16x16x128xf32, #tpu.memory_space<vmem>>, vector<16x16x128xf32>
    %192 = vector.shape_cast %110 : vector<128xf32> to vector<1x1x128xf32>
    %193 = vector.broadcast %192 : vector<1x1x128xf32> to vector<16x16x128xf32>
    %194 = arith.addf %191, %193 : vector<16x16x128xf32>
    %195 = arith.addf %194, %3 : vector<16x16x128xf32>
    %cst_217 = arith.constant 0.000000e+00 : f32
    %196 = vector.broadcast %cst_217 : f32 to vector<16x16x128xf32>
    %197 = arith.subf %196, %195 : vector<16x16x128xf32>
    %198 = math.exp %197 : vector<16x16x128xf32>
    %cst_218 = arith.constant 1.000000e+00 : f32
    %199 = vector.broadcast %cst_218 : f32 to vector<16x16x128xf32>
    %200 = arith.addf %199, %198 : vector<16x16x128xf32>
    %cst_219 = arith.constant 1.000000e+00 : f32
    %201 = vector.broadcast %cst_219 : f32 to vector<16x16x128xf32>
    %202 = arith.divf %201, %200 : vector<16x16x128xf32>
    %203 = arith.mulf %195, %202 : vector<16x16x128xf32>
    %c0_220 = arith.constant 0 : index
    %c0_221 = arith.constant 0 : index
    %c0_222 = arith.constant 0 : index
    %c0_223 = arith.constant 0 : index
    %204 = vector.load %arg9[%c0_220, %c0_221, %c0_222, %c0_223] : memref<1x16x16x128xf32, #tpu.memory_space<vmem>>, vector<1x16x16x128xf32>
    %205 = vector.shape_cast %204 : vector<1x16x16x128xf32> to vector<16x16x128xf32>
    %206 = vector.shape_cast %203 : vector<16x16x128xf32> to vector<1x16x16x128xf32>
    tpu.vector_store %arg9[%c0_220, %c0_221, %c0_222, %c0_223], %206 {strides = array<i32>} : memref<1x16x16x128xf32, #tpu.memory_space<vmem>>, vector<1x16x16x128xf32>,
    return
  }
  func.func @transform_0(%arg0: i32) -> (i32, i32, i32, i32) {
    %c0_i32 = arith.constant 0 : i32
    %c0_i32_0 = arith.constant 0 : i32
    %c0_i32_1 = arith.constant 0 : i32
    %c0_i32_2 = arith.constant 0 : i32
    return %arg0, %c0_i32, %c0_i32_0, %c0_i32_1 : i32, i32, i32, i32
  }
  func.func @transform_1(%arg0: i32) -> (i32, i32) {
    %c0_i32 = arith.constant 0 : i32
    %c0_i32_0 = arith.constant 0 : i32
    %c0_i32_1 = arith.constant 0 : i32
    return %c0_i32, %c0_i32_0 : i32, i32
  }
  func.func @transform_2(%arg0: i32) -> (i32, i32) {
    %c0_i32 = arith.constant 0 : i32
    %c0_i32_0 = arith.constant 0 : i32
    %c0_i32_1 = arith.constant 0 : i32
    return %c0_i32, %c0_i32_0 : i32, i32
  }
  func.func @transform_3(%arg0: i32) -> (i32, i32) {
    %c0_i32 = arith.constant 0 : i32
    %c0_i32_0 = arith.constant 0 : i32
    %c0_i32_1 = arith.constant 0 : i32
    return %c0_i32, %c0_i32_0 : i32, i32
  }
  func.func @transform_4(%arg0: i32) -> (i32, i32) {
    %c0_i32 = arith.constant 0 : i32
    %c0_i32_0 = arith.constant 0 : i32
    %c0_i32_1 = arith.constant 0 : i32
    return %c0_i32, %c0_i32_0 : i32, i32
  }
  func.func @transform_5(%arg0: i32) -> (i32, i32) {
    %c0_i32 = arith.constant 0 : i32
    %c0_i32_0 = arith.constant 0 : i32
    %c0_i32_1 = arith.constant 0 : i32
    return %c0_i32, %c0_i32_0 : i32, i32
  }
  func.func @transform_6(%arg0: i32) -> (i32, i32) {
    %c0_i32 = arith.constant 0 : i32
    %c0_i32_0 = arith.constant 0 : i32
    %c0_i32_1 = arith.constant 0 : i32
    return %c0_i32, %c0_i32_0 : i32, i32
  }
  func.func @transform_7(%arg0: i32) -> (i32, i32) {
    %c0_i32 = arith.constant 0 : i32
    %c0_i32_0 = arith.constant 0 : i32
    %c0_i32_1 = arith.constant 0 : i32
    return %c0_i32, %c0_i32_0 : i32, i32
  }
  func.func @transform_8(%arg0: i32) -> (i32, i32, i32, i32) {
    %c0_i32 = arith.constant 0 : i32
    %c0_i32_0 = arith.constant 0 : i32
    %c0_i32_1 = arith.constant 0 : i32
    %c0_i32_2 = arith.constant 0 : i32
    return %arg0, %c0_i32, %c0_i32_0, %c0_i32_1 : i32, i32, i32, i32
  }
}

</mosaic_0001>

<bundles_post_ra>
// kernel: bottleneck_forward_pallas.1
= control target key start
LH: loop header
LB: loop body
LE: loop exit
PB: predicated region body
PF: predicated region fallthrough
CT: control target
= control target key end

     0   :  { %13 = vsyncpa [#allocation5], 0  ;;  %s9298_s0 = inlined_call_operand.hbm [shape: f32[2,16,16,128], index: 0, kind: input, shape index: {}]   ;;  %s9299_s1 = inlined_call_operand.vmem [shape: f32[9,128], index: 1, kind: input, shape index: {}]   ;;  %s9300_s2 = inlined_call_operand.vmem [shape: f32[1,128], index: 2, kind: input, shape index: {}]   ;;  %s9301_s3 = inlined_call_operand.vmem [shape: f32[128,64], index: 3, kind: input, shape index: {}]   ;;  %s9302_s4 = inlined_call_operand.vmem [shape: f32[64,128], index: 4, kind: input, shape index: {}]   ;;  %s9303_s5 = inlined_call_operand.vmem [shape: f32[1,128], index: 5, kind: input, shape index: {}]   ;;  %s9304_s6 = inlined_call_operand.vmem [shape: f32[9,128], index: 6, kind: input, shape index: {}]   ;;  %s9305_s7 = inlined_call_operand.vmem [shape: f32[1,128], index: 7, kind: input, shape index: {}]   ;;  %s9306_s8 = inlined_call_operand.hbm [shape: f32[2,16,16,128], index: 8, kind: output, shape index: {}]  }
   0x1   :  { %15 = vsyncpa [#allocation5 + $0x1], 0 }
   0x2   :  { %16 = vsyncpa [#allocation6], 0 }
   0x3   :  { %18 = vsyncpa [#allocation6 + $0x1], 0  ;;  %s5776_s27 = smov 0   ;;  %s5778_s28 = smov 0  }
   0x4   :  { %s5780_s29 = smov 0   ;;  %s5782_s30 = smov 0  }
   0x5 LB: > { %9352 = sst [smem:[#allocation10_spill]] %s5720_s29  ;;  %s5797_s9 = sadd.s32 4294967295, %s5724_s30   ;;  %s5724_s30 = sphi %s5782_s30, %s9592_s30   ;;  %s5720_s29 = sphi %s5780_s29, %s9589_s29   ;;  %s5716_s28 = sphi %s5778_s28, %s9591_s28   ;;  %s5712_s27 = sphi %s5776_s27, %s9590_s27  }
   0x6   : > { %s5186_s10 = sadd.s32 4294967294, %s5724_s30   ;;  %s5801_s11 = sadd.s32 1, %s5724_s30  }
   0x7   : > { %s31_s12 = sadd.s32 1, %s5720_s29  ;;  %s28_s13 = ssub.s32 %s5724_s30, %s5801_s11 }
   0x8   : > { %p38_p0 = scmp.ne.s32.totalorder %s5720_s29, %s5716_s28  ;;  %p29_p1 = scmp.eq.s32.totalorder %s28_s13, 0 }
   0x9   : > { %p39_p2 = scmp.eq.s32.totalorder %s5724_s30, 0  ;;  %p44_p3 = scmp.ne.s32.totalorder %s5716_s28, %s5712_s27 }
   0xa   : > { %p45_p4 = scmp.eq.s32.totalorder %s5797_s9, 0  ;;  %p215_p7 = scmp.eq.s32.totalorder %s5797_s9, 1 }
   0xb   : > { %s5813_s14 = scalar_select %p29_p1, %s5720_s29, %s31_s12  }
   0xc   : > { %p5815_p5 = por %p39_p2, %p38_p0  ;;  %p5819_p6 = por %p45_p4, %p44_p3 }
   0xd   : > { %9353 = sst [smem:[#allocation11_spill]] %s5813_s14  ;;  %p221_p8 = scmp.eq.s32.totalorder %s5186_s10, 1 }
   0xe   : > { %p5270_p10 = scmp.lt.s32.totalorder %s5724_s30, 2  ;;  %p5826_p11 = por %p215_p7, %p38_p0 }
   0xf   : > { %p5830_p12 = por %p221_p8, %p44_p3  ;;  %s262_s19 = sand.u32 1, %s5720_s29  }
  0x10   : > { %s5232_s20 = sshll.u32 %s5724_s30, 8  ;;  %s5189_s21 = sshll.u32 %s262_s19, 8 }
  0x11   : > { %s271_s24 = scalar_lea.hbm %s9298_s0, %s5232_s20  ;;  %s266_s26 = scalar_lea.vmem [#allocation4], %s5189_s21 }
  0x12   : > { %s272_s25 = sshll.u32 %s271_s24, 4  ;;  %s274_s10 = sshll.u32 %s266_s26, 4  ;;  %s273_s25 = int_to_ptr.hbm [resolvable:$true] %s272_s25  ;;  %s275_s10 = int_to_ptr.vmem [resolvable:$true] %s274_s10 }
  0x13   : > { %p5841_p13 = pnand %p5270_p10, %p5815_p5  ;;  %p5192_p0 = scmp.ge.s32.totalorder %s5724_s30, 1 }
  0x14   : > { %p282_p1 = scmp.lt.s32.totalorder %s5724_s30, 3  ;;  %s263_s13 = scalar_lea.sflag [#allocation5], %s262_s19 }
  0x15   : > { %s5628_s14 = sshra.s32 %s273_s25, 4  ;;  %p5632_p3 = pneg %p5841_p13  ;;  %s5629_s14 = int_to_ptr.hbm [resolvable:$true] %s5628_s14 }
  0x16   : > { %s5630_s29 = scalar_lea.hbm %s5629_s14, 256  ;;  %s5635_s15 = scalar_lea.hbm %s9298_s0, 512 }
  0x17   : > { %p5631_p2 = scmp.ne.s32.totalorder %s5629_s14, %s5630_s29  ;;  %p5636_p5 = scmp.lt.s32.totalorder %s5629_s14, %s9298_s0 }
  0x18   : > { %p5637_p8 = scmp.lt.s32.totalorder %s5635_s15, %s5630_s29 }
  0x19   : > { %p5633_p4 = pnand %p5632_p3, %p5631_p2 }
  0x1a   : > { %p5638_p10 = por %p5637_p8, %p5636_p5 }
  0x1b   : > { %p5634_p7 = pneg %p5633_p4 }
  0x1d   : > { %p5639_p9 = pnand %p5638_p10, %p5634_p7 }
  0x1f   : > { %5642 = shalt.err (!%p5639_p9)
}
  0x20   : > { %s5726_s19 = smov 128   ;;  %s5727_s24 = smov 8  }
  0x21   : > { %5265 = dma.hbm_to_vmem [thread:$0]  (!%p5841_p13), %s273_s25, 4096, %s275_s10, %s263_s13, %s5726_s19, %s5726_s19, %s5727_s24  }
  0x22   : > { %p283_p2 = pnand %p5192_p0, %p282_p1 }
  0x24   : > { %286 = sbr.rel (%p283_p2) target bundleno = 774 (0x306), region = 52 }
  0x29   : > { %s5862_s26 = sand.u32 1, %s5716_s28  }
  0x2a   : > { %s5193_s29 = sshll.u32 %s5862_s26, 8  ;;  %s289_s14 = scalar_lea.sflag [#allocation5], %s5862_s26 }
  0x2b   : > { %s5868_s20 = scalar_lea.vmem [#allocation4], %s5193_s29 }
  0x2c   : > { %5703 = dma.done.wait (%p5819_p6), %s289_s14, 4096  }
  0x2d   : > { %5705 = vsyncadd (%p5819_p6), %s289_s14, 4294963200  ;;  %v5728_v0 = vmov 0.0   ;;  %v1923_v1 = vld [vmem:[%s9301_s3 + $0x78] sm:$0xff]  ;;  %v1922_v2 = vld [vmem:[%s9301_s3 + $0x70] sm:$0xff]  ;;  %vm2689_vm5 = vcmask 523264   ;;  %s7805_s21 = scalar_lea.vmem [#allocation7], %s5193_s29 }
  0x2e   : > { %326 = vst [vmem:[#allocation2] sm:$0xff] %v5728_v0  ;;  %1924 = vmatpush.msra.mxu0 %v1923_v1  ;;  %5234 = vmatpush.msra.mxu2 %v1923_v1  ;;  %v1921_v3 = vld [vmem:[%s9301_s3 + $0x68] sm:$0xff]  ;;  %v1920_v4 = vld [vmem:[%s9301_s3 + $0x60] sm:$0xff]  ;;  %v1919_v5 = vld [vmem:[%s9301_s3 + $0x58] sm:$0xff]  ;;  %s5233_s19 = sshll.u32 %s5797_s9, 8  ;;  %s5110_s25 = sshll.u32 %s7805_s21, 4  ;;  %s5111_s25 = int_to_ptr.vmem [resolvable:$true] %s5110_s25 }
  0x2f   : > { %327 = vst [vmem:[#allocation2 + $0x8] sm:$0xff] %v5728_v0  ;;  %v5901_v6 = vld [vmem:[%s5868_s20] sm:$0xff]  ;;  %v5904_v7 = vld [vmem:[%s5868_s20 + $0x8] sm:$0xff]  ;;  %v5911_v9 = vld [vmem:[%s5868_s20 + $0x10] sm:$0xff]  ;;  %s9254_s14 = scalar_lea.hbm %s9306_s8, %s5233_s19  ;;  %s5098_s12 = scalar_lea.sflag [#allocation6], %s5862_s26 }
  0x30   : > { %329 = vst [vmem:[#allocation2 + $0x18] sm:$0xff] %v5728_v0  ;;  %1925 = vmatpush.msra.mxu0 %v1922_v2  ;;  %5235 = vmatpush.msra.mxu2 %v1922_v2  ;;  %v1918_v8 = vld [vmem:[%s9301_s3 + $0x50] sm:$0xff]  ;;  %v5914_v10 = vld [vmem:[%s5868_s20 + $0x18] sm:$0xff]  ;;  %v5921_v11 = vld [vmem:[%s9299_s1] ss:$0 sm:$0xff]  ;;  %s5112_s10 = sshll.u32 %s9254_s14, 4  ;;  %s5113_s10 = int_to_ptr.hbm [resolvable:$true] %s5112_s10 }
  0x31   : > { %330 = vst [vmem:[#allocation2 + $0x20] sm:$0xff] %v5728_v0  ;;  %v5927_v13 = vld [vmem:[%s9299_s1 + $0x1] ss:$0 sm:$0xff]  ;;  %v1917_v15 = vld [vmem:[%s9301_s3 + $0x48] sm:$0xff]  ;;  %v5934_v16 = vmul.f32 0.0, %v5921_v11  ;;  %v1915_v25 = vld [vmem:[%s9301_s3 + $0x38] sm:$0xff] }
  0x32   : > { %331 = vst [vmem:[#allocation2 + $0x28] sm:$0x3] %v5728_v0  ;;  %1926 = vmatpush.msra.mxu0 %v1921_v3  ;;  %5236 = vmatpush.msra.mxu2 %v1921_v3  ;;  %v5939_v17 = vld [vmem:[%s9299_s1 + $0x2] ss:$0 sm:$0xff]  ;;  %v5945_v19 = vld [vmem:[%s9299_s1 + $0x3] ss:$0 sm:$0xff] }
  0x33   : > { %332 = vst [vmem:[#allocation2 + $0x30] sm:$0xff] %v5728_v0  ;;  %v1916_v20 = vld [vmem:[%s9301_s3 + $0x40] sm:$0xff]  ;;  %v1914_v35 = vld [vmem:[%s9301_s3 + $0x30] sm:$0xff]  ;;  %v1913_v41 = vld [vmem:[%s9301_s3 + $0x28] sm:$0xff]  ;;  %s5672_s16 = sshra.s32 %s5113_s10, 4  ;;  %s5678_s15 = scalar_lea.hbm %s9306_s8, 512  ;;  %s5673_s16 = int_to_ptr.hbm [resolvable:$true] %s5672_s16 }
  0x34   : > { %333 = vst [vmem:[#allocation2 + $0x38] sm:$0xff] %v5728_v0  ;;  %1927 = vmatpush.msra.mxu0 %v1920_v4  ;;  %5237 = vmatpush.msra.mxu2 %v1920_v4  ;;  %v5954_v22 = vld [vmem:[%s9299_s1 + $0x4] ss:$0 sm:$0xff]  ;;  %v5960_v24 = vld [vmem:[%s9299_s1 + $0x5] ss:$0 sm:$0xff]  ;;  %v1911_v52 = vld [vmem:[%s9301_s3 + $0x18] sm:$0xff]  ;;  %p5679_p0 = scmp.lt.s32.totalorder %s5673_s16, %s9306_s8 }
  0x35   : > { %334 = vst [vmem:[#allocation2 + $0x40] sm:$0x3] %v5728_v0  ;;  %v1096_v29 = vmul.f32 %v5954_v22, %v5901_v6  ;;  %v5977_v31 = vld [vmem:[%s9299_s1 + $0x6] ss:$0 sm:$0xff]  ;;  %v5982_v32 = vld [vmem:[%s9299_s1 + $0x7] ss:$0 sm:$0xff] }
  0x36   : > { %328 = vst [vmem:[#allocation2 + $0x10] sm:$0x3] %v5728_v0  ;;  %v576_v12 = vld [vmem:[#allocation2 + $0x1] sm:$0xff]  ;;  %1928 = vmatpush.msra.mxu0 %v1919_v5  ;;  %5238 = vmatpush.msra.mxu2 %v1919_v5  ;;  %v5319_v34 = vld [vmem:[%s9304_s6] ss:$0 sm:$0xff]  ;;  %v1583_v50 = vmul.f32 %v5982_v32, %v5911_v9  ;;  %v1910_v56 = vld [vmem:[%s9301_s3 + $0x10] sm:$0xff] }
  0x37   : > { %335 = vst [vmem:[#allocation2 + $0x48] sm:$0xff] %v5728_v0  ;;  %v738_v14 = vld [vmem:[#allocation2 + $0x2] sm:$0xff]  ;;  %v610_v18 = vmul.f32 %v5927_v13, %v576_v12  ;;  %v5999_v38 = vld [vmem:[%s9304_s6 + $0x1] ss:$0 sm:$0xff]  ;;  %v6002_v39 = vmul.f32 0.0, %v5319_v34  ;;  %s5674_s13 = scalar_lea.hbm %s5673_s16, 256 }
  0x38   : > { %336 = vst [vmem:[#allocation2 + $0x50] sm:$0xff] %v5728_v0  ;;  %1929 = vmatpush.msra.mxu0 %v1918_v8  ;;  %5239 = vmatpush.msra.mxu2 %v1918_v8  ;;  %v772_v21 = vmul.f32 %v5939_v17, %v738_v14  ;;  %v6007_v40 = vld [vmem:[%s9304_s6 + $0x2] ss:$0 sm:$0xff]  ;;  %v6018_v44 = vld [vmem:[%s9299_s1 + $0x8] ss:$0 sm:$0xff]  ;;  %v3096_v45 = vmul.f32 %v5999_v38, %v576_v12  ;;  %p5675_p6 = scmp.ne.s32.totalorder %s5673_s16, %s5674_s13  ;;  %p5680_p1 = scmp.lt.s32.totalorder %s5678_s15, %s5674_s13 }
  0x39   : > { %9359 = vst [vmem:[#allocation12_spill] sm:$0xff] %v5901_v6  ;;  %v642_v23 = vadd.f32 %v610_v18, %v5934_v16  ;;  %v3258_v47 = vmul.f32 %v6007_v40, %v738_v14  ;;  %v1912_v48 = vld [vmem:[%s9301_s3 + $0x20] sm:$0xff]  ;;  %v1909_v59 = vld [vmem:[%s9301_s3 + $0x8] sm:$0xff] }
  0x3a   : > { %9360 = vst [vmem:[#allocation13_spill] sm:$0xff] %v5904_v7  ;;  %1930 = vmatpush.msra.mxu0 %v1917_v15  ;;  %5240 = vmatpush.msra.mxu2 %v1917_v15  ;;  %v3128_v51 = vadd.f32 %v3096_v45, %v6002_v39  ;;  %v6049_v58 = vld [vmem:[%s9300_s2] ss:$0 sm:$0xff]  ;;  %v1097_v15 = vmul.f32 %v5954_v22, %v5904_v7  ;;  %p5676_p9 = pnand %p5675_p6, %p5826_p11  ;;  %p5681_p3 = por %p5680_p1, %p5679_p0 }
  0x3b   : > { %337 = vst [vmem:[#allocation2 + $0x58] sm:$0x3] %v5728_v0  ;;  %v804_v27 = vadd.f32 %v772_v21, %v642_v23  ;;  %v1908_v61 = vld [vmem:[%s9301_s3] sm:$0xff]  ;;  %v612_v23 = vmul.f32 %v5927_v13, %v5901_v6 }
  0x3c   : > { %9361 = vst [vmem:[#allocation14_spill] sm:$0xff] %v5911_v9  ;;  %1931 = vmatpush.msra.mxu0 %v1916_v20  ;;  %5241 = vmatpush.msra.mxu2 %v1916_v20  ;;  %v6039_v55 = vadd.f32 %v3258_v47, %v3128_v51  ;;  %v1098_v51 = vmul.f32 %v5954_v22, %v5911_v9  ;;  %p5677_p13 = pneg %p5676_p9 }
  0x3d   : > { %9362 = vst [vmem:[#allocation15_spill] sm:$0xff] %v5914_v10  ;;  %v577_v63 = vld [vmem:[#allocation2 + $0x9] sm:$0xff] }
  0x3e   : > { %414 = vst [vmem:[#allocation2 + $0x19] sm:$0xff] %v5901_v6  ;;  %1932 = vmatpush.msra.mxu0 %v1915_v25  ;;  %5242 = vmatpush.msra.mxu2 %v1915_v25  ;;  %v611_v1 = vmul.f32 %v5927_v13, %v577_v63  ;;  %v739_v2 = vld [vmem:[#allocation2 + $0xa] sm:$0xff]  ;;  %p5682_p4 = pnand %p5681_p3, %p5677_p13 }
  0x3f   : > { %415 = vst [vmem:[#allocation2 + $0x21] sm:$0xff] %v5904_v7  ;;  %v773_v4 = vmul.f32 %v5939_v17, %v739_v2 }
  0x40   : > { %416 = vst [vmem:[#allocation2 + $0x31] sm:$0xff] %v5911_v9  ;;  %1933 = vmatpush.msra.mxu0 %v1914_v35  ;;  %5243 = vmatpush.msra.mxu2 %v1914_v35  ;;  %v643_v3 = vadd.f32 %v611_v1, %v5934_v16 }
  0x41   : > { %417 = vst [vmem:[#allocation2 + $0x39] sm:$0xff] %v5914_v10 }
  0x42   : > { %338 = vst [vmem:[#allocation2 + $0x60] sm:$0xff] %v5728_v0  ;;  %1934 = vmatpush.msra.mxu0 %v1913_v41  ;;  %5244 = vmatpush.msra.mxu2 %v1913_v41  ;;  %v805_v8 = vadd.f32 %v773_v4, %v643_v3  ;;  %v3097_v41 = vmul.f32 %v5999_v38, %v577_v63 }
  0x43   : > { %339 = vst [vmem:[#allocation2 + $0x68] sm:$0xff] %v5728_v0 }
  0x44   : > { %341 = vst [vmem:[#allocation2 + $0x78] sm:$0xff] %v5728_v0  ;;  %1935 = vmatpush.msra.mxu0 %v1912_v48  ;;  %5245 = vmatpush.msra.mxu2 %v1912_v48  ;;  %v6123_v48 = vld [vmem:[%s5868_s20 + $0x70] sm:$0xff]  ;;  %v3129_v38 = vadd.f32 %v3097_v41, %v6002_v39  ;;  %v6140_v39 = vld [vmem:[%s5868_s20 + $0x88] sm:$0xff] }
  0x45   : > { %v5965_v26 = vld [vmem:[#allocation2 + $0x18] sm:$0xff]  ;;  %342 = vst [vmem:[#allocation2 + $0x80] sm:$0xff] %v5728_v0 }
  0x46   : > { %v934_v28 = vmul.f32 %v5945_v19, %v5965_v26  ;;  %v5972_v30 = vld [vmem:[#allocation2 + $0x1a] sm:$0xff]  ;;  %340 = vst [vmem:[#allocation2 + $0x70] sm:$0x3] %v5728_v0  ;;  %1936 = vmatpush.msra.mxu0 %v1911_v52  ;;  %5246 = vmatpush.msra.mxu2 %v1911_v52  ;;  %v1225_v16 = vld [vmem:[#allocation2 + $0x22] sm:$0xff]  ;;  %v482_v21 = vmul.f32 %v5921_v11, %v5965_v26  ;;  %v6105_v26 = vld [vmem:[%s5868_s20 + $0x60] sm:$0xff] }
  0x47   : > { %v5985_v33 = vld [vmem:[#allocation2 + $0x30] sm:$0xff]  ;;  %v1258_v37 = vmul.f32 %v5960_v24, %v5972_v30  ;;  %343 = vst [vmem:[#allocation2 + $0x88] sm:$0x3] %v5728_v0  ;;  %v901_v5 = vld [vmem:[#allocation2 + $0x20] sm:$0xff]  ;;  %v1259_v20 = vmul.f32 %v5960_v24, %v1225_v16  ;;  %v774_v34 = vmul.f32 %v5939_v17, %v5972_v30  ;;  %v6115_v30 = vld [vmem:[%s5868_s20 + $0x68] sm:$0xff] }
  0x48   : > { %v966_v36 = vadd.f32 %v934_v28, %v804_v27  ;;  %v1421_v43 = vmul.f32 %v5977_v31, %v5985_v33  ;;  %v6022_v46 = vld [vmem:[#allocation2 + $0x32] sm:$0xff]  ;;  %344 = vst [vmem:[#allocation2 + $0x90] sm:$0xff] %v5728_v0  ;;  %1937 = vmatpush.msra.mxu0 %v1910_v56  ;;  %5247 = vmatpush.msra.mxu2 %v1910_v56 }
  0x49   : > { %345 = vst [vmem:[#allocation2 + $0x98] sm:$0xff] %v5728_v0  ;;  %v1745_v54 = vmul.f32 %v6018_v44, %v6022_v46  ;;  %v935_v12 = vmul.f32 %v5945_v19, %v901_v5  ;;  %v6095_v25 = vld [vmem:[#allocation2 + $0x38] sm:$0xff]  ;;  %v936_v47 = vmul.f32 %v5945_v19, %v5985_v33  ;;  %v6133_v52 = vld [vmem:[%s5868_s20 + $0x80] sm:$0xff]  ;;  %v613_v56 = vmul.f32 %v5927_v13, %v5904_v7 }
  0x4a   : > { %v1128_v42 = vadd.f32 %v1096_v29, %v966_v36  ;;  %346 = vst [vmem:[#allocation2 + $0xa0] sm:$0x3] %v5728_v0  ;;  %1938 = vmatpush.msra.mxu0 %v1909_v59  ;;  %5248 = vmatpush.msra.mxu2 %v1909_v59  ;;  %v1422_v28 = vmul.f32 %v5977_v31, %v6095_v25  ;;  %v6148_v59 = vld [vmem:[%s5868_s20 + $0x90] sm:$0xff] }
  0x4b   : > { %9363 = vst [vmem:[#allocation16_spill] sm:$0xff] %v6039_v55  ;;  %v967_v14 = vadd.f32 %v935_v12, %v805_v8  ;;  %v644_v29 = vadd.f32 %v612_v23, %v482_v21  ;;  %v1584_v36 = vmul.f32 %v5982_v32, %v5914_v10  ;;  %v1260_v63 = vmul.f32 %v5960_v24, %v6022_v46  ;;  %v6171_v8 = vld [vmem:[%s5868_s20 + $0x28] sm:$0xff] }
  0x4c   : > { %v1290_v49 = vadd.f32 %v1258_v37, %v1128_v42  ;;  %347 = vst [vmem:[#allocation2 + $0xa8] sm:$0xff] %v5728_v0  ;;  %1939 = vmatpush.msra.mxu0 %v1908_v61  ;;  %5249 = vmatpush.msra.mxu2 %v1908_v61  ;;  %v6109_v37 = vld [vmem:[#allocation2 + $0x3a] sm:$0xff]  ;;  %v3259_v42 = vmul.f32 %v6007_v40, %v739_v2  ;;  %v6127_v40 = vld [vmem:[%s5868_s20 + $0x78] sm:$0xff]  ;;  %v6159_v2 = vld [vmem:[%s5868_s20 + $0x20] sm:$0xff] }
  0x4d   : > { %348 = vst [vmem:[#allocation2 + $0xb0] sm:$0xff] %v5728_v0  ;;  %v1129_v18 = vadd.f32 %v1097_v15, %v967_v14  ;;  %v806_v45 = vadd.f32 %v774_v34, %v644_v29  ;;  %v6153_v61 = vld [vmem:[%s5868_s20 + $0x98] sm:$0xff]  ;;  %v937_v3 = vmul.f32 %v5945_v19, %v6095_v25  ;;  %v625_v4 = vmul.f32 %v5927_v13, %v6115_v30  ;;  %v6199_v34 = vld [vmem:[%s5868_s20 + $0xa8] sm:$0xff] }
  0x4e   : > { %v1453_v53 = vadd.f32 %v1421_v43, %v1290_v49  ;;  %349 = vst [vmem:[#allocation2 + $0xb8] sm:$0x3] %v5728_v0  ;;  %v1746_v43 = vmul.f32 %v6018_v44, %v6109_v37  ;;  %v6175_v14 = vmul.f32 %v5982_v32, %v6140_v39  ;;  %v626_v15 = vmul.f32 %v5927_v13, %v6123_v48 }
  0x4f   : > { %350 = vst [vmem:[#allocation2 + $0xc0] sm:$0xff] %v5728_v0  ;;  %v1291_v27 = vadd.f32 %v1259_v20, %v1129_v18  ;;  %v627_v18 = vmul.f32 %v5927_v13, %v6127_v40  ;;  %v6187_v20 = vld [vmem:[%s5868_s20 + $0xa0] sm:$0xff]  ;;  %v6196_v29 = vmul.f32 %v5954_v22, %v6140_v39 }
  0x50   : > { %v1615_v57 = vadd.f32 %v1583_v50, %v1453_v53  ;;  %351 = vst [vmem:[#allocation2 + $0xc8] sm:$0xff] %v5728_v0  ;;  %v968_v50 = vadd.f32 %v936_v47, %v806_v45  ;;  %v6136_v53 = vadd.f32 %v3259_v42, %v3129_v38  ;;  %v1099_v45 = vmul.f32 %v5954_v22, %v5914_v10 }
  0x51   : > { %352 = vst [vmem:[#allocation2 + $0xd0] sm:$0x3] %v5728_v0  ;;  %v1454_v35 = vadd.f32 %v1422_v28, %v1291_v27  ;;  %v6191_v27 = vmul.f32 %v5982_v32, %v6148_v59 }
  0x52   : > { %v1777_v60 = vadd.f32 %v1745_v54, %v1615_v57  ;;  %353 = vst [vmem:[#allocation2 + $0xd8] sm:$0xff] %v5728_v0  ;;  %v483_v54 = vmul.f32 %v5921_v11, %v901_v5  ;;  %v6167_v5 = vmul.f32 %v5954_v22, %v6127_v40 }
  0x53   : > { %354 = vst [vmem:[#allocation2 + $0xe0] sm:$0xff] %v5728_v0  ;;  %v1616_v49 = vadd.f32 %v1584_v36, %v1454_v35  ;;  %v6203_v35 = vmul.f32 %v5927_v13, %v6133_v52 }
  0x54   : > { %v1876_v62 = vadd.f32 %v6049_v58, %v1777_v60  ;;  %355 = vst [vmem:[#allocation2 + $0xe8] sm:$0x3] %v5728_v0  ;;  %v775_v60 = vmul.f32 %v5939_v17, %v1225_v16  ;;  %v645_v1 = vadd.f32 %v613_v56, %v483_v54  ;;  %v6182_v16 = vmul.f32 %v5954_v22, %v6133_v52 }
  0x55   : > { %356 = vst [vmem:[#allocation2 + $0xf0] sm:$0xff] %v5728_v0  ;;  %v1261_v54 = vmul.f32 %v5960_v24, %v6109_v37 }
  0x56   : > { %1940 = vmatmul.f32.vlgmr.msra.gmra.mxu0 %v1876_v62  ;;  %357 = vst [vmem:[#allocation2 + $0xf8] sm:$0xff] %v5728_v0  ;;  %v1130_v62 = vadd.f32 %v1098_v51, %v968_v50  ;;  %v807_v12 = vadd.f32 %v775_v60, %v645_v1  ;;  %v1585_v51 = vmul.f32 %v5982_v32, %v6159_v2 }
  0x57   : > { %358 = vst [vmem:[#allocation2 + $0x100] sm:$0x3] %v5728_v0  ;;  %v6228_v1 = vmul.f32 %v5921_v11, %v5985_v33 }
  0x58   : > { %359 = vst [vmem:[#allocation2 + $0x108] sm:$0xff] %v5728_v0  ;;  %v1292_v28 = vadd.f32 %v1260_v63, %v1130_v62  ;;  %v6224_v63 = vld [vmem:[%s5868_s20 + $0x30] sm:$0xff] }
  0x59   : > { %360 = vst [vmem:[#allocation2 + $0x110] sm:$0xff] %v5728_v0 }
  0x5a   : > { %361 = vst [vmem:[#allocation2 + $0x118] sm:$0x3] %v5728_v0 }
  0x5b   : > { %362 = vst [vmem:[#allocation2 + $0x120] sm:$0xff] %v5728_v0 }
  0x5c   : > { %363 = vst [vmem:[#allocation2 + $0x128] sm:$0xff] %v5728_v0 }
  0x5d   : > { %364 = vst [vmem:[#allocation2 + $0x130] sm:$0x3] %v5728_v0 }
  0x5e   : > { %365 = vst [vmem:[#allocation2 + $0x138] sm:$0xff] %v5728_v0 }
  0x5f   : > { %366 = vst [vmem:[#allocation2 + $0x140] sm:$0xff] %v5728_v0 }
  0x60   : > { %367 = vst [vmem:[#allocation2 + $0x148] sm:$0x3] %v5728_v0 }
  0x61   : > { %368 = vst [vmem:[#allocation2 + $0x150] sm:$0xff] %v5728_v0 }
  0x62   : > { %369 = vst [vmem:[#allocation2 + $0x158] sm:$0xff] %v5728_v0 }
  0x63   : > { %370 = vst [vmem:[#allocation2 + $0x160] sm:$0x3] %v5728_v0 }
  0x64   : > { %371 = vst [vmem:[#allocation2 + $0x168] sm:$0xff] %v5728_v0 }
  0x65   : > { %372 = vst [vmem:[#allocation2 + $0x170] sm:$0xff] %v5728_v0 }
  0x66   : > { %373 = vst [vmem:[#allocation2 + $0x178] sm:$0x3] %v5728_v0 }
  0x67   : > { %374 = vst [vmem:[#allocation2 + $0x180] sm:$0xff] %v5728_v0 }
  0x68   : > { %375 = vst [vmem:[#allocation2 + $0x188] sm:$0xff] %v5728_v0 }
  0x69   : > { %376 = vst [vmem:[#allocation2 + $0x190] sm:$0x3] %v5728_v0 }
  0x6a   : > { %377 = vst [vmem:[#allocation2 + $0x198] sm:$0xff] %v5728_v0 }
  0x6b   : > { %9364 = vst [vmem:[#allocation17_spill] sm:$0xff] %v6105_v26 }
  0x6c   : > { %9365 = vst [vmem:[#allocation18_spill] sm:$0xff] %v6109_v37  ;;  %v1586_v37 = vmul.f32 %v5982_v32, %v6171_v8 }
  0x6d   : > { %378 = vst [vmem:[#allocation2 + $0x1a0] sm:$0xff] %v5728_v0 }
  0x6e   : > { %9366 = vst [vmem:[#allocation19_spill] sm:$0xff] %v6115_v30 }
  0x6f   : > { %379 = vst [vmem:[#allocation2 + $0x1a8] sm:$0x3] %v5728_v0  ;;  %v1778_v0 = vadd.f32 %v1746_v43, %v1616_v49  ;;  %v969_v43 = vadd.f32 %v937_v3, %v807_v12 }
  0x70   : > { %9367 = vst [vmem:[#allocation20_spill] sm:$0xff] %v6123_v48 }
  0x71   : > { %9368 = vst [vmem:[#allocation21_spill] sm:$0xff] %v6127_v40  ;;  %v1877_v57 = vadd.f32 %v6049_v58, %v1778_v0  ;;  %v6215_v0 = vmul.f32 %v5982_v32, %v6153_v61 }
  0x72   : > { %426 = vst [vmem:[#allocation2 + $0xa9] sm:$0xff] %v6105_v26 }
  0x73   : > { %9369 = vst [vmem:[#allocation22_spill] sm:$0xff] %v6133_v52  ;;  %1943 = vmatmul.f32.gmra.mxu0 %v1877_v57 }
  0x74   : > { %427 = vst [vmem:[#allocation2 + $0xb1] sm:$0xff] %v6115_v30 }
  0x75   : > { %9370 = vst [vmem:[#allocation23_spill] sm:$0xff] %v6136_v53 }
  0x76   : > { %9371 = vst [vmem:[#allocation24_spill] sm:$0xff] %v6140_v39 }
  0x77   : > { %428 = vst [vmem:[#allocation2 + $0xc1] sm:$0xff] %v6123_v48 }
  0x78   : > { %429 = vst [vmem:[#allocation2 + $0xc9] sm:$0xff] %v6127_v40  ;;  %v1131_v40 = vadd.f32 %v1099_v45, %v969_v43  ;;  %v6257_v45 = vld [vmem:[%s5868_s20 + $0x38] sm:$0xff] }
  0x79   : > { %9372 = vst [vmem:[#allocation25_spill] sm:$0xff] %v6148_v59 }
  0x7a   : > { %430 = vst [vmem:[#allocation2 + $0xd9] sm:$0xff] %v6133_v52 }
  0x7b   : > { %9373 = vst [vmem:[#allocation26_spill] sm:$0xff] %v6153_v61  ;;  %v461_v21 = vld [vmem:[#allocation2 + $0xb0] sm:$0xff] }
  0x7c   : > { %431 = vst [vmem:[#allocation2 + $0xe1] sm:$0xff] %v6140_v39  ;;  %v753_v23 = vld [vmem:[#allocation2 + $0xb2] sm:$0xff]  ;;  %v495_v36 = vmul.f32 %v5921_v11, %v461_v21 }
  0x7d   : > { %9374 = vst [vmem:[#allocation27_spill] sm:$0xff] %v6159_v2  ;;  %v787_v41 = vmul.f32 %v5939_v17, %v753_v23 }
  0x7e   : > { %432 = vst [vmem:[#allocation2 + $0xf1] sm:$0xff] %v6148_v59  ;;  %v462_v42 = vld [vmem:[#allocation2 + $0xc0] sm:$0xff]  ;;  %v657_v56 = vadd.f32 %v625_v4, %v495_v36 }
  0x7f   : > { %433 = vst [vmem:[#allocation2 + $0xf9] sm:$0xff] %v6153_v61  ;;  %v915_v47 = vld [vmem:[#allocation2 + $0xc8] sm:$0xff]  ;;  %v496_v38 = vmul.f32 %v5921_v11, %v462_v42  ;;  %v6279_v61 = vld [vmem:[%s5868_s20 + $0xb0] sm:$0xff] }
  0x80   : > { %418 = vst [vmem:[#allocation2 + $0x49] sm:$0xff] %v6159_v2  ;;  %v1239_v49 = vld [vmem:[#allocation2 + $0xca] sm:$0xff]  ;;  %v754_v50 = vld [vmem:[#allocation2 + $0xc2] sm:$0xff]  ;;  %v949_v57 = vmul.f32 %v5945_v19, %v915_v47  ;;  %v497_v36 = vmul.f32 %v5921_v11, %v915_v47 }
  0x81   : > { %9375 = vst [vmem:[#allocation28_spill] sm:$0xff] %v6199_v34  ;;  %v788_v60 = vmul.f32 %v5939_v17, %v754_v50  ;;  %v916_v62 = vld [vmem:[#allocation2 + $0xd8] sm:$0xff]  ;;  %v658_v21 = vadd.f32 %v626_v15, %v496_v38  ;;  %v789_v42 = vmul.f32 %v5939_v17, %v1239_v49  ;;  %v819_v50 = vadd.f32 %v787_v41, %v657_v56 }
  0x82   : > { %419 = vst [vmem:[#allocation2 + $0x51] sm:$0xff] %v6171_v8  ;;  %v950_v4 = vmul.f32 %v5945_v19, %v916_v62  ;;  %v1273_v52 = vmul.f32 %v5960_v24, %v1239_v49  ;;  %v659_v30 = vadd.f32 %v627_v18, %v497_v36 }
  0x83   : > { %434 = vst [vmem:[#allocation2 + $0x109] sm:$0xff] %v6187_v20  ;;  %v6230_v3 = vld [vmem:[#allocation2 + $0xe0] sm:$0xff]  ;;  %v820_v38 = vadd.f32 %v788_v60, %v658_v21  ;;  %v981_v7 = vadd.f32 %v949_v57, %v819_v50 }
  0x84   : > { %435 = vst [vmem:[#allocation2 + $0x111] sm:$0xff] %v6199_v34  ;;  %v6232_v12 = vld [vmem:[#allocation2 + $0xe2] sm:$0xff]  ;;  %v1240_v23 = vld [vmem:[#allocation2 + $0xda] sm:$0xff]  ;;  %v1436_v33 = vmul.f32 %v5977_v31, %v6230_v3  ;;  %v951_v47 = vmul.f32 %v5945_v19, %v6230_v3  ;;  %v821_v57 = vadd.f32 %v789_v42, %v659_v30 }
  0x85   : > { %420 = vst [vmem:[#allocation2 + $0x61] sm:$0xff] %v6224_v63  ;;  %v6241_v48 = vld [vmem:[#allocation2 + $0xf0] sm:$0xff]  ;;  %v1760_v15 = vmul.f32 %v6018_v44, %v6232_v12  ;;  %v1274_v41 = vmul.f32 %v5960_v24, %v1240_v23  ;;  %v1275_v43 = vmul.f32 %v5960_v24, %v6232_v12  ;;  %v982_v60 = vadd.f32 %v950_v4, %v820_v38 }
  0x86   : > { %v6247_v26 = vld [vmem:[#allocation2 + $0xf8] sm:$0xff]  ;;  %v1437_v49 = vmul.f32 %v5977_v31, %v6241_v48  ;;  %9376 = vst [vmem:[#allocation29_spill] sm:$0xff] %v6257_v45  ;;  %v1143_v53 = vadd.f32 %v6167_v5, %v981_v7  ;;  %v1293_v38 = vadd.f32 %v1261_v54, %v1131_v40  ;;  %v983_v34 = vadd.f32 %v951_v47, %v821_v57 }
  0x87   : > { %v6252_v56 = vld [vmem:[#allocation2 + $0x48] sm:$0xff]  ;;  %v1438_v36 = vmul.f32 %v5977_v31, %v6247_v26  ;;  %421 = vst [vmem:[#allocation2 + $0x69] sm:$0xff] %v6257_v45  ;;  %v1144_v30 = vadd.f32 %v6182_v16, %v982_v60  ;;  %v498_v5 = vmul.f32 %v5921_v11, %v916_v62  ;;  %v6285_v54 = vld [vmem:[#allocation2 + $0xf2] sm:$0xff]  ;;  %v790_v47 = vmul.f32 %v5939_v17, %v1240_v23 }
  0x88   : > { %v1423_v18 = vmul.f32 %v5977_v31, %v6252_v56  ;;  %9377 = vst [vmem:[#allocation30_spill] sm:$0xff] %v6279_v61  ;;  %v1305_v10 = vadd.f32 %v1273_v52, %v1143_v53  ;;  %v952_v53 = vmul.f32 %v5945_v19, %v6241_v48 }
  0x89   : > { %v6261_v21 = vld [vmem:[#allocation2 + $0x4a] sm:$0xff]  ;;  %v6267_v6 = vld [vmem:[#allocation2 + $0x52] sm:$0xff]  ;;  %436 = vst [vmem:[#allocation2 + $0x121] sm:$0xff] %v6279_v61  ;;  %v1306_v40 = vadd.f32 %v1274_v41, %v1144_v30  ;;  %v660_v52 = vadd.f32 %v6203_v35, %v498_v5  ;;  %v614_v41 = vmul.f32 %v5927_v13, %v5911_v9  ;;  %v1276_v30 = vmul.f32 %v5960_v24, %v6285_v54 }
  0x8a   : > { %v6265_v50 = vld [vmem:[#allocation2 + $0x50] sm:$0xff]  ;;  %v1747_v4 = vmul.f32 %v6018_v44, %v6261_v21  ;;  %v1455_v42 = vadd.f32 %v1423_v18, %v1292_v28  ;;  %v1748_v7 = vmul.f32 %v6018_v44, %v6267_v6  ;;  %v1145_v28 = vadd.f32 %v6196_v29, %v983_v34  ;;  %v6289_v18 = vld [vmem:[#allocation2 + $0xfa] sm:$0xff]  ;;  %v6304_v35 = vld [vmem:[#allocation2 + $0x108] sm:$0xff] }
  0x8b   : > { %v1424_v55 = vmul.f32 %v5977_v31, %v6265_v50  ;;  %v1468_v60 = vadd.f32 %v1436_v33, %v1305_v10  ;;  %v1469_v62 = vadd.f32 %v1437_v49, %v1306_v40  ;;  %v1761_v10 = vmul.f32 %v6018_v44, %v6285_v54  ;;  %v6316_v40 = vld [vmem:[#allocation2 + $0x10a] sm:$0xff] }
  0x8c   : > { %v1617_v16 = vadd.f32 %v1585_v51, %v1455_v42  ;;  %v6297_v51 = vld [vmem:[%s5868_s20 + $0xb8] sm:$0xff]  ;;  %v822_v34 = vadd.f32 %v790_v47, %v660_v52  ;;  %v1439_v5 = vmul.f32 %v5977_v31, %v6304_v35  ;;  %v938_v47 = vmul.f32 %v5945_v19, %v6252_v56 }
  0x8d   : > { %v1456_v45 = vadd.f32 %v1424_v55, %v1293_v38  ;;  %v1307_v38 = vadd.f32 %v1275_v43, %v1145_v28  ;;  %9378 = vst [vmem:[#allocation31_spill] sm:$0xff] %v6297_v51  ;;  %v1630_v29 = vadd.f32 %v6175_v14, %v1468_v60  ;;  %v1631_v23 = vadd.f32 %v6191_v27, %v1469_v62 }
  0x8e   : > { %v1779_v57 = vadd.f32 %v1747_v4, %v1617_v16  ;;  %437 = vst [vmem:[#allocation2 + $0x129] sm:$0xff] %v6297_v51  ;;  %v1762_v14 = vmul.f32 %v6018_v44, %v6289_v18  ;;  %v984_v4 = vadd.f32 %v952_v53, %v822_v34  ;;  %v646_v27 = vadd.f32 %v614_v41, %v6228_v1  ;;  %v6322_v16 = vld [vmem:[%s5868_s20 + $0x40] sm:$0xff] }
  0x8f   : > { %v1618_v55 = vadd.f32 %v1586_v37, %v1456_v45  ;;  %v1114_v37 = vmul.f32 %v5954_v22, %v6148_v59  ;;  %v1470_v49 = vadd.f32 %v1438_v36, %v1307_v38  ;;  %v1792_v43 = vadd.f32 %v1760_v15, %v1630_v29  ;;  %9379 = vst [vmem:[#allocation32_spill] sm:$0xff] %v6322_v16  ;;  %v6339_v38 = vld [vmem:[#allocation2 + $0x62] sm:$0xff] }
  0x90   : > { %v1878_v33 = vadd.f32 %v6049_v58, %v1779_v57  ;;  %v776_v36 = vmul.f32 %v5939_v17, %v6022_v46  ;;  %422 = vst [vmem:[#allocation2 + $0x79] sm:$0xff] %v6322_v16  ;;  %v1100_v1 = vmul.f32 %v5954_v22, %v6159_v2  ;;  %v6332_v46 = vld [vmem:[#allocation2 + $0x60] sm:$0xff]  ;;  %v1763_v57 = vmul.f32 %v6018_v44, %v6316_v40 }
  0x91   : > { %v1780_v45 = vadd.f32 %v1748_v7, %v1618_v55  ;;  %v1632_v42 = vadd.f32 %v6215_v0, %v1470_v49  ;;  %v1891_v15 = vadd.f32 %v6049_v58, %v1792_v43  ;;  %v1793_v7 = vadd.f32 %v1761_v10, %v1631_v23 }
  0x92   : > { %1946 = vmatmul.f32.gmra.mxu0 %v1878_v33  ;;  %v1146_v28 = vadd.f32 %v1114_v37, %v984_v4  ;;  %v1601_v0 = vmul.f32 %v5982_v32, %v6187_v20  ;;  %v808_v60 = vadd.f32 %v776_v36, %v646_v27  ;;  %v629_v55 = vmul.f32 %v5927_v13, %v6140_v39  ;;  %v6348_v37 = vld [vmem:[%s5868_s20 + $0x48] sm:$0xff]  ;;  %v6360_v4 = vld [vmem:[#allocation2 + $0x110] sm:$0xff]  ;;  %v9381_v36 = vld [vmem:[#allocation15_spill] sm:$0xff] }
  0x93   : > { %1985 = vmatmul.f32.vlgmr.msra.gmra.mxu2 %v1891_v15  ;;  %v1794_v52 = vadd.f32 %v1762_v14, %v1632_v42  ;;  %v1879_v53 = vadd.f32 %v6049_v58, %v1780_v45  ;;  %v1262_v29 = vmul.f32 %v5960_v24, %v6261_v21  ;;  %v499_v10 = vmul.f32 %v5921_v11, %v6230_v3  ;;  %v6400_v39 = vld [vmem:[%s5868_s20 + $0xc8] sm:$0xff] }
  0x94   : > { %v1308_v62 = vadd.f32 %v1276_v30, %v1146_v28  ;;  %v970_v41 = vadd.f32 %v938_v47, %v808_v60  ;;  %v791_v34 = vmul.f32 %v5939_v17, %v6232_v12  ;;  %9380 = vst [vmem:[#allocation33_spill] sm:$0xff] %v6348_v37  ;;  %v1892_v23 = vadd.f32 %v6049_v58, %v1793_v7  ;;  %v9382_v47 = vld [vmem:[#allocation26_spill] sm:$0xff] }
  0x95   : > { %v1425_v49 = vmul.f32 %v5977_v31, %v6332_v46  ;;  %v1587_v14 = vmul.f32 %v5982_v32, %v6224_v63  ;;  %423 = vst [vmem:[#allocation2 + $0x81] sm:$0xff] %v6348_v37  ;;  %v1749_v3 = vmul.f32 %v6018_v44, %v6339_v38  ;;  %v661_v45 = vadd.f32 %v629_v55, %v499_v10  ;;  %v9385_v10 = vld [vmem:[#allocation28_spill] sm:$0xff] }
  0x96   : > { %v1471_v33 = vadd.f32 %v1439_v5, %v1308_v62  ;;  %v1132_v43 = vadd.f32 %v1100_v1, %v970_v41  ;;  %v953_v12 = vmul.f32 %v5945_v19, %v6247_v26  ;;  %v1893_v30 = vadd.f32 %v6049_v58, %v1794_v52  ;;  %v6363_v5 = vld [vmem:[#allocation2 + $0x112] sm:$0xff]  ;;  %v9383_v1 = vld [vmem:[#allocation18_spill] sm:$0xff]  ;;  %9386 = vst [vmem:[#allocation34_spill] sm:$0xff] %v6400_v39 }
  0x97   : > { %v485_v27 = vmul.f32 %v5921_v11, %v6095_v25  ;;  %v615_v15 = vmul.f32 %v5927_v13, %v9381_v36  ;;  %v823_v28 = vadd.f32 %v791_v34, %v661_v45  ;;  %v1115_v60 = vmul.f32 %v5954_v22, %v9382_v47  ;;  %v6374_v62 = vld [vmem:[%s5868_s20 + $0xc0] sm:$0xff]  ;;  %439 = vst [vmem:[#allocation2 + $0x141] sm:$0xff] %v6400_v39 }
  0x98   : > { %v1633_v42 = vadd.f32 %v1601_v0, %v1471_v33  ;;  %v1294_v7 = vadd.f32 %v1262_v29, %v1132_v43  ;;  %v777_v55 = vmul.f32 %v5939_v17, %v9383_v1  ;;  %9384 = vst [vmem:[#allocation18_spill] sm:$0xff] %v6374_v62  ;;  %v1277_v0 = vmul.f32 %v5960_v24, %v6289_v18  ;;  %v6389_v43 = vld [vmem:[#allocation2 + $0x68] sm:$0xff] }
  0x99   : > { %v1440_v25 = vmul.f32 %v5977_v31, %v6360_v4  ;;  %v647_v52 = vadd.f32 %v615_v15, %v485_v27  ;;  %438 = vst [vmem:[#allocation2 + $0x139] sm:$0xff] %v6374_v62  ;;  %v985_v29 = vadd.f32 %v953_v12, %v823_v28  ;;  %v1602_v34 = vmul.f32 %v5982_v32, %v9385_v10 }
  0x9a   : > { %1949 = vmatmul.f32.gmra.mxu0 %v1879_v53  ;;  %v939_v53 = vmul.f32 %v5945_v19, %v6265_v50  ;;  %v1457_v41 = vadd.f32 %v1425_v49, %v1294_v7  ;;  %v6387_v33 = vmul.f32 %v6018_v44, %v6363_v5  ;;  %v1795_v45 = vadd.f32 %v1763_v57, %v1633_v42  ;;  %v9387_v42 = vld [vmem:[#allocation29_spill] sm:$0xff] }
  0x9b   : > { %1988 = vmatmul.f32.gmra.mxu2 %v1892_v23  ;;  %v809_v27 = vadd.f32 %v777_v55, %v647_v52  ;;  %v1101_v15 = vmul.f32 %v5954_v22, %v6171_v8  ;;  %v500_v1 = vmul.f32 %v5921_v11, %v6241_v48  ;;  %v1147_v12 = vadd.f32 %v1115_v60, %v985_v29  ;;  %v6409_v55 = vld [vmem:[#allocation2 + $0x6a] sm:$0xff] }
  0x9c   : > { %v1619_v49 = vadd.f32 %v1587_v14, %v1457_v41  ;;  %v630_v7 = vmul.f32 %v5927_v13, %v6148_v59  ;;  %v792_v28 = vmul.f32 %v5939_v17, %v6285_v54  ;;  %v1263_v57 = vmul.f32 %v5960_v24, %v6267_v6 }
  0x9d   : > { %v971_v36 = vadd.f32 %v939_v53, %v809_v27  ;;  %v1426_v23 = vmul.f32 %v5977_v31, %v6389_v43  ;;  %v1588_v48 = vmul.f32 %v5982_v32, %v9387_v42  ;;  %v1309_v60 = vadd.f32 %v1277_v0, %v1147_v12  ;;  %v6416_v27 = vld [vmem:[#allocation2 + $0x120] sm:$0xff] }
  0x9e   : > { %v1781_v14 = vadd.f32 %v1749_v3, %v1619_v49  ;;  %v662_v54 = vadd.f32 %v630_v7, %v500_v1  ;;  %v954_v52 = vmul.f32 %v5945_v19, %v6304_v35  ;;  %v1894_v53 = vadd.f32 %v6049_v58, %v1795_v45  ;;  %v6421_v12 = vld [vmem:[#allocation2 + $0x122] sm:$0xff] }
  0x9f   : > { %v1133_v41 = vadd.f32 %v1101_v15, %v971_v36  ;;  %v1116_v29 = vmul.f32 %v5954_v22, %v6187_v20  ;;  %v486_v59 = vmul.f32 %v5921_v11, %v6252_v56  ;;  %v1472_v0 = vadd.f32 %v1440_v25, %v1309_v60  ;;  %v6426_v7 = vld [vmem:[%s5868_s20 + $0x50] sm:$0xff] }
  0xa0   : > { %v1880_v3 = vadd.f32 %v6049_v58, %v1781_v14  ;;  %v824_v49 = vadd.f32 %v792_v28, %v662_v54  ;;  %v616_v1 = vmul.f32 %v5927_v13, %v6159_v2  ;;  %9388 = vst [vmem:[#allocation29_spill] sm:$0xff] %v6426_v7  ;;  %v1750_v45 = vmul.f32 %v6018_v44, %v6409_v55 }
  0xa1   : > { %v1295_v36 = vadd.f32 %v1263_v57, %v1133_v41  ;;  %v1278_v15 = vmul.f32 %v5960_v24, %v6316_v40  ;;  %v778_v56 = vmul.f32 %v5939_v17, %v6261_v21  ;;  %424 = vst [vmem:[#allocation2 + $0x91] sm:$0xff] %v6426_v7  ;;  %v1441_v28 = vmul.f32 %v5977_v31, %v6416_v27 }
  0xa2   : > { %1952 = vmatmul.f32.gmra.mxu0 %v1880_v3  ;;  %v986_v25 = vadd.f32 %v954_v52, %v824_v49  ;;  %v648_v14 = vadd.f32 %v616_v1, %v486_v59  ;;  %v940_v57 = vmul.f32 %v5945_v19, %v6332_v46  ;;  %v1603_v54 = vmul.f32 %v5982_v32, %v6279_v61  ;;  %v6445_v3 = vld [vmem:[#allocation2 + $0x78] sm:$0xff] }
  0xa3   : > { %1991 = vmatmul.f32.gmra.mxu2 %v1893_v30  ;;  %v1458_v60 = vadd.f32 %v1426_v23, %v1295_v36  ;;  %v1765_v21 = vmul.f32 %v6018_v44, %v6421_v12  ;;  %v1102_v41 = vmul.f32 %v5954_v22, %v6224_v63  ;;  %v1634_v52 = vadd.f32 %v1602_v34, %v1472_v0  ;;  %v6447_v59 = vld [vmem:[#allocation2 + $0x7a] sm:$0xff]  ;;  %v6452_v23 = vld [vmem:[%s5868_s20 + $0x58] sm:$0xff] }
  0xa4   : > { %v1148_v49 = vadd.f32 %v1116_v29, %v986_v25  ;;  %v810_v2 = vadd.f32 %v778_v56, %v648_v14  ;;  %v501_v30 = vmul.f32 %v5921_v11, %v6247_v26  ;;  %9389 = vst [vmem:[#allocation35_spill] sm:$0xff] %v6452_v23  ;;  %v1264_v36 = vmul.f32 %v5960_v24, %v6339_v38 }
  0xa5   : > { %v1620_v1 = vadd.f32 %v1588_v48, %v1458_v60  ;;  %v631_v9 = vmul.f32 %v5927_v13, %v9382_v47  ;;  %v793_v34 = vmul.f32 %v5939_v17, %v6289_v18  ;;  %425 = vst [vmem:[#allocation2 + $0x99] sm:$0xff] %v6452_v23  ;;  %v1427_v26 = vmul.f32 %v5977_v31, %v6445_v3 }
  0xa6   : > { %v1310_v29 = vadd.f32 %v1278_v15, %v1148_v49  ;;  %v972_v0 = vadd.f32 %v940_v57, %v810_v2  ;;  %v1589_v48 = vmul.f32 %v5982_v32, %v6322_v16  ;;  %v1751_v25 = vmul.f32 %v6018_v44, %v6447_v59  ;;  %v6473_v15 = vld [vmem:[%s5868_s20 + $0xd0] sm:$0xff] }
  0xa7   : > { %v1782_v56 = vadd.f32 %v1750_v45, %v1620_v1  ;;  %v663_v14 = vadd.f32 %v631_v9, %v501_v30  ;;  %v955_v60 = vmul.f32 %v5945_v19, %v6360_v4  ;;  %v1796_v18 = vadd.f32 %v6387_v33, %v1634_v52  ;;  %9390 = vst [vmem:[#allocation36_spill] sm:$0xff] %v6473_v15  ;;  %v6476_v45 = vld [vmem:[#allocation2 + $0x128] sm:$0xff] }
  0xa8   : > { %v1473_v47 = vadd.f32 %v1441_v28, %v1310_v29  ;;  %v1134_v23 = vadd.f32 %v1102_v41, %v972_v0  ;;  %v1117_v2 = vmul.f32 %v5954_v22, %v9385_v10  ;;  %v487_v9 = vmul.f32 %v5921_v11, %v6265_v50  ;;  %440 = vst [vmem:[#allocation2 + $0x151] sm:$0xff] %v6473_v15  ;;  %v6485_v52 = vld [vmem:[#allocation2 + $0x12a] sm:$0xff] }
  0xa9   : > { %v1881_v57 = vadd.f32 %v6049_v58, %v1782_v56  ;;  %v825_v49 = vadd.f32 %v793_v34, %v663_v14  ;;  %v617_v30 = vmul.f32 %v5927_v13, %v6171_v8  ;;  %v1279_v41 = vmul.f32 %v5960_v24, %v6363_v5 }
  0xaa   : > { %v1635_v33 = vadd.f32 %v1603_v54, %v1473_v47  ;;  %v1296_v28 = vadd.f32 %v1264_v36, %v1134_v23  ;;  %v779_v1 = vmul.f32 %v5939_v17, %v6267_v6  ;;  %v941_v29 = vmul.f32 %v5945_v19, %v6389_v43  ;;  %v6497_v23 = vld [vmem:[%s5868_s20 + $0xd8] sm:$0xff] }
  0xab   : > { %1994 = vmatmul.f32.gmra.mxu2 %v1894_v53  ;;  %1955 = vmatmul.f32.gmra.mxu0 %v1881_v57  ;;  %v987_v34 = vadd.f32 %v955_v60, %v825_v49  ;;  %v649_v50 = vadd.f32 %v617_v30, %v487_v9  ;;  %v1895_v0 = vadd.f32 %v6049_v58, %v1796_v18  ;;  %v6503_v60 = vld [vmem:[#allocation2 + $0x80] sm:$0xff] }
  0xac   : > { %v1459_v56 = vadd.f32 %v1427_v26, %v1296_v28  ;;  %v1442_v47 = vmul.f32 %v5977_v31, %v6476_v45  ;;  %v1604_v54 = vmul.f32 %v5982_v32, %v6297_v51  ;;  %9391 = vst [vmem:[#allocation37_spill] sm:$0xff] %v6497_v23  ;;  %v1766_v6 = vmul.f32 %v6018_v44, %v6485_v52  ;;  %v6506_v57 = vld [vmem:[#allocation2 + $0x82] sm:$0xff] }
  0xad   : > { %v1149_v36 = vadd.f32 %v1117_v2, %v987_v34  ;;  %v811_v53 = vadd.f32 %v779_v1, %v649_v50  ;;  %v1103_v14 = vmul.f32 %v5954_v22, %v9387_v42  ;;  %441 = vst [vmem:[#allocation2 + $0x159] sm:$0xff] %v6497_v23  ;;  %v1797_v26 = vadd.f32 %v1765_v21, %v1635_v33 }
  0xae   : > { %v1621_v18 = vadd.f32 %v1589_v48, %v1459_v56  ;;  %v502_v49 = vmul.f32 %v5921_v11, %v6304_v35  ;;  %v632_v2 = vmul.f32 %v5927_v13, %v6187_v20  ;;  %v1265_v28 = vmul.f32 %v5960_v24, %v6409_v55  ;;  %v6524_v56 = vld [vmem:[#allocation2 + $0x138] sm:$0xff] }
  0xaf   : > { %v1311_v9 = vadd.f32 %v1279_v41, %v1149_v36  ;;  %v973_v30 = vadd.f32 %v941_v29, %v811_v53  ;;  %v794_v1 = vmul.f32 %v5939_v17, %v6316_v40  ;;  %v1428_v21 = vmul.f32 %v5977_v31, %v6503_v60 }
  0xb0   : > { %v1783_v34 = vadd.f32 %v1751_v25, %v1621_v18  ;;  %v664_v48 = vadd.f32 %v632_v2, %v502_v49  ;;  %v956_v33 = vmul.f32 %v5945_v19, %v6416_v27  ;;  %v1590_v41 = vmul.f32 %v5982_v32, %v6348_v37  ;;  %v6532_v18 = vld [vmem:[#allocation2 + $0x13a] sm:$0xff] }
  0xb1   : > { %v1474_v35 = vadd.f32 %v1442_v47, %v1311_v9  ;;  %v1135_v50 = vadd.f32 %v1103_v14, %v973_v30  ;;  %v1752_v29 = vmul.f32 %v6018_v44, %v6506_v57  ;;  %v1118_v36 = vmul.f32 %v5954_v22, %v6279_v61 }
  0xb2   : > { %v1882_v40 = vadd.f32 %v6049_v58, %v1783_v34  ;;  %v826_v25 = vadd.f32 %v794_v1, %v664_v48  ;;  %v488_v53 = vmul.f32 %v5921_v11, %v6332_v46  ;;  %v1896_v47 = vadd.f32 %v6049_v58, %v1797_v26  ;;  %v6546_v34 = vld [vmem:[#allocation2 + $0x90] sm:$0xff] }
  0xb3   : > { %1997 = vmatmul.f32.gmra.mxu2 %v1895_v0  ;;  %v1297_v14 = vadd.f32 %v1265_v28, %v1135_v50  ;;  %v618_v49 = vmul.f32 %v5927_v13, %v6224_v63  ;;  %v780_v2 = vmul.f32 %v5939_v17, %v6339_v38  ;;  %v1636_v9 = vadd.f32 %v1604_v54, %v1474_v35 }
  0xb4   : > { %1958 = vmatmul.f32.gmra.mxu0 %v1882_v40  ;;  %v988_v30 = vadd.f32 %v956_v33, %v826_v25  ;;  %v1280_v1 = vmul.f32 %v5960_v24, %v6421_v12  ;;  %v1443_v46 = vmul.f32 %v5977_v31, %v6524_v56  ;;  %v1605_v26 = vmul.f32 %v5982_v32, %v6374_v62  ;;  %v6556_v40 = vld [vmem:[#allocation2 + $0x92] sm:$0xff]  ;;  %v6561_v25 = vld [vmem:[%s9299_s1 + $0x1] ss:$0 sm:$0xff] }
  0xb5   : > { %v1460_v0 = vadd.f32 %v1428_v21, %v1297_v14  ;;  %v650_v28 = vadd.f32 %v618_v49, %v488_v53  ;;  %v942_v13 = vmul.f32 %v5945_v19, %v6445_v3  ;;  %v1767_v54 = vmul.f32 %v6018_v44, %v6532_v18 }
  0xb6   : > { %v1150_v38 = vadd.f32 %v1118_v36, %v988_v30  ;;  %v1104_v48 = vmul.f32 %v5954_v22, %v6322_v16  ;;  %v503_v21 = vmul.f32 %v5921_v11, %v6360_v4  ;;  %v1266_v50 = vmul.f32 %v5960_v24, %v6447_v59 }
  0xb7   : > { %v1622_v33 = vadd.f32 %v1590_v41, %v1460_v0  ;;  %v812_v35 = vadd.f32 %v780_v2, %v650_v28  ;;  %v633_v36 = vmul.f32 %v6561_v25, %v9385_v10  ;;  %v1798_v53 = vadd.f32 %v1766_v6, %v1636_v9  ;;  %v6570_v41 = vld [vmem:[%s5868_s20 + $0xe0] sm:$0xff]  ;;  %v6584_v28 = vld [vmem:[#allocation2 + $0x142] sm:$0xff] }
  0xb8   : > { %v1312_v14 = vadd.f32 %v1280_v1, %v1150_v38  ;;  %v1429_v11 = vmul.f32 %v5977_v31, %v6546_v34  ;;  %v795_v4 = vmul.f32 %v5939_v17, %v6363_v5  ;;  %9392 = vst [vmem:[#allocation38_spill] sm:$0xff] %v6570_v41  ;;  %v957_v30 = vmul.f32 %v5945_v19, %v6476_v45  ;;  %v6581_v5 = vld [vmem:[#allocation2 + $0x140] sm:$0xff] }
  0xb9   : > { %v1784_v24 = vadd.f32 %v1752_v29, %v1622_v33  ;;  %v974_v49 = vadd.f32 %v942_v13, %v812_v35  ;;  %v665_v2 = vadd.f32 %v633_v36, %v503_v21  ;;  %442 = vst [vmem:[#allocation2 + $0x169] sm:$0xff] %v6570_v41  ;;  %v1591_v6 = vmul.f32 %v5982_v32, %v6426_v7  ;;  %v6606_v21 = vld [vmem:[%s9299_s1 + $0x2] ss:$0 sm:$0xff]  ;;  %v6611_v33 = vld [vmem:[%s5868_s20 + $0xe8] sm:$0xff] }
  0xba   : > { %v1475_v0 = vadd.f32 %v1443_v46, %v1312_v14  ;;  %v1753_v9 = vmul.f32 %v6018_v44, %v6556_v40  ;;  %v1119_v17 = vmul.f32 %v5954_v22, %v6297_v51  ;;  %v6589_v46 = vld [vmem:[%s9299_s1] ss:$0 sm:$0xff]  ;;  %v1897_v38 = vadd.f32 %v6049_v58, %v1798_v53  ;;  %v6597_v22 = vld [vmem:[%s9299_s1 + $0x5] ss:$0 sm:$0xff]  ;;  %9393 = vst [vmem:[#allocation39_spill] sm:$0xff] %v6611_v33 }
  0xbb   : > { %2000 = vmatmul.f32.gmra.mxu2 %v1896_v47  ;;  %v1883_v29 = vadd.f32 %v6049_v58, %v1784_v24  ;;  %v1136_v1 = vadd.f32 %v1104_v48, %v974_v49  ;;  %v827_v19 = vadd.f32 %v795_v4, %v665_v2  ;;  %v489_v13 = vmul.f32 %v6589_v46, %v6389_v43 }
  0xbc   : > { %v1281_v47 = vmul.f32 %v6597_v22, %v6485_v52  ;;  %v619_v48 = vmul.f32 %v6561_v25, %v9387_v42  ;;  %v781_v43 = vmul.f32 %v6606_v21, %v6409_v55  ;;  %v1637_v35 = vadd.f32 %v1605_v26, %v1475_v0  ;;  %v6622_v55 = vld [vmem:[%s9299_s1 + $0x3] ss:$0 sm:$0xff]  ;;  %443 = vst [vmem:[#allocation2 + $0x171] sm:$0xff] %v6611_v33 }
  0xbd   : > { %1961 = vmatmul.f32.gmra.mxu0 %v1883_v29  ;;  %v1298_v36 = vadd.f32 %v1266_v50, %v1136_v1  ;;  %v989_v53 = vadd.f32 %v957_v30, %v827_v19  ;;  %v1444_v14 = vmul.f32 %v5977_v31, %v6581_v5  ;;  %v1606_v4 = vmul.f32 %v5982_v32, %v6400_v39  ;;  %v6626_v50 = vld [vmem:[#allocation2 + $0x98] sm:$0xff]  ;;  %v6632_v32 = vld [vmem:[%s9299_s1 + $0x4] ss:$0 sm:$0xff] }
  0xbe   : > { %v1768_v24 = vmul.f32 %v6018_v44, %v6584_v28  ;;  %v651_v49 = vadd.f32 %v619_v48, %v489_v13  ;;  %v943_v26 = vmul.f32 %v6622_v55, %v6503_v60  ;;  %v1105_v44 = vmul.f32 %v6632_v32, %v6348_v37  ;;  %v6640_v1 = vld [vmem:[#allocation2 + $0x9a] sm:$0xff] }
  0xbf   : > { %v1461_v31 = vadd.f32 %v1429_v11, %v1298_v36  ;;  %v1151_v2 = vadd.f32 %v1119_v17, %v989_v53  ;;  %v504_v30 = vmul.f32 %v6589_v46, %v6416_v27  ;;  %v1267_v29 = vmul.f32 %v6597_v22, %v6506_v57  ;;  %v6649_v36 = vld [vmem:[%s9299_s1 + $0x6] ss:$0 sm:$0xff]  ;;  %v6656_v53 = vld [vmem:[%s9299_s1 + $0x7] ss:$0 sm:$0xff] }
  0xc0   : > { %v813_v0 = vadd.f32 %v781_v43, %v651_v49  ;;  %v634_v11 = vmul.f32 %v6561_v25, %v6279_v61  ;;  %v796_v17 = vmul.f32 %v6606_v21, %v6421_v12  ;;  %v1799_v19 = vadd.f32 %v1767_v54, %v1637_v35  ;;  %v9394_v49 = vld [vmem:[#allocation35_spill] sm:$0xff] }
  0xc1   : > { %v1623_v13 = vadd.f32 %v1591_v6, %v1461_v31  ;;  %v1313_v48 = vadd.f32 %v1281_v47, %v1151_v2  ;;  %v1430_v27 = vmul.f32 %v6649_v36, %v6626_v50  ;;  %v1592_v12 = vmul.f32 %v6656_v53, %v9394_v49  ;;  %v6665_v31 = vld [vmem:[%s9299_s1 + $0x8] ss:$0 sm:$0xff] }
  0xc2   : > { %v975_v43 = vadd.f32 %v943_v26, %v813_v0  ;;  %v666_v54 = vadd.f32 %v634_v11, %v504_v30  ;;  %v958_v6 = vmul.f32 %v6622_v55, %v6524_v56  ;;  %v1754_v26 = vmul.f32 %v6665_v31, %v6640_v1  ;;  %v6671_v30 = vld [vmem:[#allocation2 + $0x150] sm:$0xff] }
  0xc3   : > { %2003 = vmatmul.f32.gmra.mxu2 %v1897_v38  ;;  %v1785_v47 = vadd.f32 %v1753_v9, %v1623_v13  ;;  %v1476_v35 = vadd.f32 %v1444_v14, %v1313_v48  ;;  %v1120_v2 = vmul.f32 %v6632_v32, %v6374_v62  ;;  %v490_v38 = vmul.f32 %v6589_v46, %v6445_v3 }
  0xc4   : > { %v1137_v0 = vadd.f32 %v1105_v44, %v975_v43  ;;  %v828_v61 = vadd.f32 %v796_v17, %v666_v54  ;;  %v620_v9 = vmul.f32 %v6561_v25, %v6322_v16  ;;  %v1282_v13 = vmul.f32 %v6597_v22, %v6532_v18  ;;  %v6682_v17 = vld [vmem:[#allocation2 + $0x152] sm:$0xff] }
  0xc5   : > { %v1884_v14 = vadd.f32 %v6049_v58, %v1785_v47  ;;  %v1638_v11 = vadd.f32 %v1606_v4, %v1476_v35  ;;  %v782_v48 = vmul.f32 %v6606_v21, %v6447_v59  ;;  %v944_v3 = vmul.f32 %v6622_v55, %v6546_v34 }
  0xc6   : > { %v1299_v10 = vadd.f32 %v1267_v29, %v1137_v0  ;;  %v990_v44 = vadd.f32 %v958_v6, %v828_v61  ;;  %v652_v43 = vadd.f32 %v620_v9, %v490_v38  ;;  %v1898_v54 = vadd.f32 %v6049_v58, %v1799_v19  ;;  %v6693_v0 = vld [vmem:[#allocation2 + $0xa8] sm:$0xff]  ;;  %v6698_v9 = vld [vmem:[%s5868_s20 + $0xf0] sm:$0xff] }
  0xc7   : > { %1964 = vmatmul.f32.gmra.mxu0 %v1884_v14  ;;  %v1445_v4 = vmul.f32 %v6649_v36, %v6671_v30  ;;  %v1607_v47 = vmul.f32 %v6656_v53, %v6473_v15  ;;  %v1106_v59 = vmul.f32 %v6632_v32, %v6426_v7  ;;  %v1800_v29 = vadd.f32 %v1768_v24, %v1638_v11  ;;  %v6695_v38 = vld [vmem:[#allocation2 + $0xa9] sm:$0xff] }
  0xc8   : > { %v1462_v61 = vadd.f32 %v1430_v27, %v1299_v10  ;;  %v1152_v6 = vadd.f32 %v1120_v2, %v990_v44  ;;  %v814_v35 = vadd.f32 %v782_v48, %v652_v43  ;;  %9395 = vst [vmem:[#allocation40_spill] sm:$0xff] %v6698_v9  ;;  %v1769_v58 = vmul.f32 %v6665_v31, %v6682_v17 }
  0xc9   : > { %v505_v19 = vmul.f32 %v6589_v46, %v6476_v45  ;;  %v635_v14 = vmul.f32 %v6561_v25, %v6297_v51  ;;  %v797_v10 = vmul.f32 %v6606_v21, %v6485_v52  ;;  %444 = vst [vmem:[#allocation2 + $0x181] sm:$0xff] %v6698_v9  ;;  %v1268_v11 = vmul.f32 %v6597_v22, %v6556_v40 }
  0xca   : > { %v1624_v24 = vadd.f32 %v1592_v12, %v1462_v61  ;;  %v1314_v27 = vadd.f32 %v1282_v13, %v1152_v6  ;;  %v976_v2 = vadd.f32 %v944_v3, %v814_v35  ;;  %v1431_v48 = vmul.f32 %v6649_v36, %v6693_v0  ;;  %v6720_v12 = vld [vmem:[%s9300_s2] ss:$0 sm:$0xff]  ;;  %v6724_v61 = vld [vmem:[%s5868_s20 + $0xf8] sm:$0xff] }
  0xcb   : > { %2006 = vmatmul.f32.gmra.mxu2 %v1898_v54  ;;  %v1593_v45 = vmul.f32 %v6656_v53, %v6695_v38  ;;  %v667_v44 = vadd.f32 %v635_v14, %v505_v19  ;;  %v959_v52 = vmul.f32 %v6622_v55, %v6581_v5  ;;  %v1899_v13 = vadd.f32 %v6720_v12, %v1800_v29  ;;  %v6726_v6 = vld [vmem:[#allocation2 + $0xaa] sm:$0xff]  ;;  %v6730_v14 = vld [vmem:[#allocation2 + $0x158] sm:$0xff] }
  0xcc   : > { %v1786_v43 = vadd.f32 %v1754_v26, %v1624_v24  ;;  %v1477_v3 = vadd.f32 %v1445_v4, %v1314_v27  ;;  %v1138_v54 = vadd.f32 %v1106_v59, %v976_v2  ;;  %9396 = vst [vmem:[#allocation41_spill] sm:$0xff] %v6724_v61  ;;  %v1121_v19 = vmul.f32 %v6632_v32, %v6400_v39  ;;  %v6742_v27 = vld [vmem:[#allocation2 + $0x15a] sm:$0xff] }
  0xcd   : > { %v829_v35 = vadd.f32 %v797_v10, %v667_v44  ;;  %v491_v51 = vmul.f32 %v6589_v46, %v6503_v60  ;;  %v621_v16 = vmul.f32 %v6561_v25, %v6348_v37  ;;  %445 = vst [vmem:[#allocation2 + $0x189] sm:$0xff] %v6724_v61  ;;  %v783_v29 = vmul.f32 %v6606_v21, %v6506_v57 }
  0xce   : > { %v1885_v26 = vadd.f32 %v6720_v12, %v1786_v43  ;;  %v1639_v4 = vadd.f32 %v1607_v47, %v1477_v3  ;;  %v1300_v59 = vadd.f32 %v1268_v11, %v1138_v54  ;;  %v1283_v24 = vmul.f32 %v6597_v22, %v6584_v28 }
  0xcf   : > { %v991_v10 = vadd.f32 %v959_v52, %v829_v35  ;;  %v653_v2 = vadd.f32 %v621_v16, %v491_v51  ;;  %v945_v60 = vmul.f32 %v6622_v55, %v6626_v50  ;;  %v1755_v43 = vmul.f32 %v6665_v31, %v6726_v6  ;;  %v6754_v16 = vld [vmem:[#allocation2 + $0xb0] sm:$0xff] }
  0xd0   : > { %1967 = vmatmul.f32.gmra.mxu0 %v1885_v26  ;;  %v1463_v44 = vadd.f32 %v1431_v48, %v1300_v59  ;;  %v1446_v47 = vmul.f32 %v6649_v36, %v6730_v14  ;;  %v1608_v57 = vmul.f32 %v6656_v53, %v6497_v23  ;;  %v1801_v11 = vadd.f32 %v1769_v58, %v1639_v4  ;;  %v6758_v35 = vld [vmem:[#allocation2 + $0xb1] sm:$0xff] }
  0xd1   : > { %v1153_v52 = vadd.f32 %v1121_v19, %v991_v10  ;;  %v815_v3 = vadd.f32 %v783_v29, %v653_v2  ;;  %v1107_v51 = vmul.f32 %v6632_v32, %v9394_v49  ;;  %v1770_v48 = vmul.f32 %v6665_v31, %v6742_v27 }
  0xd2   : > { %v1625_v54 = vadd.f32 %v1593_v45, %v1463_v44  ;;  %v506_v26 = vmul.f32 %v6589_v46, %v6524_v56  ;;  %v636_v59 = vmul.f32 %v6561_v25, %v6374_v62  ;;  %v1269_v4 = vmul.f32 %v6597_v22, %v6640_v1 }
  0xd3   : > { %2009 = vmatmul.f32.gmra.mxu2 %v1899_v13  ;;  %v1315_v58 = vadd.f32 %v1283_v24, %v1153_v52  ;;  %v977_v19 = vadd.f32 %v945_v60, %v815_v3  ;;  %v798_v45 = vmul.f32 %v6606_v21, %v6532_v18  ;;  %v1432_v10 = vmul.f32 %v6649_v36, %v6754_v16  ;;  %v6775_v60 = vld [vmem:[#allocation2 + $0xb2] sm:$0xff]  ;;  %v6777_v52 = vld [vmem:[#allocation2 + $0x168] sm:$0xff] }
  0xd4   : > { %v1787_v29 = vadd.f32 %v1755_v43, %v1625_v54  ;;  %v668_v2 = vadd.f32 %v636_v59, %v506_v26  ;;  %v960_v56 = vmul.f32 %v6622_v55, %v6671_v30  ;;  %v1900_v44 = vadd.f32 %v6720_v12, %v1801_v11 }
  0xd5   : > { %v1478_v62 = vadd.f32 %v1446_v47, %v1315_v58  ;;  %v1139_v13 = vadd.f32 %v1107_v51, %v977_v19  ;;  %v1594_v24 = vmul.f32 %v6656_v53, %v6758_v35  ;;  %v1122_v3 = vmul.f32 %v6632_v32, %v6473_v15  ;;  %v6784_v47 = vld [vmem:[#allocation2 + $0x16a] sm:$0xff] }
  0xd6   : > { %v1886_v18 = vadd.f32 %v6720_v12, %v1787_v29  ;;  %v830_v43 = vadd.f32 %v798_v45, %v668_v2  ;;  %v492_v54 = vmul.f32 %v6589_v46, %v6546_v34  ;;  %v622_v51 = vmul.f32 %v6561_v25, %v6426_v7 }
  0xd7   : > { %v1640_v26 = vadd.f32 %v1608_v57, %v1478_v62  ;;  %v1301_v11 = vadd.f32 %v1269_v4, %v1139_v13  ;;  %v784_v59 = vmul.f32 %v6606_v21, %v6556_v40  ;;  %v1756_v58 = vmul.f32 %v6665_v31, %v6775_v60  ;;  %v6800_v40 = vld [vmem:[#allocation2 + $0xc0] sm:$0xff] }
  0xd8   : > { %1970 = vmatmul.f32.gmra.mxu0 %v1886_v18  ;;  %v992_v19 = vadd.f32 %v960_v56, %v830_v43  ;;  %v1284_v45 = vmul.f32 %v6597_v22, %v6682_v17  ;;  %v1447_v62 = vmul.f32 %v6649_v36, %v6777_v52  ;;  %v1609_v57 = vmul.f32 %v6656_v53, %v6570_v41 }
  0xd9   : > { %v1464_v34 = vadd.f32 %v1432_v10, %v1301_v11  ;;  %v654_v4 = vadd.f32 %v622_v51, %v492_v54  ;;  %v946_v29 = vmul.f32 %v6622_v55, %v6693_v0  ;;  %v1802_v2 = vadd.f32 %v1770_v48, %v1640_v26  ;;  %v6808_v54 = vld [vmem:[#allocation2 + $0xc1] sm:$0xff] }
  0xda   : > { %v1154_v13 = vadd.f32 %v1122_v3, %v992_v19  ;;  %v1771_v56 = vmul.f32 %v6665_v31, %v6784_v47  ;;  %v507_v18 = vmul.f32 %v6589_v46, %v6581_v5  ;;  %v1108_v11 = vmul.f32 %v6632_v32, %v6695_v38  ;;  %v6818_v26 = vld [vmem:[#allocation2 + $0xc2] sm:$0xff] }
  0xdb   : > { %2012 = vmatmul.f32.gmra.mxu2 %v1900_v44  ;;  %v1626_v43 = vadd.f32 %v1594_v24, %v1464_v34  ;;  %v816_v10 = vadd.f32 %v784_v59, %v654_v4  ;;  %v637_v51 = vmul.f32 %v6561_v25, %v6400_v39  ;;  %v1270_v48 = vmul.f32 %v6597_v22, %v6726_v6  ;;  %v6827_v39 = vld [vmem:[#allocation2 + $0x170] sm:$0xff] }
  0xdc   : > { %v1316_v7 = vadd.f32 %v1284_v45, %v1154_v13  ;;  %v1433_v3 = vmul.f32 %v6649_v36, %v6800_v40  ;;  %v799_v5 = vmul.f32 %v6606_v21, %v6584_v28  ;;  %v961_v19 = vmul.f32 %v6622_v55, %v6730_v14 }
  0xdd   : > { %v1788_v44 = vadd.f32 %v1756_v58, %v1626_v43  ;;  %v978_v24 = vadd.f32 %v946_v29, %v816_v10  ;;  %v669_v59 = vadd.f32 %v637_v51, %v507_v18  ;;  %v1901_v34 = vadd.f32 %v6720_v12, %v1802_v2  ;;  %v6830_v43 = vld [vmem:[#allocation2 + $0x172] sm:$0xff] }
  0xde   : > { %v1479_v45 = vadd.f32 %v1447_v62, %v1316_v7  ;;  %v1595_v4 = vmul.f32 %v6656_v53, %v6808_v54  ;;  %v1123_v13 = vmul.f32 %v6632_v32, %v6497_v23  ;;  %v493_v18 = vmul.f32 %v6589_v46, %v6626_v50 }
  0xdf   : > { %v1887_v28 = vadd.f32 %v6720_v12, %v1788_v44  ;;  %v1140_v58 = vadd.f32 %v1108_v11, %v978_v24  ;;  %v831_v29 = vadd.f32 %v799_v5, %v669_v59  ;;  %v1757_v7 = vmul.f32 %v6665_v31, %v6818_v26 }
  0xe0   : > { %v1641_v10 = vadd.f32 %v1609_v57, %v1479_v45  ;;  %v623_v62 = vmul.f32 %v6561_v25, %v9394_v49  ;;  %v785_v2 = vmul.f32 %v6606_v21, %v6640_v1  ;;  %v1285_v11 = vmul.f32 %v6597_v22, %v6742_v27  ;;  %v1400_v1 = vld [vmem:[#allocation2 + $0xc8] sm:$0xff] }
  0xe1   : > { %1973 = vmatmul.f32.gmra.mxu0 %v1887_v28  ;;  %v1302_v51 = vadd.f32 %v1270_v48, %v1140_v58  ;;  %v993_v44 = vadd.f32 %v961_v19, %v831_v29  ;;  %v1448_v5 = vmul.f32 %v6649_v36, %v6827_v39  ;;  %v1610_v50 = vmul.f32 %v6656_v53, %v6611_v33  ;;  %v1562_v28 = vld [vmem:[#allocation2 + $0xc9] sm:$0xff] }
  0xe2   : > { %v1772_v57 = vmul.f32 %v6665_v31, %v6830_v43  ;;  %v655_v24 = vadd.f32 %v623_v62, %v493_v18  ;;  %v947_v59 = vmul.f32 %v6622_v55, %v6754_v16  ;;  %v1803_v48 = vadd.f32 %v1771_v56, %v1641_v10 }
  0xe3   : > { %2015 = vmatmul.f32.gmra.mxu2 %v1901_v34  ;;  %v1465_v19 = vadd.f32 %v1433_v3, %v1302_v51  ;;  %v1155_v45 = vadd.f32 %v1123_v13, %v993_v44  ;;  %v508_v58 = vmul.f32 %v6589_v46, %v6671_v30  ;;  %v1109_v49 = vmul.f32 %v6632_v32, %v6758_v35  ;;  %v1724_v44 = vld [vmem:[#allocation2 + $0xca] sm:$0xff] }
  0xe4   : > { %v817_v29 = vadd.f32 %v785_v2, %v655_v24  ;;  %v638_v37 = vmul.f32 %v6561_v25, %v6473_v15  ;;  %v800_v18 = vmul.f32 %v6606_v21, %v6682_v17  ;;  %v1271_v56 = vmul.f32 %v6597_v22, %v6775_v60  ;;  %v1415_v60 = vld [vmem:[#allocation2 + $0x180] sm:$0xff] }
  0xe5   : > { %v1627_v16 = vadd.f32 %v1595_v4, %v1465_v19  ;;  %v1317_v62 = vadd.f32 %v1285_v11, %v1155_v45  ;;  %v1434_v3 = vmul.f32 %v6649_v36, %v1400_v1  ;;  %v1596_v30 = vmul.f32 %v6656_v53, %v1562_v28 }
  0xe6   : > { %v979_v34 = vadd.f32 %v947_v59, %v817_v29  ;;  %v670_v13 = vadd.f32 %v638_v37, %v508_v58  ;;  %v962_v35 = vmul.f32 %v6622_v55, %v6777_v52  ;;  %v1902_v10 = vadd.f32 %v6720_v12, %v1803_v48  ;;  %v1739_v29 = vld [vmem:[#allocation2 + $0x182] sm:$0xff] }
  0xe7   : > { %v1789_v2 = vadd.f32 %v1757_v7, %v1627_v16  ;;  %v1480_v51 = vadd.f32 %v1448_v5, %v1317_v62  ;;  %v1124_v17 = vmul.f32 %v6632_v32, %v6570_v41  ;;  %v494_v24 = vmul.f32 %v6589_v46, %v6693_v0  ;;  %v1401_v62 = vld [vmem:[#allocation2 + $0xd8] sm:$0xff] }
  0xe8   : > { %v1141_v4 = vadd.f32 %v1109_v49, %v979_v34  ;;  %v832_v11 = vadd.f32 %v800_v18, %v670_v13  ;;  %v624_v37 = vmul.f32 %v6561_v25, %v6695_v38  ;;  %v1286_v7 = vmul.f32 %v6597_v22, %v6784_v47 }
  0xe9   : > { %v1888_v59 = vadd.f32 %v6720_v12, %v1789_v2  ;;  %v1642_v1 = vadd.f32 %v1610_v50, %v1480_v51  ;;  %v786_v5 = vmul.f32 %v6606_v21, %v6726_v6  ;;  %v948_v45 = vmul.f32 %v6622_v55, %v6800_v40 }
  0xea   : > { %v1303_v48 = vadd.f32 %v1271_v56, %v1141_v4  ;;  %v994_v49 = vadd.f32 %v962_v35, %v832_v11  ;;  %v656_v19 = vadd.f32 %v624_v37, %v494_v24  ;;  %v1758_v38 = vmul.f32 %v6665_v31, %v1724_v44  ;;  %v1563_v35 = vld [vmem:[#allocation2 + $0xd9] sm:$0xff]  ;;  %v6897_v11 = vpop.f32.mrf.mxu0 }
  0xeb   : > { %2018 = vmatmul.f32.gmra.mxu2 %v1902_v10  ;;  %1976 = vmatmul.f32.gmra.mxu0 %v1888_v59  ;;  %v1804_v0 = vadd.f32 %v1772_v57, %v1642_v1  ;;  %v1449_v28 = vmul.f32 %v6649_v36, %v1415_v60  ;;  %v1110_v6 = vmul.f32 %v6632_v32, %v6808_v54 }
  0xec   : > { %v1466_v50 = vadd.f32 %v1434_v3, %v1303_v48  ;;  %v1156_v58 = vadd.f32 %v1124_v17, %v994_v49  ;;  %v818_v18 = vadd.f32 %v786_v5, %v656_v19  ;;  %v1611_v16 = vmul.f32 %v6656_v53, %v6698_v9  ;;  %v1416_v48 = vld [vmem:[#allocation2 + $0x188] sm:$0xff] }
  0xed   : > { %v1272_v40 = vmul.f32 %v6597_v22, %v6818_v26  ;;  %v509_v57 = vmul.f32 %v6589_v46, %v6730_v14  ;;  %v639_v56 = vmul.f32 %v6561_v25, %v6497_v23  ;;  %v801_v54 = vmul.f32 %v6606_v21, %v6742_v27 }
  0xee   : > { %v1628_v3 = vadd.f32 %v1596_v30, %v1466_v50  ;;  %v1318_v34 = vadd.f32 %v1286_v7, %v1156_v58  ;;  %v980_v13 = vadd.f32 %v948_v45, %v818_v18  ;;  %v1903_v10 = vadd.f32 %v6720_v12, %v1804_v0  ;;  %v1725_v30 = vld [vmem:[#allocation2 + $0xda] sm:$0xff] }
  0xef   : > { %v1773_v2 = vmul.f32 %v6665_v31, %v1739_v29  ;;  %v671_v51 = vadd.f32 %v639_v56, %v509_v57  ;;  %v963_v26 = vmul.f32 %v6622_v55, %v6827_v39  ;;  %v1435_v44 = vmul.f32 %v6649_v36, %v1401_v62 }
  0xf0   : > { %v1790_v17 = vadd.f32 %v1758_v38, %v1628_v3  ;;  %v1481_v14 = vadd.f32 %v1449_v28, %v1318_v34  ;;  %v1142_v4 = vadd.f32 %v1110_v6, %v980_v13  ;;  %v1597_v24 = vmul.f32 %v6656_v53, %v1563_v35  ;;  %v1740_v38 = vld [vmem:[#allocation2 + $0x18a] sm:$0xff] }
  0xf1   : > { %v833_v37 = vadd.f32 %v801_v54, %v671_v51  ;;  %v1125_v27 = vmul.f32 %v6632_v32, %v6611_v33  ;;  %v510_v59 = vmul.f32 %v6589_v46, %v6777_v52  ;;  %v640_v49 = vmul.f32 %v6561_v25, %v6570_v41 }
  0xf2   : > { %v1889_v1 = vadd.f32 %v6720_v12, %v1790_v17  ;;  %v1643_v7 = vadd.f32 %v1611_v16, %v1481_v14  ;;  %v1304_v5 = vadd.f32 %v1272_v40, %v1142_v4  ;;  %v1759_v19 = vmul.f32 %v6665_v31, %v1725_v30  ;;  %v1579_v14 = vld [vmem:[#allocation2 + $0x199] sm:$0xff] }
  0xf3   : > { %2021 = vmatmul.f32.gmra.mxu2 %v1903_v10  ;;  %v995_v45 = vadd.f32 %v963_v26, %v833_v37  ;;  %v1287_v0 = vmul.f32 %v6597_v22, %v6830_v43  ;;  %v802_v28 = vmul.f32 %v6606_v21, %v6784_v47  ;;  %v672_v58 = vadd.f32 %v640_v49, %v510_v59  ;;  %v5596_v26 = vld [vmem:[#allocation2] sm:$0xff] }
  0xf4   : > { %1979 = vmatmul.f32.gmra.mxu0 %v1889_v1  ;;  %v1805_v52 = vadd.f32 %v1773_v2, %v1643_v7  ;;  %v1467_v50 = vadd.f32 %v1435_v44, %v1304_v5  ;;  %v964_v18 = vmul.f32 %v6622_v55, %v1415_v60  ;;  %v1450_v16 = vmul.f32 %v6649_v36, %v1416_v48 }
  0xf5   : > { %v1157_v6 = vadd.f32 %v1125_v27, %v995_v45  ;;  %v1612_v40 = vmul.f32 %v6656_v53, %v6724_v61  ;;  %v1774_v57 = vmul.f32 %v6665_v31, %v1740_v38  ;;  %v834_v56 = vadd.f32 %v802_v28, %v672_v58  ;;  %v6931_v27 = vpop.f32.mrf.mxu0  ;;  %v1580_v28 = vld [vmem:[#allocation2 + $0x1a1] sm:$0xff] }
  0xf6   : > { %v1629_v62 = vadd.f32 %v1597_v24, %v1467_v50  ;;  %v1126_v3 = vmul.f32 %v6632_v32, %v6698_v9  ;;  %v1904_v47 = vadd.f32 %v6720_v12, %v1805_v52  ;;  %v1288_v13 = vmul.f32 %v6597_v22, %v1739_v29 }
  0xf7   : > { %v1319_v34 = vadd.f32 %v1287_v0, %v1157_v6  ;;  %v2037_v60 = vsub.f32 0.0, %v6897_v11  ;;  %v996_v54 = vadd.f32 %v964_v18, %v834_v56  ;;  %v511_v10 = vmul.f32 %v6589_v46, %v6827_v39  ;;  %v2683_v18 = vld [vmem:[%s9302_s4 + $0x30] sm:$0xff]  ;;  %v1742_v6 = vld [vmem:[#allocation2 + $0x1a2] sm:$0xff] }
  0xf8   : > { %v1791_v35 = vadd.f32 %v1759_v19, %v1629_v62  ;;  %v641_v2 = vmul.f32 %v6561_v25, %v6611_v33  ;;  %v1451_v17 = vmul.f32 %v5596_v26, %v6649_v36  ;;  %v803_v44 = vmul.f32 %v6606_v21, %v6830_v43  ;;  %v1741_v36 = vld [vmem:[#allocation2 + $0x19a] sm:$0xff] }
  0xf9   : > { %v1482_v51 = vadd.f32 %v1450_v16, %v1319_v34  ;;  %v2069_v4 = vmul.f32 1.442695, %v2037_v60  ;;  %v1158_v30 = vadd.f32 %v1126_v3, %v996_v54  ;;  %v965_v37 = vmul.f32 %v6622_v55, %v1416_v48 }
  0xfa   : > { %v1890_v29 = vadd.f32 %v6720_v12, %v1791_v35  ;;  %v673_v24 = vadd.f32 %v641_v2, %v511_v10  ;;  %v1613_v46 = vmul.f32 %v6656_v53, %v1579_v14  ;;  %v1127_v21 = vmul.f32 %v6632_v32, %v6724_v61  ;;  %v2684_v32 = vld [vmem:[%s9302_s4 + $0x38] sm:$0xff] }
  0xfb   : > { %2024 = vmatmul.f32.gmra.mxu2 %v1904_v47  ;;  %v1644_v39 = vadd.f32 %v1612_v40, %v1482_v51  ;;  %5330 = vpow2.f32 %v2069_v4  ;;  %v1320_v25 = vadd.f32 %v1288_v13, %v1158_v30  ;;  %v2038_v1 = vsub.f32 0.0, %v6931_v27  ;;  %2794 = vmatpush.msra.mxu1 %v2684_v32  ;;  %v2682_v40 = vld [vmem:[%s9302_s4 + $0x28] sm:$0xff]  ;;  %v2681_v47 = vld [vmem:[%s9302_s4 + $0x20] sm:$0xff]  ;;  %v2680_v13 = vld [vmem:[%s9302_s4 + $0x18] sm:$0xff] }
  0xfc   : > { %1982 = vmatmul.f32.gmra.mxu0 %v1890_v29  ;;  %v835_v59 = vadd.f32 %v803_v44, %v673_v24  ;;  %v1289_v55 = vmul.f32 %v6597_v22, %v1740_v38  ;;  %v1775_v49 = vmul.f32 %v6665_v31, %v1741_v36  ;;  %5250 = vmatpush.msra.mxu3 %v2684_v32  ;;  %v2678_v24 = vld [vmem:[%s9302_s4 + $0x8] sm:$0xff] }
  0xfd   : > { %v1806_v43 = vadd.f32 %v1774_v57, %v1644_v39  ;;  %v1483_v7 = vadd.f32 %v1451_v17, %v1320_v25  ;;  %v2071_v19 = vmul.f32 1.442695, %v2038_v1  ;;  %v1614_v38 = vmul.f32 %v6656_v53, %v1580_v28  ;;  %2795 = vmatpush.msra.mxu1 %v2683_v18 }
  0xfe   : > { %v997_v5 = vadd.f32 %v965_v37, %v835_v59  ;;  %5251 = vmatpush.msra.mxu3 %v2683_v18  ;;  %v1776_v3 = vmul.f32 %v6665_v31, %v1742_v6  ;;  %v2679_v31 = vld [vmem:[%s9302_s4 + $0x10] sm:$0xff] }
  0xff   : > { %v1905_v48 = vadd.f32 %v6720_v12, %v1806_v43  ;;  %v1645_v45 = vadd.f32 %v1613_v46, %v1483_v7  ;;  %5332 = vpow2.f32 %v2071_v19  ;;  %2796 = vmatpush.msra.mxu1 %v2682_v40 }
 0x100   : > { %v1159_v0 = vadd.f32 %v1127_v21, %v997_v5  ;;  %5252 = vmatpush.msra.mxu3 %v2682_v40 }
 0x101   : > { %v5331_v52 = vpop.eup %5330  ;;  %v1807_v22 = vadd.f32 %v1775_v49, %v1645_v45  ;;  %2797 = vmatpush.msra.mxu1 %v2681_v47 }
 0x102   : > { %v2133_v50 = vadd.f32 1.0, %v5331_v52  ;;  %v1321_v58 = vadd.f32 %v1289_v55, %v1159_v0  ;;  %5253 = vmatpush.msra.mxu3 %v2681_v47 }
 0x103   : > { %2027 = vmatmul.f32.gmra.mxu2 %v1905_v48  ;;  %v1906_v57 = vadd.f32 %v6720_v12, %v1807_v22  ;;  %2798 = vmatpush.msra.mxu1 %v2680_v13 }
 0x104   : > { %5334 = vrcp.f32 %v2133_v50  ;;  %v1484_v16 = vadd.f32 %v1451_v17, %v1321_v58  ;;  %5254 = vmatpush.msra.mxu3 %v2680_v13  ;;  %vm2170_vm0 = vweird.f32 %v2133_v50  ;;  %v2176_v2 = vand.u32 2147483648, %v2133_v50 }
 0x105   : > { %v5333_v62 = vpop.eup %5332  ;;  %2799 = vmatpush.msra.mxu1 %v2679_v31  ;;  %v2174_v17 = vand.u32 2147483647, %v2133_v50 }
 0x106   : > { %v1646_v56 = vadd.f32 %v1614_v38, %v1484_v16  ;;  %v2134_v53 = vadd.f32 1.0, %v5333_v62  ;;  %5255 = vmatpush.msra.mxu3 %v2679_v31  ;;  %v2177_v37 = vor.u32 1.1754944e-38, %v2176_v2 }
 0x107   : > { %2800 = vmatpush.msra.mxu1 %v2678_v24  ;;  %vm2175_vm3 = vcmp.eq.f32.partialorder %v2174_v17, 8.507059e+37 }
 0x108   : > { %5336 = vrcp.f32 %v2134_v53  ;;  %v1808_v35 = vadd.f32 %v1776_v3, %v1646_v56  ;;  %5256 = vmatpush.msra.mxu3 %v2678_v24  ;;  %vm2185_vm4 = vweird.f32 %v2134_v53  ;;  %v2191_v36 = vand.u32 2147483648, %v2134_v53 }
 0x109   : > { %v2189_v43 = vand.u32 2147483647, %v2134_v53 }
 0x10a   : > { %v5335_v34 = vpop.eup %5334  ;;  %v1907_v14 = vadd.f32 %v6720_v12, %v1808_v35  ;;  %v2677_v12 = vld [vmem:[%s9302_s4] sm:$0xff]  ;;  %v2192_v49 = vor.u32 1.1754944e-38, %v2191_v36 }
 0x10b   : > { %2030 = vmatmul.f32.gmra.mxu2 %v1906_v57  ;;  %v2166_v60 = vmul.f32 %v5335_v34, %v2133_v50  ;;  %vm2171_vm1 = vweird.f32 %v5335_v34  ;;  %2801 = vmatpush.msra.mxu1 %v2677_v12  ;;  %vm2190_vm8 = vcmp.eq.f32.partialorder %v2189_v43, 8.507059e+37 }
 0x10c   : > { %vm2172_vm2 = vmor %vm2170_vm0, %vm2171_vm1  ;;  %5257 = vmatpush.msra.mxu3 %v2677_v12 }
 0x10d   : > { %v2167_v54 = vsub.f32 1.0, %v2166_v60 }
 0x10e   : > { %v5337_v4 = vpop.eup %5336 }
 0x10f   : > { %v6961_v10 = vpop.f32.mrf.mxu0  ;;  %v2168_v26 = vmul.f32 %v5335_v34, %v2167_v54  ;;  %v2181_v30 = vmul.f32 %v5337_v4, %v2134_v53  ;;  %vm2186_vm6 = vweird.f32 %v5337_v4 }
 0x110   : > { %v2039_v51 = vsub.f32 0.0, %v6961_v10  ;;  %vm2187_vm7 = vmor %vm2185_vm4, %vm2186_vm6 }
 0x111   : > { %v2169_v29 = vadd.f32 %v5335_v34, %v2168_v26  ;;  %v2182_v25 = vsub.f32 1.0, %v2181_v30 }
 0x112   : > { %v2073_v44 = vmul.f32 1.442695, %v2039_v51 }
 0x113   : > { %v2173_v39 = vsel %vm2172_vm2, %v5335_v34, %v2169_v29  ;;  %2033 = vmatmul.f32.gmra.mxu2 %v1907_v14  ;;  %v2183_v21 = vmul.f32 %v5337_v4, %v2182_v25 }
 0x114   : > { %5338 = vpow2.f32 %v2073_v44  ;;  %v2178_v46 = vsel %vm2175_vm3, %v2177_v37, %v2173_v39 }
 0x115   : > { %v2645_v59 = vmul.f32 %v2178_v46, %v6897_v11  ;;  %v2184_v55 = vadd.f32 %v5337_v4, %v2183_v21 }
 0x116   : > { %v6974_v7 = vpop.f32.mrf.mxu2 }
 0x117   : > { %v6972_v1 = vpop.f32.mrf.mxu0  ;;  %5195 = vmatmul.msk.f32.vlgmr.msra.gmra.mxu1 %vm2689_vm5, %v2645_v59  ;;  %v2188_v45 = vsel %vm2187_vm7, %v5337_v4, %v2184_v55  ;;  %v2052_v46 = vsub.f32 0.0, %v6974_v7 }
 0x118   : > { %v2040_v5 = vsub.f32 0.0, %v6972_v1  ;;  %v2193_v0 = vsel %vm2190_vm8, %v2192_v49, %v2188_v45 }
 0x119   : > { %v2646_v28 = vmul.f32 %v2193_v0, %v6931_v27  ;;  %v2099_v45 = vmul.f32 1.442695, %v2052_v46 }
 0x11a   : > { %v5339_v48 = vpop.eup %5338  ;;  %v2075_v19 = vmul.f32 1.442695, %v2040_v5 }
 0x11b   : > { %v2135_v11 = vadd.f32 1.0, %v5339_v48 }
 0x11c   : > { %5340 = vpow2.f32 %v2075_v19 }
 0x11d   : > { %5342 = vrcp.f32 %v2135_v11  ;;  %vm2200_vm9 = vweird.f32 %v2135_v11  ;;  %v2206_v62 = vand.u32 2147483648, %v2135_v11  ;;  %v2204_v56 = vand.u32 2147483647, %v2135_v11 }
 0x11e   : > { %v6980_v52 = vpop.f32.mrf.mxu2 }
 0x11f   : > { %v6982_v32 = vpop.f32.mrf.mxu0  ;;  %5196 = vmatmul.msk.f32.gmra.mxu1 %vm2689_vm5, %v2646_v28  ;;  %v2207_v60 = vor.u32 1.1754944e-38, %v2206_v62  ;;  %vm2205_vm12 = vcmp.eq.f32.partialorder %v2204_v56, 8.507059e+37  ;;  %v2053_v21 = vsub.f32 0.0, %v6980_v52 }
 0x120   : > { %v2041_v58 = vsub.f32 0.0, %v6982_v32 }
 0x122   : > { %v5341_v50 = vpop.eup %5340  ;;  %v2077_v18 = vmul.f32 1.442695, %v2041_v58  ;;  %v2101_v58 = vmul.f32 1.442695, %v2053_v21 }
 0x123   : > { %v2136_v22 = vadd.f32 1.0, %v5341_v50  ;;  %v5343_v38 = vpop.eup %5342 }
 0x124   : > { %v2196_v6 = vmul.f32 %v5343_v38, %v2135_v11  ;;  %vm2201_vm10 = vweird.f32 %v5343_v38 }
 0x125   : > { %5344 = vrcp.f32 %v2136_v22  ;;  %vm2202_vm11 = vmor %vm2200_vm9, %vm2201_vm10  ;;  %vm2215_vm13 = vweird.f32 %v2136_v22  ;;  %v2221_v29 = vand.u32 2147483648, %v2136_v22  ;;  %v2219_v37 = vand.u32 2147483647, %v2136_v22 }
 0x126   : > { %v2197_v16 = vsub.f32 1.0, %v2196_v6  ;;  %v6986_v40 = vpop.f32.mrf.mxu2  ;;  %5346 = vpow2.f32 %v2077_v18 }
 0x127   : > { %v2054_v57 = vsub.f32 0.0, %v6986_v40  ;;  %v2222_v59 = vor.u32 1.1754944e-38, %v2221_v29  ;;  %vm2220_vm0 = vcmp.eq.f32.partialorder %v2219_v37, 8.507059e+37 }
 0x128   : > { %v2198_v27 = vmul.f32 %v5343_v38, %v2197_v16  ;;  %v6989_v3 = vpop.f32.mrf.mxu0 }
 0x129   : > { %v2103_v47 = vmul.f32 1.442695, %v2054_v57  ;;  %v2042_v35 = vsub.f32 0.0, %v6989_v3 }
 0x12a   : > { %v2199_v53 = vadd.f32 %v5343_v38, %v2198_v27 }
 0x12b   : > { %v5345_v34 = vpop.eup %5344  ;;  %5348 = vpow2.f32 %v2103_v47  ;;  %v2079_v44 = vmul.f32 1.442695, %v2042_v35 }
 0x12c   : > { %v2203_v13 = vsel %vm2202_vm11, %v5343_v38, %v2199_v53  ;;  %v5347_v31 = vpop.eup %5346  ;;  %v2211_v2 = vmul.f32 %v5345_v34, %v2136_v22  ;;  %vm2216_vm14 = vweird.f32 %v5345_v34 }
 0x12d   : > { %v2208_v54 = vsel %vm2205_vm12, %v2207_v60, %v2203_v13  ;;  %v6995_v17 = vadd.f32 1.0, %v5347_v31  ;;  %vm2217_vm15 = vmor %vm2215_vm13, %vm2216_vm14 }
 0x12e   : > { %v2647_v51 = vmul.f32 %v2208_v54, %v6961_v10  ;;  %v6993_v26 = vpop.f32.mrf.mxu2  ;;  %v2212_v14 = vsub.f32 1.0, %v2211_v2 }
 0x12f   : > { %v2055_v4 = vsub.f32 0.0, %v6993_v26  ;;  %5350 = vrcp.f32 %v6995_v17  ;;  %v2234_v18 = vand.u32 2147483647, %v6995_v17  ;;  %v2236_v6 = vand.u32 2147483648, %v6995_v17 }
 0x130   : > { %5197 = vmatmul.msk.f32.gmra.mxu1 %vm2689_vm5, %v2647_v51  ;;  %v2213_v24 = vmul.f32 %v5345_v34, %v2212_v14  ;;  %5352 = vpow2.f32 %v2079_v44  ;;  %vm2230_vm1 = vweird.f32 %v6995_v17 }
 0x131   : > { %v5349_v30 = vpop.eup %5348  ;;  %v7000_v10 = vpop.f32.mrf.mxu0  ;;  %v2105_v25 = vmul.f32 1.442695, %v2055_v4  ;;  %vm7028_vm3 = vcmp.eq.f32.partialorder %v2234_v18, 8.507059e+37  ;;  %v2237_v31 = vor.u32 1.1754944e-38, %v2236_v6 }
 0x132   : > { %v7002_v39 = vadd.f32 1.0, %v5349_v30  ;;  %v2043_v12 = vsub.f32 0.0, %v7000_v10  ;;  %v2214_v36 = vadd.f32 %v5345_v34, %v2213_v24 }
 0x134   : > { %5354 = vrcp.f32 %v7002_v39  ;;  %v2218_v43 = vsel %vm2217_vm15, %v5345_v34, %v2214_v36  ;;  %v2081_v49 = vmul.f32 1.442695, %v2043_v12  ;;  %v2429_v56 = vand.u32 2147483647, %v7002_v39 }
 0x135   : > { %v5351_v5 = vpop.eup %5350  ;;  %v2223_v55 = vsel %vm2220_vm0, %v2222_v59, %v2218_v43  ;;  %5356 = vpow2.f32 %v2105_v25  ;;  %v2431_v47 = vand.u32 2147483648, %v7002_v39  ;;  %vm2425_vm4 = vweird.f32 %v7002_v39 }
 0x136   : > { %v7009_v48 = vpop.f32.mrf.mxu2  ;;  %v5353_v19 = vpop.eup %5352  ;;  %v2648_v11 = vmul.f32 %v2223_v55, %v6972_v1  ;;  %v2226_v0 = vmul.f32 %v5351_v5, %v6995_v17  ;;  %5358 = vpow2.f32 %v2081_v49  ;;  %vm2231_vm2 = vweird.f32 %v5351_v5 }
 0x137   : > { %v2056_v28 = vsub.f32 0.0, %v7009_v48  ;;  %v7014_v50 = vadd.f32 1.0, %v5353_v19  ;;  %vm2232_vm7 = vmor %vm2230_vm1, %vm2231_vm2  ;;  %vm7039_vm8 = vcmp.eq.f32.partialorder %v2429_v56, 8.507059e+37  ;;  %v2432_v37 = vor.u32 1.1754944e-38, %v2431_v47 }
 0x138   : > { %v2227_v22 = vsub.f32 1.0, %v2226_v0  ;;  %5198 = vmatmul.msk.f32.gmra.mxu1 %vm2689_vm5, %v2648_v11 }
 0x139   : > { %v2107_v16 = vmul.f32 1.442695, %v2056_v28  ;;  %5360 = vrcp.f32 %v7014_v50  ;;  %v2249_v36 = vand.u32 2147483647, %v7014_v50  ;;  %v2251_v59 = vand.u32 2147483648, %v7014_v50 }
 0x13a   : > { %v5355_v38 = vpop.eup %5354  ;;  %v7020_v1 = vpop.f32.mrf.mxu0  ;;  %5362 = vpow2.f32 %v2099_v45  ;;  %v2228_v62 = vmul.f32 %v5351_v5, %v2227_v22  ;;  %vm2245_vm10 = vweird.f32 %v7014_v50 }
 0x13b   : > { %v2421_v27 = vmul.f32 %v5355_v38, %v7002_v39  ;;  %v5357_v57 = vpop.eup %5356  ;;  %5364 = vpow2.f32 %v2107_v16  ;;  %vm2426_vm6 = vweird.f32 %v5355_v38  ;;  %vm7076_vm13 = vcmp.eq.f32.partialorder %v2249_v36, 8.507059e+37 }
 0x13c   : > { %v7026_v34 = vadd.f32 1.0, %v5357_v57  ;;  %v2229_v13 = vadd.f32 %v5351_v5, %v2228_v62  ;;  %v5359_v60 = vpop.eup %5358  ;;  %5366 = vpow2.f32 %v2101_v58  ;;  %vm2427_vm9 = vmor %vm2425_vm4, %vm2426_vm6  ;;  %v2252_v6 = vor.u32 1.1754944e-38, %v2251_v59 }
 0x13d   : > { %v2422_v53 = vsub.f32 1.0, %v2421_v27  ;;  %v7044_v29 = vadd.f32 1.0, %v5359_v60 }
 0x13e   : > { %v7032_v54 = vpop.f32.mrf.mxu2  ;;  %5368 = vrcp.f32 %v7026_v34  ;;  %v2233_v4 = vsel %vm2232_vm7, %v5351_v5, %v2229_v13  ;;  %v2444_v39 = vand.u32 2147483647, %v7026_v34  ;;  %vm2440_vm12 = vweird.f32 %v7026_v34 }
 0x13f   : > { %v2423_v2 = vmul.f32 %v5355_v38, %v2422_v53  ;;  %v5361_v51 = vpop.eup %5360  ;;  %v2057_v44 = vsub.f32 0.0, %v7032_v54  ;;  %v2238_v25 = vsel %vm7028_vm3, %v2237_v31, %v2233_v4  ;;  %5370 = vrcp.f32 %v7044_v29 }
 0x140   : > { %v7046_v30 = vpop.eup %5362  ;;  %v2241_v17 = vmul.f32 %v5361_v51, %v7014_v50  ;;  %v2649_v46 = vmul.f32 %v2238_v25, %v6982_v32  ;;  %v2446_v32 = vand.u32 2147483648, %v7026_v34  ;;  %vm2246_vm11 = vweird.f32 %v5361_v51 }
 0x141   : > { %v2424_v24 = vadd.f32 %v5355_v38, %v2423_v2  ;;  %v5365_v12 = vpop.eup %5364  ;;  %v2109_v21 = vmul.f32 1.442695, %v2057_v44  ;;  %vm7082_vm14 = vcmp.eq.f32.partialorder %v2444_v39, 8.507059e+37  ;;  %vm2247_vm0 = vmor %vm2245_vm10, %vm2246_vm11  ;;  %vm2260_vm1 = vweird.f32 %v7044_v29 }
 0x142   : > { %v7056_v5 = vadd.f32 1.0, %v5365_v12  ;;  %v2242_v55 = vsub.f32 1.0, %v2241_v17  ;;  %v7059_v49 = vpop.eup %5366  ;;  %5199 = vmatmul.msk.f32.gmra.mxu1 %vm2689_vm5, %v2649_v46  ;;  %v2447_v62 = vor.u32 1.1754944e-38, %v2446_v32  ;;  %v2264_v50 = vand.u32 2147483647, %v7044_v29 }
 0x143   : > { %v2428_v43 = vsel %vm2427_vm9, %v5355_v38, %v2424_v24  ;;  %5372 = vpow2.f32 %v2109_v21  ;;  %v2044_v38 = vsub.f32 0.0, %v7020_v1  ;;  %v2266_v46 = vand.u32 2147483648, %v7044_v29 }
 0x144   : > { %v2433_v19 = vsel %vm7039_vm8, %v2432_v37, %v2428_v43  ;;  %v7065_v45 = vpop.f32.mrf.mxu0  ;;  %v5369_v11 = vpop.eup %5368  ;;  %5374 = vrcp.f32 %v7056_v5  ;;  %v2243_v58 = vmul.f32 %v5361_v51, %v2242_v55  ;;  %v2461_v12 = vand.u32 2147483648, %v7056_v5 }
 0x145   : > { %v2662_v0 = vmul.f32 %v2433_v19, %v6986_v40  ;;  %v2436_v28 = vmul.f32 %v5369_v11, %v7026_v34  ;;  %v7086_v56 = vpop.eup %5370  ;;  %vm2441_vm15 = vweird.f32 %v5369_v11  ;;  %v2045_v47 = vsub.f32 0.0, %v7065_v45 }
 0x146   : > { %v7072_v22 = vpop.f32.mrf.mxu2  ;;  %v2244_v57 = vadd.f32 %v5361_v51, %v2243_v58  ;;  %v2256_v31 = vmul.f32 %v7086_v56, %v7044_v29  ;;  %v2083_v2 = vmul.f32 1.442695, %v2044_v38  ;;  %vm2442_vm2 = vmor %vm2440_vm12, %vm2441_vm15  ;;  %vm2261_vm4 = vweird.f32 %v7086_v56 }
 0x147   : > { %v2058_v40 = vsub.f32 0.0, %v7072_v22  ;;  %5212 = vmatmul.msk.f32.vlgmr.msra.gmra.mxu3 %vm2689_vm5, %v2662_v0  ;;  %v2437_v16 = vsub.f32 1.0, %v2436_v28  ;;  %v2085_v17 = vmul.f32 1.442695, %v2045_v47  ;;  %v7120_v0 = vadd.f32 1.0, %v7046_v30  ;;  %vm7131_vm8 = vmor %vm2260_vm1, %vm2261_vm4 }
 0x148   : > { %v2248_v35 = vsel %vm2247_vm0, %v5361_v51, %v2244_v57  ;;  %v2459_v51 = vand.u32 2147483647, %v7056_v5  ;;  %v2257_v43 = vsub.f32 1.0, %v2256_v31  ;;  %vm2455_vm6 = vweird.f32 %v7056_v5 }
 0x149   : > { %v2111_v53 = vmul.f32 1.442695, %v2058_v40  ;;  %v5373_v13 = vpop.eup %5372  ;;  %v2438_v60 = vmul.f32 %v5369_v11, %v2437_v16  ;;  %v2253_v4 = vsel %vm7076_vm13, %v2252_v6, %v2248_v35  ;;  %v2462_v40 = vor.u32 1.1754944e-38, %v2461_v12 }
 0x14a   : > { %v5375_v14 = vpop.eup %5374  ;;  %v7096_v44 = vadd.f32 1.0, %v5373_v13  ;;  %v2650_v25 = vmul.f32 %v2253_v4, %v6989_v3  ;;  %v2258_v32 = vmul.f32 %v7086_v56, %v2257_v43  ;;  %vm7124_vm7 = vcmp.eq.f32.partialorder %v2459_v51, 8.507059e+37 }
 0x14b   : > { %5376 = vpow2.f32 %v2111_v53  ;;  %v2439_v24 = vadd.f32 %v5369_v11, %v2438_v60  ;;  %v2451_v37 = vmul.f32 %v5375_v14, %v7056_v5  ;;  %vm2456_vm3 = vweird.f32 %v5375_v14 }
 0x14c   : > { %5378 = vrcp.f32 %v7096_v44  ;;  %5200 = vmatmul.msk.f32.gmra.mxu1 %vm2689_vm5, %v2650_v25  ;;  %vm2457_vm9 = vmor %vm2455_vm6, %vm2456_vm3  ;;  %vm2265_vm10 = vcmp.eq.f32.partialorder %v2264_v50, 8.507059e+37  ;;  %v2267_v16 = vor.u32 1.1754944e-38, %v2266_v46  ;;  %v2476_v50 = vand.u32 2147483648, %v7096_v44 }
 0x14d   : > { %v7108_v36 = vpop.f32.mrf.mxu0  ;;  %v2443_v59 = vsel %vm2442_vm2, %v5369_v11, %v2439_v24  ;;  %v2452_v21 = vsub.f32 1.0, %v2451_v37  ;;  %5380 = vpow2.f32 %v2083_v2  ;;  %vm2470_vm12 = vweird.f32 %v7096_v44 }
 0x14e   : > { %v7110_v3 = vpop.f32.mrf.mxu2  ;;  %v2448_v34 = vsel %vm7082_vm14, %v2447_v62, %v2443_v59  ;;  %5382 = vpow2.f32 %v2085_v17  ;;  %v2046_v58 = vsub.f32 0.0, %v7108_v36 }
 0x14f   : > { %v2059_v55 = vsub.f32 0.0, %v7110_v3  ;;  %v2663_v19 = vmul.f32 %v2448_v34, %v6993_v26  ;;  %v2453_v39 = vmul.f32 %v5375_v14, %v2452_v21  ;;  %v2259_v26 = vadd.f32 %v7086_v56, %v2258_v32 }
 0x150   : > { %v2087_v53 = vmul.f32 1.442695, %v2046_v58  ;;  %v2477_v21 = vor.u32 1.1754944e-38, %v2476_v50 }
 0x151   : > { %v5377_v11 = vpop.eup %5376  ;;  %v2113_v28 = vmul.f32 1.442695, %v2059_v55  ;;  %v2454_v38 = vadd.f32 %v5375_v14, %v2453_v39  ;;  %5213 = vmatmul.msk.f32.gmra.mxu3 %vm2689_vm5, %v2663_v19  ;;  %v2263_v29 = vsel %vm7131_vm8, %v7086_v56, %v2259_v26  ;;  %v2474_v56 = vand.u32 2147483647, %v7096_v44 }
 0x152   : > { %v7135_v30 = vadd.f32 1.0, %v5377_v11  ;;  %v5379_v5 = vpop.eup %5378  ;;  %v2268_v13 = vsel %vm2265_vm10, %v2267_v16, %v2263_v29 }
 0x153   : > { %5384 = vpow2.f32 %v2113_v28  ;;  %v5381_v27 = vpop.eup %5380  ;;  %v2458_v62 = vsel %vm2457_vm9, %v5375_v14, %v2454_v38  ;;  %v2466_v57 = vmul.f32 %v5379_v5, %v7096_v44  ;;  %v2651_v2 = vmul.f32 %v2268_v13, %v7000_v10 }
 0x154   : > { %v2463_v47 = vsel %vm7124_vm7, %v2462_v40, %v2458_v62  ;;  %5386 = vrcp.f32 %v7135_v30  ;;  %v5383_v60 = vpop.eup %5382  ;;  %v7155_v24 = vadd.f32 1.0, %v5381_v27  ;;  %vm2471_vm11 = vweird.f32 %v5379_v5 }
 0x155   : > { %5388 = vrcp.f32 %v7120_v0  ;;  %v2664_v35 = vmul.f32 %v2463_v47, %v7009_v48  ;;  %v2467_v31 = vsub.f32 1.0, %v2466_v57  ;;  %v7151_v4 = vpop.f32.mrf.mxu0  ;;  %v7157_v37 = vadd.f32 1.0, %v5383_v60  ;;  %5201 = vmatmul.msk.f32.gmra.mxu1 %vm2689_vm5, %v2651_v2  ;;  %vm2472_vm13 = vmor %vm2470_vm12, %vm2471_vm11 }
 0x156   : > { %v7149_v14 = vpop.f32.mrf.mxu2  ;;  %v2489_v17 = vand.u32 2147483647, %v7135_v30  ;;  %5390 = vpow2.f32 %v2087_v53  ;;  %v7162_v48 = vadd.f32 1.0, %v7059_v49  ;;  %v2491_v12 = vand.u32 2147483648, %v7135_v30 }
 0x157   : > { %v2468_v25 = vmul.f32 %v5379_v5, %v2467_v31  ;;  %5392 = vrcp.f32 %v7155_v24  ;;  %vm2475_vm14 = vcmp.eq.f32.partialorder %v2474_v56, 8.507059e+37  ;;  %vm2485_vm15 = vweird.f32 %v7135_v30 }
 0x158   : > { %5394 = vrcp.f32 %v7157_v37  ;;  %v2060_v49 = vsub.f32 0.0, %v7149_v14  ;;  %vm7176_vm0 = vcmp.eq.f32.partialorder %v2489_v17, 8.507059e+37  ;;  %v2279_v19 = vand.u32 2147483647, %v7155_v24 }
 0x159   : > { %v5385_v10 = vpop.eup %5384  ;;  %v2469_v51 = vadd.f32 %v5379_v5, %v2468_v25  ;;  %5214 = vmatmul.msk.f32.gmra.mxu3 %vm2689_vm5, %v2664_v35  ;;  %v2281_v32 = vand.u32 2147483648, %v7155_v24  ;;  %v2047_v11 = vsub.f32 0.0, %v7151_v4  ;;  %v2492_v18 = vor.u32 1.1754944e-38, %v2491_v12 }
 0x15a   : > { %v7167_v46 = vadd.f32 1.0, %v5385_v10  ;;  %v5387_v59 = vpop.eup %5386  ;;  %vm2275_vm1 = vweird.f32 %v7155_v24  ;;  %vm2290_vm2 = vweird.f32 %v7157_v37  ;;  %v2115_v40 = vmul.f32 1.442695, %v2060_v49 }
 0x15b   : > { %v7173_v44 = vpop.eup %5388  ;;  %v2473_v43 = vsel %vm2472_vm13, %v5379_v5, %v2469_v51  ;;  %v2481_v34 = vmul.f32 %v5387_v59, %v7135_v30  ;;  %v2294_v5 = vand.u32 2147483647, %v7157_v37  ;;  %vm2486_vm3 = vweird.f32 %v5387_v59 }
 0x15c   : > { %v2478_v39 = vsel %vm2475_vm14, %v2477_v21, %v2473_v43  ;;  %5396 = vrcp.f32 %v7167_v46  ;;  %v5391_v28 = vpop.eup %5390  ;;  %vm7193_vm4 = vcmp.eq.f32.partialorder %v2279_v19, 8.507059e+37  ;;  %v2296_v29 = vand.u32 2147483648, %v7157_v37  ;;  %vm2487_vm7 = vmor %vm2485_vm15, %vm2486_vm3 }
 0x15d   : > { %v2665_v58 = vmul.f32 %v2478_v39, %v7032_v54  ;;  %v2482_v38 = vsub.f32 1.0, %v2481_v34  ;;  %v5393_v6 = vpop.eup %5392  ;;  %v7190_v16 = vadd.f32 1.0, %v5391_v28  ;;  %v2282_v47 = vor.u32 1.1754944e-38, %v2281_v32 }
 0x15e   : > { %v7186_v26 = vpop.f32.mrf.mxu2  ;;  %v5395_v27 = vpop.eup %5394  ;;  %v2271_v57 = vmul.f32 %v5393_v6, %v7155_v24  ;;  %v2504_v13 = vand.u32 2147483647, %v7167_v46  ;;  %5398 = vpow2.f32 %v2115_v40  ;;  %vm2500_vm6 = vweird.f32 %v7167_v46 }
 0x15f   : > { %v2483_v62 = vmul.f32 %v5387_v59, %v2482_v38  ;;  %v7198_v53 = vpop.f32.mrf.mxu0  ;;  %v2286_v60 = vmul.f32 %v5395_v27, %v7157_v37  ;;  %v2506_v2 = vand.u32 2147483648, %v7167_v46  ;;  %5400 = vrcp.f32 %v7190_v16 }
 0x160   : > { %v2272_v31 = vsub.f32 1.0, %v2271_v57  ;;  %vm7209_vm8 = vcmp.eq.f32.partialorder %v2294_v5, 8.507059e+37  ;;  %v2061_v17 = vsub.f32 0.0, %v7186_v26  ;;  %v2089_v10 = vmul.f32 1.442695, %v2047_v11 }
 0x161   : > { %v2484_v35 = vadd.f32 %v5387_v59, %v2483_v62  ;;  %5215 = vmatmul.msk.f32.gmra.mxu3 %vm2689_vm5, %v2665_v58  ;;  %v2287_v50 = vsub.f32 1.0, %v2286_v60  ;;  %vm2276_vm9 = vweird.f32 %v5393_v6  ;;  %vm2291_vm11 = vweird.f32 %v5395_v27 }
 0x162   : > { %v5397_v56 = vpop.eup %5396  ;;  %v2273_v12 = vmul.f32 %v5393_v6, %v2272_v31  ;;  %v2117_v39 = vmul.f32 1.442695, %v2061_v17  ;;  %vm2277_vm12 = vmor %vm2275_vm1, %vm2276_vm9  ;;  %5402 = vpow2.f32 %v2089_v10  ;;  %v2048_v55 = vsub.f32 0.0, %v7198_v53 }
 0x163   : > { %v2488_v51 = vsel %vm2487_vm7, %v5387_v59, %v2484_v35  ;;  %v2496_v21 = vmul.f32 %v5397_v56, %v7167_v46  ;;  %vm2501_vm10 = vweird.f32 %v5397_v56  ;;  %v2288_v43 = vmul.f32 %v5395_v27, %v2287_v50  ;;  %vm7229_vm13 = vmor %vm2290_vm2, %vm2291_vm11 }
 0x164   : > { %v2493_v49 = vsel %vm7176_vm0, %v2492_v18, %v2488_v51  ;;  %v2274_v34 = vadd.f32 %v5393_v6, %v2273_v12  ;;  %v5399_v28 = vpop.eup %5398  ;;  %5404 = vpow2.f32 %v2117_v39  ;;  %v2297_v62 = vor.u32 1.1754944e-38, %v2296_v29  ;;  %vm2502_vm15 = vmor %vm2500_vm6, %vm2501_vm10 }
 0x165   : > { %v2666_v30 = vmul.f32 %v2493_v49, %v7072_v22  ;;  %v2497_v19 = vsub.f32 1.0, %v2496_v21  ;;  %v2289_v59 = vadd.f32 %v5395_v27, %v2288_v43  ;;  %v7224_v58 = vpop.eup %5400  ;;  %v7233_v5 = vadd.f32 1.0, %v5399_v28 }
 0x166   : > { %v7218_v32 = vpop.f32.mrf.mxu2  ;;  %v2278_v38 = vsel %vm2277_vm12, %v5393_v6, %v2274_v34  ;;  %v2301_v6 = vmul.f32 %v7224_v58, %v7190_v16  ;;  %vm2505_vm14 = vcmp.eq.f32.partialorder %v2504_v13, 8.507059e+37  ;;  %v2507_v54 = vor.u32 1.1754944e-38, %v2506_v2 }
 0x167   : > { %v2062_v11 = vsub.f32 0.0, %v7218_v32  ;;  %v2498_v18 = vmul.f32 %v5397_v56, %v2497_v19  ;;  %v2283_v24 = vsel %vm7193_vm4, %v2282_v47, %v2278_v38  ;;  %v2293_v40 = vsel %vm7229_vm13, %v5395_v27, %v2289_v59 }
 0x168   : > { %v2652_v57 = vmul.f32 %v2283_v24, %v7020_v1  ;;  %5406 = vrcp.f32 %v7233_v5  ;;  %v7244_v60 = vpop.f32.mrf.mxu0  ;;  %v2298_v27 = vsel %vm7209_vm8, %v2297_v62, %v2293_v40  ;;  %vm2305_vm0 = vweird.f32 %v7190_v16  ;;  %v5403_v31 = vpop.eup %5402 }
 0x169   : > { %v2499_v37 = vadd.f32 %v5397_v56, %v2498_v18  ;;  %5216 = vmatmul.msk.f32.gmra.mxu3 %vm2689_vm5, %v2666_v30  ;;  %v2309_v1 = vand.u32 2147483647, %v7190_v16  ;;  %v2302_v47 = vsub.f32 1.0, %v2301_v6  ;;  %v2119_v13 = vmul.f32 1.442695, %v2062_v11 }
 0x16a   : > { %v2091_v35 = vmul.f32 1.442695, %v2048_v55  ;;  %5202 = vmatmul.msk.f32.gmra.mxu1 %vm2689_vm5, %v2652_v57  ;;  %vm2306_vm1 = vweird.f32 %v7224_v58  ;;  %v2311_v46 = vand.u32 2147483648, %v7190_v16  ;;  %v2049_v2 = vsub.f32 0.0, %v7244_v60  ;;  %v5405_v25 = vpop.eup %5404 }
 0x16b   : > { %v2503_v29 = vsel %vm2502_vm15, %v5397_v56, %v2499_v37  ;;  %v2303_v10 = vmul.f32 %v7224_v58, %v2302_v47  ;;  %v7259_v51 = vadd.f32 1.0, %v5403_v31  ;;  %5408 = vpow2.f32 %v2119_v13  ;;  %vm7276_vm2 = vmor %vm2305_vm0, %vm2306_vm1 }
 0x16c   : > { %v2508_v50 = vsel %vm2505_vm14, %v2507_v54, %v2503_v29  ;;  %v2653_v12 = vmul.f32 %v2298_v27, %v7065_v45  ;;  %v7264_v21 = vadd.f32 1.0, %v5405_v25  ;;  %5410 = vpow2.f32 %v2091_v35 }
 0x16d   : > { %v2667_v17 = vmul.f32 %v2508_v50, %v7110_v3  ;;  %v2519_v30 = vand.u32 2147483647, %v7233_v5  ;;  %v2521_v34 = vand.u32 2147483648, %v7233_v5  ;;  %v2304_v3 = vadd.f32 %v7224_v58, %v2303_v10 }
 0x16e   : > { %v7261_v56 = vpop.f32.mrf.mxu2  ;;  %v5407_v43 = vpop.eup %5406  ;;  %5412 = vrcp.f32 %v7259_v51  ;;  %v7283_v39 = vmul.f32 %v7173_v44, %v7120_v0  ;;  %v2093_v59 = vmul.f32 1.442695, %v2049_v2  ;;  %vm2310_vm3 = vcmp.eq.f32.partialorder %v2309_v1, 8.507059e+37 }
 0x16f   : > { %v2063_v49 = vsub.f32 0.0, %v7261_v56  ;;  %v2511_v19 = vmul.f32 %v5407_v43, %v7233_v5  ;;  %5414 = vrcp.f32 %v7264_v21  ;;  %v2308_v28 = vsel %vm7276_vm2, %v7224_v58, %v2304_v3 }
 0x170   : > { %5416 = vrcp.f32 %v7162_v48  ;;  %v2312_v11 = vor.u32 1.1754944e-38, %v2311_v46  ;;  %vm2515_vm4 = vweird.f32 %v7233_v5  ;;  %vm2516_vm6 = vweird.f32 %v5407_v43 }
 0x171   : > { %5217 = vmatmul.msk.f32.gmra.mxu3 %vm2689_vm5, %v2667_v17  ;;  %v2512_v16 = vsub.f32 1.0, %v2511_v19  ;;  %v2121_v55 = vmul.f32 1.442695, %v2063_v49  ;;  %v5409_v38 = vpop.eup %5408  ;;  %vm7291_vm7 = vcmp.eq.f32.partialorder %v2519_v30, 8.507059e+37  ;;  %v2522_v22 = vor.u32 1.1754944e-38, %v2521_v34  ;;  %vm2517_vm8 = vmor %vm2515_vm4, %vm2516_vm6 }
 0x172   : > { %5203 = vmatmul.msk.f32.gmra.mxu1 %vm2689_vm5, %v2653_v12  ;;  %v5411_v24 = vpop.eup %5410  ;;  %v2313_v40 = vsel %vm2310_vm3, %v2312_v11, %v2308_v28  ;;  %v7296_v62 = vadd.f32 1.0, %v5409_v38  ;;  %v2534_v57 = vand.u32 2147483647, %v7264_v21  ;;  %v2324_v37 = vand.u32 2147483647, %v7259_v51  ;;  %v7328_v12 = vpop.f32.mrf.mxu0 }
 0x173   : > { %v2513_v58 = vmul.f32 %v5407_v43, %v2512_v16  ;;  %5418 = vpow2.f32 %v2121_v55  ;;  %v7300_v54 = vadd.f32 1.0, %v5411_v24  ;;  %v2536_v47 = vand.u32 2147483648, %v7264_v21 }
 0x174   : > { %v5413_v6 = vpop.eup %5412  ;;  %5420 = vpow2.f32 %v2093_v59  ;;  %v2654_v31 = vmul.f32 %v2313_v40, %v7108_v36  ;;  %vm2320_vm9 = vweird.f32 %v7259_v51  ;;  %v2326_v46 = vand.u32 2147483648, %v7259_v51 }
 0x175   : > { %v5415_v1 = vpop.eup %5414  ;;  %v2514_v29 = vadd.f32 %v5407_v43, %v2513_v58  ;;  %v2316_v13 = vmul.f32 %v5413_v6, %v7259_v51  ;;  %5422 = vrcp.f32 %v7296_v62  ;;  %vm2530_vm10 = vweird.f32 %v7264_v21 }
 0x176   : > { %v7302_v27 = vpop.f32.mrf.mxu2  ;;  %v7307_v35 = vpop.eup %5416  ;;  %v2526_v50 = vmul.f32 %v5415_v1, %v7264_v21  ;;  %5424 = vrcp.f32 %v7300_v54  ;;  %vm7320_vm11 = vcmp.eq.f32.partialorder %v2534_v57, 8.507059e+37  ;;  %vm7324_vm12 = vcmp.eq.f32.partialorder %v2324_v37, 8.507059e+37 }
 0x177   : > { %v2518_v2 = vsel %vm2517_vm8, %v5407_v43, %v2514_v29  ;;  %v2317_v25 = vsub.f32 1.0, %v2316_v13  ;;  %v2537_v30 = vor.u32 1.1754944e-38, %v2536_v47  ;;  %vm2321_vm13 = vweird.f32 %v5413_v6 }
 0x178   : > { %v2523_v17 = vsel %vm7291_vm7, %v2522_v22, %v2518_v2  ;;  %v2527_v10 = vsub.f32 1.0, %v2526_v50  ;;  %vm2531_vm14 = vweird.f32 %v5415_v1  ;;  %v2327_v45 = vor.u32 1.1754944e-38, %v2326_v46  ;;  %vm2322_vm0 = vmor %vm2320_vm9, %vm2321_vm13 }
 0x179   : > { %v5419_v49 = vpop.eup %5418  ;;  %v2668_v43 = vmul.f32 %v2523_v17, %v7149_v14  ;;  %v2318_v34 = vmul.f32 %v5413_v6, %v2317_v25  ;;  %vm2545_vm15 = vweird.f32 %v7296_v62  ;;  %v2549_v11 = vand.u32 2147483647, %v7296_v62  ;;  %vm2532_vm1 = vmor %vm2530_vm10, %vm2531_vm14 }
 0x17a   : > { %v5421_v3 = vpop.eup %5420  ;;  %v2528_v19 = vmul.f32 %v5415_v1, %v2527_v10  ;;  %v7331_v28 = vadd.f32 1.0, %v5419_v49  ;;  %5204 = vmatmul.msk.f32.gmra.mxu1 %vm2689_vm5, %v2654_v31  ;;  %v2050_v14 = vsub.f32 0.0, %v7328_v12  ;;  %v2551_v18 = vand.u32 2147483648, %v7296_v62  ;;  %v7366_v36 = vpop.f32.mrf.mxu0 }
 0x17b   : > { %v5423_v59 = vpop.eup %5422  ;;  %v2319_v16 = vadd.f32 %v5413_v6, %v2318_v34  ;;  %5218 = vmatmul.msk.f32.gmra.mxu3 %vm2689_vm5, %v2668_v43  ;;  %v2339_v22 = vand.u32 2147483647, %v7300_v54  ;;  %v7349_v57 = vadd.f32 1.0, %v5421_v3  ;;  %v2064_v51 = vsub.f32 0.0, %v7302_v27 }
 0x17c   : > { %v2529_v55 = vadd.f32 %v5415_v1, %v2528_v19  ;;  %v2541_v38 = vmul.f32 %v5423_v59, %v7296_v62  ;;  %v5425_v58 = vpop.eup %5424  ;;  %5426 = vrcp.f32 %v7331_v28  ;;  %v2095_v50 = vmul.f32 1.442695, %v2050_v14 }
 0x17d   : > { %v2323_v40 = vsel %vm2322_vm0, %v5413_v6, %v2319_v16  ;;  %v2331_v13 = vmul.f32 %v5425_v58, %v7300_v54  ;;  %v2341_v6 = vand.u32 2147483648, %v7300_v54  ;;  %vm2546_vm2 = vweird.f32 %v5423_v59 }
 0x17e   : > { %v7343_v24 = vpop.f32.mrf.mxu2  ;;  %v2533_v37 = vsel %vm2532_vm1, %v5415_v1, %v2529_v55  ;;  %v2328_v29 = vsel %vm7324_vm12, %v2327_v45, %v2323_v40  ;;  %v2542_v47 = vsub.f32 1.0, %v2541_v38  ;;  %vm7360_vm3 = vcmp.eq.f32.partialorder %v2549_v11, 8.507059e+37  ;;  %vm2547_vm7 = vmor %vm2545_vm15, %vm2546_vm2 }
 0x17f   : > { %v2538_v31 = vsel %vm7320_vm11, %v2537_v30, %v2533_v37  ;;  %v2655_v21 = vmul.f32 %v2328_v29, %v7151_v4  ;;  %v2332_v25 = vsub.f32 1.0, %v2331_v13  ;;  %v2552_v17 = vor.u32 1.1754944e-38, %v2551_v18 }
 0x180   : > { %v2669_v46 = vmul.f32 %v2538_v31, %v7186_v26  ;;  %v2543_v2 = vmul.f32 %v5423_v59, %v2542_v47  ;;  %vm2335_vm4 = vweird.f32 %v7300_v54  ;;  %5428 = vrcp.f32 %v7349_v57 }
 0x181   : > { %v2333_v5 = vmul.f32 %v5425_v58, %v2332_v25  ;;  %vm2336_vm6 = vweird.f32 %v5425_v58  ;;  %v2123_v4 = vmul.f32 1.442695, %v2064_v51  ;;  %vm7371_vm8 = vcmp.eq.f32.partialorder %v2339_v22, 8.507059e+37 }
 0x182   : > { %v2544_v10 = vadd.f32 %v5423_v59, %v2543_v2  ;;  %5205 = vmatmul.msk.f32.gmra.mxu1 %vm2689_vm5, %v2655_v21  ;;  %v5427_v26 = vpop.eup %5426  ;;  %v2342_v43 = vor.u32 1.1754944e-38, %v2341_v6  ;;  %5430 = vpow2.f32 %v2095_v50  ;;  %v2065_v30 = vsub.f32 0.0, %v7343_v24  ;;  %vm2337_vm9 = vmor %vm2335_vm4, %vm2336_vm6 }
 0x183   : > { %5219 = vmatmul.msk.f32.gmra.mxu3 %vm2689_vm5, %v2669_v46  ;;  %v2334_v3 = vadd.f32 %v5425_v58, %v2333_v5  ;;  %v2556_v19 = vmul.f32 %v5427_v26, %v7331_v28  ;;  %v2564_v45 = vand.u32 2147483647, %v7331_v28  ;;  %5432 = vpow2.f32 %v2123_v4 }
 0x184   : > { %v2548_v34 = vsel %vm2547_vm7, %v5423_v59, %v2544_v10  ;;  %v2125_v11 = vmul.f32 1.442695, %v2065_v30  ;;  %v2051_v14 = vsub.f32 0.0, %v7366_v36  ;;  %v2566_v38 = vand.u32 2147483648, %v7331_v28 }
 0x185   : > { %v2553_v62 = vsel %vm7360_vm3, %v2552_v17, %v2548_v34  ;;  %v2338_v55 = vsel %vm2337_vm9, %v5425_v58, %v2334_v3  ;;  %v2557_v59 = vsub.f32 1.0, %v2556_v19  ;;  %vm2561_vm10 = vweird.f32 %v5427_v26 }
 0x186   : > { %v7379_v16 = vpop.f32.mrf.mxu2  ;;  %v5429_v22 = vpop.eup %5428  ;;  %v2670_v40 = vmul.f32 %v2553_v62, %v7218_v32  ;;  %v2343_v51 = vsel %vm7371_vm8, %v2342_v43, %v2338_v55  ;;  %5434 = vpow2.f32 %v2125_v11  ;;  %v2097_v37 = vmul.f32 1.442695, %v2051_v14 }
 0x187   : > { %v2066_v18 = vsub.f32 0.0, %v7379_v16  ;;  %v2656_v54 = vmul.f32 %v2343_v51, %v7198_v53  ;;  %v2558_v29 = vmul.f32 %v5427_v26, %v2557_v59  ;;  %v2346_v47 = vmul.f32 %v5429_v22, %v7349_v57 }
 0x188   : > { %v5431_v58 = vpop.eup %5430  ;;  %vm2560_vm11 = vweird.f32 %v7331_v28  ;;  %vm7395_vm12 = vcmp.eq.f32.partialorder %v2564_v45, 8.507059e+37  ;;  %5436 = vpow2.f32 %v2097_v37  ;;  %vm2350_vm13 = vweird.f32 %v7349_v57 }
 0x189   : > { %v2127_v32 = vmul.f32 1.442695, %v2066_v18  ;;  %v2559_v31 = vadd.f32 %v5427_v26, %v2558_v29  ;;  %v2347_v21 = vsub.f32 1.0, %v2346_v47  ;;  %v7400_v6 = vadd.f32 1.0, %v5431_v58  ;;  %v5433_v53 = vpop.eup %5432  ;;  %vm2562_vm14 = vmor %vm2560_vm11, %vm2561_vm10 }
 0x18a   : > { %5206 = vmatmul.msk.f32.gmra.mxu1 %vm2689_vm5, %v2656_v54  ;;  %v2567_v50 = vor.u32 1.1754944e-38, %v2566_v38  ;;  %vm2351_vm15 = vweird.f32 %v5429_v22  ;;  %v2354_v28 = vand.u32 2147483647, %v7349_v57  ;;  %v2356_v46 = vand.u32 2147483648, %v7349_v57 }
 0x18b   : > { %5220 = vmatmul.msk.f32.gmra.mxu3 %vm2689_vm5, %v2670_v40  ;;  %v2563_v2 = vsel %vm2562_vm14, %v5427_v26, %v2559_v31  ;;  %v2348_v25 = vmul.f32 %v5429_v22, %v2347_v21  ;;  %v7406_v1 = vadd.f32 1.0, %v5433_v53  ;;  %5438 = vrcp.f32 %v7400_v6  ;;  %vm2352_vm0 = vmor %vm2350_vm13, %vm2351_vm15 }
 0x18c   : > { %v5435_v10 = vpop.eup %5434  ;;  %v2568_v5 = vsel %vm7395_vm12, %v2567_v50, %v2563_v2  ;;  %5440 = vpow2.f32 %v2127_v32  ;;  %v2392_v43 = vsub.f32 1.0, %v7283_v39  ;;  %v7417_v26 = vmul.f32 %v7307_v35, %v7162_v48 }
 0x18d   : > { %v2349_v4 = vadd.f32 %v5429_v22, %v2348_v25  ;;  %5442 = vrcp.f32 %v7406_v1  ;;  %v2671_v30 = vmul.f32 %v2568_v5, %v7261_v56  ;;  %v2357_v34 = vor.u32 1.1754944e-38, %v2356_v46  ;;  %v7464_v5 = vld [vmem:[%s9303_s5] ss:$0 sm:$0xff] }
 0x18e   : > { %v7409_v17 = vpop.f32.mrf.mxu2  ;;  %v5437_v49 = vpop.eup %5436  ;;  %vm2355_vm1 = vcmp.eq.f32.partialorder %v2354_v28, 8.507059e+37  ;;  %v7423_v19 = vadd.f32 1.0, %v5435_v10  ;;  %v2369_v39 = vand.u32 2147483647, %v7400_v6  ;;  %v2371_v11 = vand.u32 2147483648, %v7400_v6 }
 0x18f   : > { %v2353_v3 = vsel %vm2352_vm0, %v5429_v22, %v2349_v4  ;;  %v7425_v45 = vadd.f32 1.0, %v5437_v49  ;;  %v2579_v56 = vand.u32 2147483647, %v7406_v1  ;;  %v2581_v57 = vand.u32 2147483648, %v7406_v1 }
 0x190   : > { %v2358_v62 = vsel %vm2355_vm1, %v2357_v34, %v2353_v3  ;;  %5444 = vrcp.f32 %v7423_v19  ;;  %v2399_v38 = vand.u32 2147483647, %v7120_v0  ;;  %v2067_v22 = vsub.f32 0.0, %v7409_v17 }
 0x191   : > { %v5439_v14 = vpop.eup %5438  ;;  %v2657_v55 = vmul.f32 %v2358_v62, %v7244_v60  ;;  %5446 = vrcp.f32 %v7425_v45  ;;  %v2393_v60 = vmul.f32 %v7173_v44, %v2392_v43  ;;  %v2401_v51 = vand.u32 2147483648, %v7120_v0 }
 0x192   : > { %v5441_v59 = vpop.eup %5440  ;;  %v2361_v18 = vmul.f32 %v5439_v14, %v7400_v6  ;;  %v2407_v37 = vsub.f32 1.0, %v7417_v26  ;;  %vm2365_vm2 = vweird.f32 %v7400_v6  ;;  %vm2575_vm3 = vweird.f32 %v7406_v1  ;;  %v7588_v26 = vld [vmem:[%s9304_s6 + $0x6] ss:$0 sm:$0xff] }
 0x193   : > { %5221 = vmatmul.msk.f32.gmra.mxu3 %vm2689_vm5, %v2671_v30  ;;  %v5443_v40 = vpop.eup %5442  ;;  %5207 = vmatmul.msk.f32.gmra.mxu1 %vm2689_vm5, %v2657_v55  ;;  %vm7445_vm4 = vcmp.eq.f32.partialorder %v2369_v39, 8.507059e+37  ;;  %vm7451_vm6 = vcmp.eq.f32.partialorder %v2579_v56, 8.507059e+37  ;;  %v2582_v32 = vor.u32 1.1754944e-38, %v2581_v57  ;;  %v2372_v31 = vor.u32 1.1754944e-38, %v2371_v11 }
 0x194   : > { %v2571_v54 = vmul.f32 %v5443_v40, %v7406_v1  ;;  %v2362_v29 = vsub.f32 1.0, %v2361_v18  ;;  %v7455_v21 = vadd.f32 1.0, %v5441_v59  ;;  %vm2366_vm7 = vweird.f32 %v5439_v14  ;;  %v2803_v4 = vpop.f32.mrf.mxu1 }
 0x195   : > { %v2129_v28 = vmul.f32 1.442695, %v2067_v22  ;;  %v2594_v2 = vand.u32 2147483647, %v7423_v19  ;;  %v2596_v25 = vand.u32 2147483648, %v7423_v19  ;;  %vm2576_vm8 = vweird.f32 %v5443_v40  ;;  %vm2367_vm10 = vmor %vm2365_vm2, %vm2366_vm7 }
 0x196   : > { %v7449_v58 = vpop.f32.mrf.mxu2  ;;  %v2572_v53 = vsub.f32 1.0, %v2571_v54  ;;  %v2363_v50 = vmul.f32 %v5439_v14, %v2362_v29  ;;  %v5445_v46 = vpop.eup %5444  ;;  %5448 = vrcp.f32 %v7455_v21  ;;  %vm2396_vm9 = vweird.f32 %v7173_v44  ;;  %vm2577_vm13 = vmor %vm2575_vm3, %vm2576_vm8 }
 0x197   : > { %v2068_v10 = vsub.f32 0.0, %v7449_v58  ;;  %v5447_v49 = vpop.eup %5446  ;;  %v2586_v34 = vmul.f32 %v5445_v46, %v7423_v19  ;;  %vm2380_vm11 = vweird.f32 %v7425_v45  ;;  %v2384_v62 = vand.u32 2147483647, %v7425_v45 }
 0x198   : > { %v2573_v43 = vmul.f32 %v5443_v40, %v2572_v53  ;;  %v2364_v30 = vadd.f32 %v5439_v14, %v2363_v50  ;;  %v2376_v3 = vmul.f32 %v5447_v49, %v7425_v45  ;;  %v2386_v39 = vand.u32 2147483648, %v7425_v45 }
 0x199   : > { %v2587_v56 = vsub.f32 1.0, %v2586_v34  ;;  %5450 = vpow2.f32 %v2129_v28  ;;  %vm2395_vm12 = vweird.f32 %v7120_v0  ;;  %v2131_v59 = vmul.f32 1.442695, %v2068_v10 }
 0x19a   : > { %v2574_v11 = vadd.f32 %v5443_v40, %v2573_v43  ;;  %v2368_v55 = vsel %vm2367_vm10, %v5439_v14, %v2364_v30  ;;  %v2377_v57 = vsub.f32 1.0, %v2376_v3  ;;  %v7481_v18 = vadd.f32 %v7464_v5, %v2803_v4  ;;  %vm7513_vm8 = vmor %vm2395_vm12, %vm2396_vm9 }
 0x19b   : > { %v2373_v6 = vsel %vm7445_vm4, %v2372_v31, %v2368_v55  ;;  %v2588_v29 = vmul.f32 %v5445_v46, %v2587_v56  ;;  %vm2591_vm14 = vweird.f32 %v5445_v46  ;;  %vm2381_vm15 = vweird.f32 %v5447_v49 }
 0x19c   : > { %v2578_v22 = vsel %vm2577_vm13, %v5443_v40, %v2574_v11  ;;  %v2658_v54 = vmul.f32 %v2373_v6, %v7328_v12  ;;  %v5449_v14 = vpop.eup %5448  ;;  %v2378_v50 = vmul.f32 %v5447_v49, %v2377_v57  ;;  %5452 = vpow2.f32 %v2131_v59  ;;  %2900 = vst [vmem:[#allocation2 + $0x19] sm:$0xff] %v7481_v18  ;;  %v2806_v31 = vpop.f32.mrf.mxu1  ;;  %vm2382_vm3 = vmor %vm2380_vm11, %vm2381_vm15 }
 0x19d   : > { %v2583_v53 = vsel %vm7451_vm6, %v2582_v32, %v2578_v22  ;;  %v2589_v47 = vadd.f32 %v5445_v46, %v2588_v29  ;;  %vm2590_vm0 = vweird.f32 %v7423_v19  ;;  %v2601_v40 = vmul.f32 %v5449_v14, %v7455_v21 }
 0x19e   : > { %v2672_v1 = vmul.f32 %v2583_v53, %v7302_v27  ;;  %5208 = vmatmul.msk.f32.gmra.mxu1 %vm2689_vm5, %v2658_v54  ;;  %v2394_v12 = vadd.f32 %v7173_v44, %v2393_v60  ;;  %vm2592_vm1 = vmor %vm2590_vm0, %vm2591_vm14  ;;  %vm2595_vm2 = vcmp.eq.f32.partialorder %v2594_v2, 8.507059e+37  ;;  %v2597_v13 = vor.u32 1.1754944e-38, %v2596_v25 }
 0x19f   : > { %v2379_v32 = vadd.f32 %v5447_v49, %v2378_v50  ;;  %v5451_v28 = vpop.eup %5450  ;;  %v2593_v10 = vsel %vm2592_vm1, %v5445_v46, %v2589_v47  ;;  %v2387_v27 = vor.u32 1.1754944e-38, %v2386_v39  ;;  %v2602_v4 = vsub.f32 1.0, %v2601_v40 }
 0x1a0   : > { %5222 = vmatmul.msk.f32.gmra.mxu3 %vm2689_vm5, %v2672_v1  ;;  %v7497_v19 = vadd.f32 %v7464_v5, %v2806_v31  ;;  %v2598_v43 = vsel %vm2595_vm2, %v2597_v13, %v2593_v10  ;;  %vm2385_vm4 = vcmp.eq.f32.partialorder %v2384_v62, 8.507059e+37  ;;  %v7499_v2 = vadd.f32 1.0, %v5451_v28 }
 0x1a1   : > { %v2383_v60 = vsel %vm2382_vm3, %v5447_v49, %v2379_v32  ;;  %v2408_v46 = vmul.f32 %v7307_v35, %v2407_v37  ;;  %v2603_v30 = vmul.f32 %v5449_v14, %v2602_v4  ;;  %vm2606_vm6 = vweird.f32 %v5449_v14 }
 0x1a2   : > { %v2388_v25 = vsel %vm2385_vm4, %v2387_v27, %v2383_v60  ;;  %2901 = vst [vmem:[#allocation2 + $0x21] sm:$0xff] %v7497_v19  ;;  %v5453_v45 = vpop.eup %5452  ;;  %vm2605_vm7 = vweird.f32 %v7455_v21  ;;  %v2611_v3 = vand.u32 2147483648, %v7455_v21  ;;  %5454 = vrcp.f32 %v7499_v2 }
 0x1a3   : > { %v2659_v34 = vmul.f32 %v2388_v25, %v7366_v36  ;;  %v2673_v37 = vmul.f32 %v2598_v43, %v7343_v24  ;;  %v2604_v49 = vadd.f32 %v5449_v14, %v2603_v30  ;;  %v2609_v62 = vand.u32 2147483647, %v7455_v21  ;;  %vm7521_vm10 = vmor %vm2605_vm7, %vm2606_vm6 }
 0x1a4   : > { %v7519_v36 = vadd.f32 1.0, %v5453_v45  ;;  %v2398_v11 = vsel %vm7513_vm8, %v7173_v44, %v2394_v12  ;;  %v2402_v55 = vor.u32 1.1754944e-38, %v2401_v51  ;;  %v2409_v24 = vadd.f32 %v7307_v35, %v2408_v46  ;;  %v7562_v12 = vld [vmem:[#allocation2 + $0x18] sm:$0xff]  ;;  %v7581_v46 = vld [vmem:[%s9304_s6 + $0x5] ss:$0 sm:$0xff] }
 0x1a5   : > { %v2608_v56 = vsel %vm7521_vm10, %v5449_v14, %v2604_v49  ;;  %vm2411_vm9 = vweird.f32 %v7307_v35  ;;  %v2416_v21 = vand.u32 2147483648, %v7162_v48  ;;  %v2612_v6 = vor.u32 1.1754944e-38, %v2611_v3  ;;  %v9441_v49 = vld [vmem:[#allocation16_spill] sm:$0xff] }
 0x1a6   : > { %5456 = vrcp.f32 %v7519_v36  ;;  %5209 = vmatmul.msk.f32.gmra.mxu1 %vm2689_vm5, %v2659_v34  ;;  %vm2400_vm11 = vcmp.eq.f32.partialorder %v2399_v38, 8.507059e+37  ;;  %vm2610_vm12 = vcmp.eq.f32.partialorder %v2609_v62, 8.507059e+37  ;;  %vm2410_vm13 = vweird.f32 %v7162_v48 }
 0x1a7   : > { %v2403_v51 = vsel %vm2400_vm11, %v2402_v55, %v2398_v11  ;;  %v2414_v57 = vand.u32 2147483647, %v7162_v48  ;;  %v2613_v59 = vsel %vm2610_vm12, %v2612_v6, %v2608_v56  ;;  %vm7542_vm14 = vmor %vm2410_vm13, %vm2411_vm9  ;;  %v2417_v38 = vor.u32 1.1754944e-38, %v2416_v21  ;;  %v7555_v48 = vld [vmem:[%s9304_s6 + $0x3] ss:$0 sm:$0xff] }
 0x1a8   : > { %5223 = vmatmul.msk.f32.gmra.mxu3 %vm2689_vm5, %v2673_v37  ;;  %v5455_v44 = vpop.eup %5454  ;;  %v2413_v0 = vsel %vm7542_vm14, %v7307_v35, %v2409_v24  ;;  %v2660_v53 = vmul.f32 %v2403_v51, %v6974_v7  ;;  %v2674_v50 = vmul.f32 %v2613_v59, %v7379_v16  ;;  %v2626_v40 = vand.u32 2147483648, %v7499_v2  ;;  %v7612_v59 = vld [vmem:[%s9304_s6 + $0x7] ss:$0 sm:$0xff] }
 0x1a9   : > { %v2616_v54 = vmul.f32 %v5455_v44, %v7499_v2  ;;  %vm2415_vm15 = vcmp.eq.f32.partialorder %v2414_v57, 8.507059e+37  ;;  %vm2621_vm0 = vweird.f32 %v5455_v44  ;;  %v2624_v16 = vand.u32 2147483647, %v7499_v2  ;;  %v2935_v43 = vld [vmem:[#allocation2 + $0x20] sm:$0xff] }
 0x1aa   : > { %v2418_v13 = vsel %vm2415_vm15, %v2417_v38, %v2413_v0  ;;  %vm2620_vm1 = vweird.f32 %v7499_v2  ;;  %v3420_v28 = vmul.f32 %v7555_v48, %v7562_v12  ;;  %v2627_v27 = vor.u32 1.1754944e-38, %v2626_v40  ;;  %v7576_v2 = vld [vmem:[%s9304_s6 + $0x4] ss:$0 sm:$0xff]  ;;  %v3226_v34 = vld [vmem:[#allocation2 + $0x1a] sm:$0xff]  ;;  %v7619_v0 = vld [vmem:[%s9304_s6 + $0x8] ss:$0 sm:$0xff] }
 0x1ab   : > { %v2617_v1 = vsub.f32 1.0, %v2616_v54  ;;  %v2661_v10 = vmul.f32 %v2418_v13, %v6980_v52  ;;  %vm2622_vm2 = vmor %vm2620_vm1, %vm2621_vm0  ;;  %vm2625_vm3 = vcmp.eq.f32.partialorder %v2624_v16, 8.507059e+37  ;;  %vm2635_vm4 = vweird.f32 %v7519_v36 }
 0x1ac   : > { %v5457_v14 = vpop.eup %5456  ;;  %v2639_v30 = vand.u32 2147483647, %v7519_v36  ;;  %v2641_v45 = vand.u32 2147483648, %v7519_v36  ;;  %v3452_v62 = vadd.f32 %v3420_v28, %v9441_v49  ;;  %v3421_v39 = vmul.f32 %v7555_v48, %v2935_v43 }
 0x1ad   : > { %v2809_v29 = vpop.f32.mrf.mxu1  ;;  %v2631_v35 = vmul.f32 %v5457_v14, %v7519_v36  ;;  %v2618_v7 = vmul.f32 %v5455_v44, %v2617_v1  ;;  %vm2636_vm6 = vweird.f32 %v5457_v14  ;;  %v3582_v24 = vmul.f32 %v7576_v2, %v7481_v18 }
 0x1ae   : > { %v7558_v47 = vadd.f32 %v7464_v5, %v2809_v29  ;;  %5210 = vmatmul.msk.f32.gmra.mxu1 %vm2689_vm5, %v2660_v53  ;;  %vm2637_vm7 = vmor %vm2635_vm4, %vm2636_vm6  ;;  %v2642_v21 = vor.u32 1.1754944e-38, %v2641_v45  ;;  %vm2640_vm8 = vcmp.eq.f32.partialorder %v2639_v30, 8.507059e+37  ;;  %v3583_v22 = vmul.f32 %v7576_v2, %v7497_v19  ;;  %v3227_v29 = vld [vmem:[#allocation2 + $0x22] sm:$0xff]  ;;  %v7647_v45 = vld [vmem:[%s9304_s6] ss:$0 sm:$0xff] }
 0x1af   : > { %v2632_v32 = vsub.f32 1.0, %v2631_v35  ;;  %v2619_v31 = vadd.f32 %v5455_v44, %v2618_v7  ;;  %v3614_v6 = vadd.f32 %v3582_v24, %v3452_v62  ;;  %v9443_v62 = vld [vmem:[#allocation12_spill] sm:$0xff] }
 0x1b0   : > { %2902 = vst [vmem:[#allocation2 + $0x31] sm:$0xff] %v7558_v47  ;;  %5224 = vmatmul.msk.f32.gmra.mxu3 %vm2689_vm5, %v2674_v50  ;;  %v3745_v50 = vmul.f32 %v7581_v46, %v3227_v29  ;;  %v4068_v1 = vmul.f32 %v7612_v59, %v7558_v47 }
 0x1b1   : > { %v2633_v4 = vmul.f32 %v5457_v14, %v2632_v32  ;;  %v2623_v60 = vsel %vm2622_vm2, %v5455_v44, %v2619_v31  ;;  %v9442_v44 = vld [vmem:[#allocation23_spill] sm:$0xff] }
 0x1b2   : > { %v2628_v52 = vsel %vm2625_vm3, %v2627_v27, %v2623_v60  ;;  %v3453_v36 = vadd.f32 %v3421_v39, %v9442_v44 }
 0x1b3   : > { %v2634_v25 = vadd.f32 %v5457_v14, %v2633_v4  ;;  %v2675_v37 = vmul.f32 %v2628_v52, %v7409_v17  ;;  %v3744_v17 = vmul.f32 %v7581_v46, %v3226_v34 }
 0x1b5   : > { %v2812_v3 = vpop.f32.mrf.mxu1  ;;  %v2638_v56 = vsel %vm2637_vm7, %v5457_v14, %v2634_v25  ;;  %v3776_v54 = vadd.f32 %v3744_v17, %v3614_v6  ;;  %v3615_v14 = vadd.f32 %v3583_v22, %v3453_v36 }
 0x1b6   : > { %v7594_v11 = vadd.f32 %v7464_v5, %v2812_v3  ;;  %5211 = vmatmul.msk.f32.gmra.mxu1 %vm2689_vm5, %v2661_v10  ;;  %v2643_v57 = vsel %vm2640_vm8, %v2642_v21, %v2638_v56  ;;  %v2969_v3 = vmul.f32 %v7647_v45, %v2935_v43  ;;  %v7658_v56 = vld [vmem:[%s9304_s6 + $0x1] ss:$0 sm:$0xff] }
 0x1b7   : > { %v7598_v55 = vld [vmem:[#allocation2 + $0x30] sm:$0xff]  ;;  %v2676_v38 = vmul.f32 %v2643_v57, %v7449_v58  ;;  %v3777_v7 = vadd.f32 %v3745_v50, %v3615_v14  ;;  %v7631_v58 = vld [vmem:[%s9305_s7] ss:$0 sm:$0xff]  ;;  %v3098_v24 = vmul.f32 %v7658_v56, %v7481_v18  ;;  %v3099_v17 = vmul.f32 %v7658_v56, %v7497_v19 }
 0x1b8   : > { %2903 = vst [vmem:[#allocation2 + $0x39] sm:$0xff] %v7594_v11  ;;  %5225 = vmatmul.msk.f32.gmra.mxu3 %vm2689_vm5, %v2675_v37  ;;  %v3906_v51 = vmul.f32 %v7588_v26, %v7598_v55  ;;  %v4069_v27 = vmul.f32 %v7612_v59, %v7594_v11  ;;  %v2968_v37 = vmul.f32 %v7647_v45, %v7562_v12  ;;  %v7667_v12 = vld [vmem:[%s9304_s6 + $0x2] ss:$0 sm:$0xff] }
 0x1b9   : > { %v3260_v43 = vmul.f32 %v7667_v12, %v3226_v34  ;;  %v3131_v57 = vadd.f32 %v3099_v17, %v2969_v3  ;;  %v3422_v22 = vmul.f32 %v7555_v48, %v7598_v55  ;;  %v3261_v34 = vmul.f32 %v7667_v12, %v3227_v29 }
 0x1ba   : > { %v3938_v53 = vadd.f32 %v3906_v51, %v3776_v54  ;;  %v3130_v19 = vadd.f32 %v3098_v24, %v2968_v37  ;;  %v9444_v54 = vld [vmem:[#allocation13_spill] sm:$0xff] }
 0x1bc   : > { %v4100_v16 = vadd.f32 %v4068_v1, %v3938_v53  ;;  %v3292_v50 = vadd.f32 %v3260_v43, %v3130_v19 }
 0x1bf   : > { %v2937_v40 = vld [vmem:[#allocation2 + $0x38] sm:$0xff]  ;;  %v2815_v13 = vpop.f32.mrf.mxu1 }
 0x1c0   : > { %v3228_v35 = vld [vmem:[#allocation2 + $0x32] sm:$0xff]  ;;  %5226 = vmatmul.msk.f32.gmra.mxu3 %vm2689_vm5, %v2676_v38  ;;  %v3907_v32 = vmul.f32 %v7588_v26, %v2937_v40  ;;  %v7633_v28 = vld [vmem:[#allocation2 + $0x3a] sm:$0xff]  ;;  %v7638_v60 = vadd.f32 %v7464_v5, %v2815_v13  ;;  %v3423_v53 = vmul.f32 %v7555_v48, %v2937_v40  ;;  %v3293_v13 = vadd.f32 %v3261_v34, %v3131_v57 }
 0x1c1   : > { %v4230_v31 = vmul.f32 %v7619_v0, %v3228_v35  ;;  %v4231_v25 = vmul.f32 %v7619_v0, %v7633_v28 }
 0x1c2   : > { %v3939_v10 = vadd.f32 %v3907_v32, %v3777_v7  ;;  %2904 = vst [vmem:[#allocation2 + $0x49] sm:$0xff] %v7638_v60  ;;  %v2971_v7 = vmul.f32 %v7647_v45, %v2937_v40  ;;  %v3454_v32 = vadd.f32 %v3422_v22, %v3292_v50  ;;  %v3455_v29 = vadd.f32 %v3423_v53, %v3293_v13 }
 0x1c3   : > { %v4262_v4 = vadd.f32 %v4230_v31, %v4100_v16  ;;  %v2970_v16 = vmul.f32 %v7647_v45, %v7598_v55  ;;  %v3585_v55 = vmul.f32 %v7576_v2, %v7594_v11  ;;  %v3586_v34 = vmul.f32 %v7576_v2, %v7638_v60 }
 0x1c4   : > { %v4101_v52 = vadd.f32 %v4069_v27, %v3939_v10  ;;  %v3101_v10 = vmul.f32 %v7658_v56, %v7594_v11 }
 0x1c5   : > { %v4361_v30 = vadd.f32 %v7631_v58, %v4262_v4  ;;  %v3100_v4 = vmul.f32 %v7658_v56, %v7558_v47 }
 0x1c6   : > { %v4263_v49 = vadd.f32 %v4231_v25, %v4101_v52  ;;  %v3584_v52 = vmul.f32 %v7576_v2, %v7558_v47  ;;  %v3262_v25 = vmul.f32 %v7667_v12, %v3228_v35  ;;  %v3133_v40 = vadd.f32 %v3101_v10, %v2971_v7 }
 0x1c7   : > { %v7653_v39 = vadd.f32 %v4361_v30, %v9443_v62  ;;  %v3746_v30 = vmul.f32 %v7581_v46, %v3228_v35  ;;  %v3132_v37 = vadd.f32 %v3100_v4, %v2970_v16  ;;  %v3263_v62 = vmul.f32 %v7667_v12, %v7633_v28 }
 0x1c8   : > { %v4362_v6 = vadd.f32 %v7631_v58, %v4263_v49  ;;  %v3616_v49 = vadd.f32 %v3584_v52, %v3454_v32  ;;  %v3747_v35 = vmul.f32 %v7581_v46, %v7633_v28 }
 0x1c9   : > { %v4425_v44 = vsub.f32 0.0, %v7653_v39  ;;  %v2818_v51 = vpop.f32.mrf.mxu1  ;;  %v2938_v27 = vld [vmem:[#allocation2 + $0x48] sm:$0xff]  ;;  %v3294_v11 = vadd.f32 %v3262_v25, %v3132_v37 }
 0x1ca   : > { %v2854_v21 = vpop.f32.mrf.mxu3  ;;  %v7674_v18 = vadd.f32 %v7464_v5, %v2818_v51  ;;  %v7679_v38 = vadd.f32 %v4362_v6, %v9444_v54  ;;  %v3424_v24 = vmul.f32 %v7555_v48, %v2938_v27  ;;  %v3908_v43 = vmul.f32 %v7588_v26, %v2938_v27 }
 0x1cb   : > { %v2855_v36 = vadd.f32 %v7464_v5, %v2854_v21  ;;  %v4457_v14 = vmul.f32 1.442695, %v4425_v44  ;;  %v3617_v21 = vadd.f32 %v3585_v55, %v3455_v29  ;;  %v7707_v44 = vadd.f32 %v3263_v62, %v3133_v40 }
 0x1cc   : > { %2905 = vst [vmem:[#allocation2 + $0x51] sm:$0xff] %v7674_v18  ;;  %v4426_v1 = vsub.f32 0.0, %v7679_v38  ;;  %v3778_v51 = vadd.f32 %v3746_v30, %v3616_v49  ;;  %v2972_v22 = vmul.f32 %v7647_v45, %v2938_v27  ;;  %v3102_v54 = vmul.f32 %v7658_v56, %v7638_v60 }
 0x1cd   : > { %2917 = vst [vmem:[#allocation2 + $0xe1] sm:$0xff] %v2855_v36  ;;  %5458 = vpow2.f32 %v4457_v14  ;;  %v3456_v14 = vadd.f32 %v3424_v24, %v3294_v11  ;;  %v3779_v53 = vadd.f32 %v3747_v35, %v3617_v21  ;;  %v7723_v7 = vmul.f32 %v7658_v56, %v2855_v36 }
 0x1ce   : > { %v4459_v31 = vmul.f32 1.442695, %v4426_v1  ;;  %v3940_v28 = vadd.f32 %v3908_v43, %v3778_v51  ;;  %v4070_v1 = vmul.f32 %v7612_v59, %v7638_v60  ;;  %v7726_v32 = vmul.f32 %v7576_v2, %v2855_v36 }
 0x1cf   : > { %9445 = vst [vmem:[#allocation16_spill] sm:$0xff] %v7723_v7  ;;  %v3103_v27 = vmul.f32 %v7658_v56, %v7674_v18  ;;  %v7737_v4 = vmul.f32 %v7576_v2, %v7674_v18  ;;  %v4071_v52 = vmul.f32 %v7612_v59, %v7674_v18  ;;  %v7741_v25 = vadd.f32 %v3102_v54, %v2972_v22 }
 0x1d0   : > { %5460 = vpow2.f32 %v4459_v31  ;;  %9446 = vst [vmem:[#allocation23_spill] sm:$0xff] %v7726_v32  ;;  %v7729_v31 = vmul.f32 %v7612_v59, %v2855_v36  ;;  %v7743_v36 = vadd.f32 %v3586_v34, %v3456_v14  ;;  %v4102_v49 = vadd.f32 %v4070_v1, %v3940_v28 }
 0x1d2   : > { %9447 = vst [vmem:[#allocation12_spill] sm:$0xff] %v7729_v31  ;;  %v2821_v29 = vpop.f32.mrf.mxu1 }
 0x1d3   : > { %v5459_v3 = vpop.eup %5458  ;;  %v2939_v57 = vld [vmem:[#allocation2 + $0x50] sm:$0xff]  ;;  %v7753_v24 = vadd.f32 %v7464_v5, %v2821_v29 }
 0x1d4   : > { %v2857_v17 = vpop.f32.mrf.mxu3  ;;  %v7701_v47 = vadd.f32 1.0, %v5459_v3  ;;  %v3230_v13 = vld [vmem:[#allocation2 + $0x4a] sm:$0xff]  ;;  %v3243_v16 = vld [vmem:[#allocation2 + $0xe2] sm:$0xff]  ;;  %v3909_v10 = vmul.f32 %v7588_v26, %v2939_v57  ;;  %v3231_v60 = vld [vmem:[#allocation2 + $0x52] sm:$0xff]  ;;  %v2973_v54 = vmul.f32 %v7647_v45, %v2939_v57  ;;  %v3425_v14 = vmul.f32 %v7555_v48, %v2939_v57 }
 0x1d5   : > { %v7705_v6 = vadd.f32 %v7464_v5, %v2857_v17  ;;  %v4232_v55 = vmul.f32 %v7619_v0, %v3230_v13  ;;  %v7747_v37 = vmul.f32 %v7667_v12, %v3243_v16  ;;  %v7757_v17 = vmul.f32 %v7581_v46, %v3243_v16  ;;  %2906 = vst [vmem:[#allocation2 + $0x61] sm:$0xff] %v7753_v24 }
 0x1d6   : > { %5462 = vrcp.f32 %v7701_v47  ;;  %v5461_v19 = vpop.eup %5460  ;;  %v3941_v40 = vadd.f32 %v3909_v10, %v3779_v53  ;;  %v4233_v43 = vmul.f32 %v7619_v0, %v3231_v60  ;;  %v4562_v11 = vand.u32 2147483647, %v7701_v47 }
 0x1d7   : > { %2918 = vst [vmem:[#allocation2 + $0xf1] sm:$0xff] %v7705_v6  ;;  %v7718_v50 = vadd.f32 1.0, %v5461_v19  ;;  %v4564_v35 = vand.u32 2147483648, %v7701_v47  ;;  %v7763_v51 = vmul.f32 %v7619_v0, %v3243_v16  ;;  %v4264_v19 = vadd.f32 %v4232_v55, %v4102_v49 }
 0x1d8   : > { %9448 = vst [vmem:[#allocation13_spill] sm:$0xff] %v7747_v37  ;;  %v4103_v21 = vadd.f32 %v4071_v52, %v3941_v40  ;;  %v3264_v28 = vmul.f32 %v7667_v12, %v3230_v13  ;;  %v3265_v1 = vmul.f32 %v7667_v12, %v3231_v60  ;;  %v3748_v10 = vmul.f32 %v7581_v46, %v3230_v13 }
 0x1d9   : > { %5464 = vrcp.f32 %v7718_v50  ;;  %9449 = vst [vmem:[#allocation42_spill] sm:$0xff] %v7757_v17  ;;  %v4363_v16 = vadd.f32 %v7631_v58, %v4264_v19  ;;  %vm4558_vm10 = vweird.f32 %v7701_v47  ;;  %vm7776_vm9 = vcmp.eq.f32.partialorder %v4562_v11, 8.507059e+37 }
 0x1da   : > { %9450 = vst [vmem:[#allocation43_spill] sm:$0xff] %v7763_v51  ;;  %v4265_v34 = vadd.f32 %v4233_v43, %v4103_v21  ;;  %v4565_v55 = vor.u32 1.1754944e-38, %v4564_v35  ;;  %v3457_v21 = vadd.f32 %v3425_v14, %v7707_v44  ;;  %v9454_v43 = vld [vmem:[#allocation15_spill] sm:$0xff]  ;;  %v3135_v14 = vadd.f32 %v3103_v27, %v2973_v54 }
 0x1db   : > { %vm4573_vm13 = vweird.f32 %v7718_v50  ;;  %v3116_v27 = vmul.f32 %v7658_v56, %v7705_v6 }
 0x1dc   : > { %v2860_v30 = vpop.f32.mrf.mxu3  ;;  %v5463_v3 = vpop.eup %5462  ;;  %v4364_v40 = vadd.f32 %v7631_v58, %v4265_v34  ;;  %v4577_v34 = vand.u32 2147483647, %v7718_v50 }
 0x1dd   : > { %v7750_v62 = vadd.f32 %v7464_v5, %v2860_v30  ;;  %v4554_v18 = vmul.f32 %v5463_v3, %v7701_v47  ;;  %vm4559_vm5 = vweird.f32 %v5463_v3  ;;  %v9453_v30 = vld [vmem:[#allocation14_spill] sm:$0xff]  ;;  %v4579_v47 = vand.u32 2147483648, %v7718_v50 }
 0x1de   : > { %v7781_v49 = vadd.f32 %v4363_v16, %v9453_v30  ;;  %v7785_v19 = vadd.f32 %v4364_v40, %v9454_v43  ;;  %vm4560_vm11 = vmor %vm4558_vm10, %vm4559_vm5  ;;  %vm4578_vm15 = vcmp.eq.f32.partialorder %v4577_v34, 8.507059e+37  ;;  %v3296_v34 = vadd.f32 %v3264_v28, %v7741_v25 }
 0x1df   : > { %2919 = vst [vmem:[#allocation2 + $0xf9] sm:$0xff] %v7750_v62  ;;  %v4555_v22 = vsub.f32 1.0, %v4554_v18  ;;  %v5465_v53 = vpop.eup %5464  ;;  %v4580_v33 = vor.u32 1.1754944e-38, %v4579_v47  ;;  %v7820_v47 = vadd.f32 %v3265_v1, %v3135_v14 }
 0x1e0   : > { %v4569_v52 = vmul.f32 %v5465_v53, %v7718_v50  ;;  %v4427_v11 = vsub.f32 0.0, %v7781_v49  ;;  %vm4574_vm12 = vweird.f32 %v5465_v53 }
 0x1e1   : > { %v4556_v29 = vmul.f32 %v5463_v3, %v4555_v22  ;;  %vm4575_vm14 = vmor %vm4573_vm13, %vm4574_vm12 }
 0x1e2   : > { %v4570_v13 = vsub.f32 1.0, %v4569_v52  ;;  %v3749_v52 = vmul.f32 %v7581_v46, %v3231_v60  ;;  %v4461_v40 = vmul.f32 1.442695, %v4427_v11  ;;  %v3619_v60 = vadd.f32 %v7737_v4, %v3457_v21 }
 0x1e3   : > { %v4557_v18 = vadd.f32 %v5463_v3, %v4556_v29  ;;  %v4428_v29 = vsub.f32 0.0, %v7785_v19  ;;  %v7815_v4 = vmul.f32 %v7612_v59, %v7705_v6  ;;  %v3780_v11 = vadd.f32 %v3748_v10, %v7743_v36 }
 0x1e4   : > { %v2863_v22 = vpop.f32.mrf.mxu3  ;;  %v4571_v30 = vmul.f32 %v5465_v53, %v4570_v13  ;;  %5466 = vpow2.f32 %v4461_v40  ;;  %v7837_v36 = vmul.f32 %v7576_v2, %v7750_v62  ;;  %v7847_v40 = vmul.f32 %v7612_v59, %v7750_v62 }
 0x1e5   : > { %v7791_v35 = vadd.f32 %v7464_v5, %v2863_v22  ;;  %v4561_v16 = vsel %vm4560_vm11, %v5463_v3, %v4557_v18  ;;  %v2952_v3 = vld [vmem:[#allocation2 + $0xf0] sm:$0xff]  ;;  %v4463_v18 = vmul.f32 1.442695, %v4428_v29  ;;  %9456 = vst [vmem:[#allocation15_spill] sm:$0xff] %v7815_v4 }
 0x1e6   : > { %v4566_v44 = vsel %vm7776_vm9, %v4565_v55, %v4561_v16  ;;  %v4572_v43 = vadd.f32 %v5465_v53, %v4571_v30  ;;  %v2953_v13 = vld [vmem:[#allocation2 + $0xf8] sm:$0xff]  ;;  %v2986_v55 = vmul.f32 %v7647_v45, %v2952_v3  ;;  %v7824_v30 = vmul.f32 %v7555_v48, %v2952_v3  ;;  %9459 = vst [vmem:[#allocation46_spill] sm:$0xff] %v7837_v36 }
 0x1e7   : > { %2920 = vst [vmem:[#allocation2 + $0x109] sm:$0xff] %v7791_v35  ;;  %v5033_v22 = vmul.f32 %v4566_v44, %v7653_v39  ;;  %v2824_v61 = vpop.f32.mrf.mxu1  ;;  %v7810_v39 = vmul.f32 %v7576_v2, %v7705_v6  ;;  %5468 = vpow2.f32 %v4463_v18  ;;  %v3244_v50 = vld [vmem:[#allocation2 + $0xf2] sm:$0xff]  ;;  %v3117_v6 = vmul.f32 %v7658_v56, %v7750_v62  ;;  %v2940_v44 = vld [vmem:[#allocation2 + $0x60] sm:$0xff] }
 0x1e8   : > { %v4576_v54 = vsel %vm4575_vm14, %v5465_v53, %v4572_v43  ;;  %v2987_v53 = vmul.f32 %v7647_v45, %v2953_v13  ;;  %9457 = vst [vmem:[#allocation44_spill] sm:$0xff] %v7824_v30  ;;  %v3278_v29 = vmul.f32 %v7667_v12, %v3244_v50  ;;  %v3245_v25 = vld [vmem:[#allocation2 + $0xfa] sm:$0xff]  ;;  %v7840_v28 = vadd.f32 %v7464_v5, %v2824_v61 }
 0x1e9   : > { %5065 = vst [vmem:[%s7805_s21] sm:$0xff] %v5033_v22  ;;  %v4581_v57 = vsel %vm4578_vm15, %v4580_v33, %v4576_v54  ;;  %v7826_v33 = vadd.f32 %v3749_v52, %v3619_v60  ;;  %v3148_v14 = vadd.f32 %v3116_v27, %v2986_v55  ;;  %v3104_v43 = vmul.f32 %v7658_v56, %v7753_v24 }
 0x1ea   : > { %9455 = vst [vmem:[#allocation14_spill] sm:$0xff] %v7810_v39  ;;  %v5034_v21 = vmul.f32 %v4581_v57, %v7679_v38  ;;  %v7833_v38 = vmul.f32 %v7588_v26, %v2952_v3  ;;  %v5467_v10 = vpop.eup %5466  ;;  %v3149_v52 = vadd.f32 %v3117_v6, %v2987_v53  ;;  %v3426_v18 = vmul.f32 %v7555_v48, %v2940_v44 }
 0x1eb   : > { %9460 = vst [vmem:[#allocation47_spill] sm:$0xff] %v7847_v40  ;;  %v7851_v3 = vadd.f32 1.0, %v5467_v10  ;;  %v3588_v61 = vmul.f32 %v7576_v2, %v7753_v24  ;;  %v3910_v60 = vmul.f32 %v7588_v26, %v2940_v44  ;;  %v3279_v62 = vmul.f32 %v7667_v12, %v3245_v25 }
 0x1ec   : > { %v2866_v16 = vpop.f32.mrf.mxu3  ;;  %5066 = vst [vmem:[%s7805_s21 + $0x8] sm:$0xff] %v5034_v21  ;;  %v3310_v55 = vadd.f32 %v3278_v29, %v3148_v14  ;;  %v4072_v53 = vmul.f32 %v7612_v59, %v7753_v24  ;;  %v7866_v21 = vmul.f32 %v7555_v48, %v2953_v13  ;;  %v7872_v6 = vmul.f32 %v7581_v46, %v3245_v25 }
 0x1ed   : > { %9458 = vst [vmem:[#allocation45_spill] sm:$0xff] %v7833_v38  ;;  %v7843_v1 = vadd.f32 %v7464_v5, %v2866_v16  ;;  %v5469_v22 = vpop.eup %5468  ;;  %5470 = vrcp.f32 %v7851_v3  ;;  %v7869_v16 = vmul.f32 %v7581_v46, %v3244_v50  ;;  %v7875_v10 = vadd.f32 %v3279_v62, %v3149_v52 }
 0x1ee   : > { %v2954_v54 = vld [vmem:[#allocation2 + $0x108] sm:$0xff]  ;;  %2907 = vst [vmem:[#allocation2 + $0x69] sm:$0xff] %v7840_v28  ;;  %v7858_v57 = vadd.f32 1.0, %v5469_v22  ;;  %v2974_v29 = vmul.f32 %v7647_v45, %v2940_v44  ;;  %v7880_v14 = vmul.f32 %v7588_v26, %v2953_v13  ;;  %v7883_v22 = vmul.f32 %v7619_v0, %v3244_v50 }
 0x1ef   : > { %v2827_v27 = vpop.f32.mrf.mxu1  ;;  %2921 = vst [vmem:[#allocation2 + $0x111] sm:$0xff] %v7843_v1  ;;  %v3440_v24 = vmul.f32 %v7555_v48, %v2954_v54  ;;  %v3458_v9 = vadd.f32 %v3426_v18, %v3296_v34  ;;  %v3942_v41 = vadd.f32 %v3910_v60, %v3780_v11  ;;  %v7886_v40 = vmul.f32 %v7619_v0, %v3245_v25 }
 0x1f0   : > { %9461 = vst [vmem:[#allocation48_spill] sm:$0xff] %v7866_v21  ;;  %5472 = vrcp.f32 %v7858_v57  ;;  %v2988_v4 = vmul.f32 %v7647_v45, %v2954_v54  ;;  %v3118_v52 = vmul.f32 %v7658_v56, %v7791_v35  ;;  %v3602_v44 = vmul.f32 %v7576_v2, %v7791_v35 }
 0x1f1   : > { %9462 = vst [vmem:[#allocation49_spill] sm:$0xff] %v7869_v16  ;;  %v4592_v13 = vand.u32 2147483647, %v7851_v3  ;;  %v7896_v50 = vmul.f32 %v7612_v59, %v7791_v35  ;;  %v7899_v34 = vadd.f32 %v7464_v5, %v2827_v27  ;;  %v4594_v25 = vand.u32 2147483648, %v7851_v3 }
 0x1f2   : > { %9463 = vst [vmem:[#allocation50_spill] sm:$0xff] %v7872_v6  ;;  %v7905_v18 = vadd.f32 %v3104_v43, %v2974_v29  ;;  %v3472_v60 = vadd.f32 %v3440_v24, %v3310_v55  ;;  %v7908_v62 = vmul.f32 %v7588_v26, %v2954_v54  ;;  %v4104_v31 = vadd.f32 %v4072_v53, %v3942_v41 }
 0x1f3   : > { %9464 = vst [vmem:[#allocation51_spill] sm:$0xff] %v7880_v14  ;;  %v3105_v27 = vmul.f32 %v7658_v56, %v7840_v28  ;;  %vm4588_vm0 = vweird.f32 %v7851_v3  ;;  %vm7925_vm1 = vcmp.eq.f32.partialorder %v4592_v13, 8.507059e+37  ;;  %vm4603_vm2 = vweird.f32 %v7858_v57 }
 0x1f4   : > { %9465 = vst [vmem:[#allocation52_spill] sm:$0xff] %v7883_v22  ;;  %v2869_v51 = vpop.f32.mrf.mxu3  ;;  %v7910_v22 = vadd.f32 %v3588_v61, %v3458_v9  ;;  %v4607_v9 = vand.u32 2147483647, %v7858_v57  ;;  %v7922_v61 = vadd.f32 %v3118_v52, %v2988_v4  ;;  %v4609_v29 = vand.u32 2147483648, %v7858_v57 }
 0x1f5   : > { %9466 = vst [vmem:[#allocation53_spill] sm:$0xff] %v7886_v40  ;;  %v7902_v11 = vadd.f32 %v7464_v5, %v2869_v51  ;;  %v5471_v40 = vpop.eup %5470  ;;  %v2941_v35 = vld [vmem:[#allocation2 + $0x68] sm:$0xff]  ;;  %v3589_v51 = vmul.f32 %v7576_v2, %v7840_v28  ;;  %v7932_v14 = vadd.f32 %v3602_v44, %v3472_v60  ;;  %v4073_v13 = vmul.f32 %v7612_v59, %v7840_v28 }
 0x1f6   : > { %9467 = vst [vmem:[#allocation54_spill] sm:$0xff] %v7896_v50  ;;  %v5473_v43 = vpop.eup %5472  ;;  %v4584_v55 = vmul.f32 %v5471_v40, %v7851_v3  ;;  %v3232_v41 = vld [vmem:[#allocation2 + $0x62] sm:$0xff]  ;;  %v3911_v4 = vmul.f32 %v7588_v26, %v2941_v35  ;;  %v3233_v38 = vld [vmem:[#allocation2 + $0x6a] sm:$0xff]  ;;  %v3427_v6 = vmul.f32 %v7555_v48, %v2941_v35  ;;  %vm4589_vm3 = vweird.f32 %v5471_v40 }
 0x1f7   : > { %9468 = vst [vmem:[#allocation55_spill] sm:$0xff] %v7908_v62  ;;  %v7917_v50 = vpop.f32.mrf.mxu1  ;;  %v4599_v53 = vmul.f32 %v5473_v43, %v7858_v57  ;;  %v4595_v62 = vor.u32 1.1754944e-38, %v4594_v25  ;;  %v4234_v16 = vmul.f32 %v7619_v0, %v3232_v41  ;;  %vm7939_vm4 = vcmp.eq.f32.partialorder %v4607_v9, 8.507059e+37  ;;  %v7946_v21 = vld [vmem:[#allocation2 + $0x110] sm:$0xff]  ;;  %vm4590_vm7 = vmor %vm4588_vm0, %vm4589_vm3 }
 0x1f8   : > { %2908 = vst [vmem:[#allocation2 + $0x79] sm:$0xff] %v7899_v34  ;;  %v4585_v24 = vsub.f32 1.0, %v4584_v55  ;;  %v3943_v44 = vadd.f32 %v3911_v4, %v7826_v33  ;;  %vm4604_vm6 = vweird.f32 %v5473_v43  ;;  %v4610_v60 = vor.u32 1.1754944e-38, %v4609_v29 }
 0x1f9   : > { %2922 = vst [vmem:[#allocation2 + $0x121] sm:$0xff] %v7902_v11  ;;  %v4600_v52 = vsub.f32 1.0, %v4599_v53  ;;  %v4266_v55 = vadd.f32 %v4234_v16, %v4104_v31  ;;  %v2975_v36 = vmul.f32 %v7647_v45, %v2941_v35  ;;  %v4235_v28 = vmul.f32 %v7619_v0, %v3233_v38  ;;  %vm4605_vm8 = vmor %vm4603_vm2, %vm4604_vm6 }
 0x1fa   : > { %v4586_v17 = vmul.f32 %v5471_v40, %v4585_v24  ;;  %v4105_v39 = vadd.f32 %v4073_v13, %v3943_v44  ;;  %v3459_v33 = vadd.f32 %v3427_v6, %v7820_v47  ;;  %v3119_v31 = vmul.f32 %v7658_v56, %v7843_v1 }
 0x1fb   : > { %v4601_v25 = vmul.f32 %v5473_v43, %v4600_v52  ;;  %v4365_v4 = vadd.f32 %v7631_v58, %v4266_v55  ;;  %v3266_v16 = vmul.f32 %v7667_v12, %v3232_v41  ;;  %v3750_v35 = vmul.f32 %v7581_v46, %v3232_v41  ;;  %v9473_v52 = vld [vmem:[#allocation27_spill] sm:$0xff] }
 0x1fc   : > { %v4587_v53 = vadd.f32 %v5471_v40, %v4586_v17  ;;  %v4267_v3 = vadd.f32 %v4235_v28, %v4105_v39  ;;  %v3137_v41 = vadd.f32 %v3105_v27, %v2975_v36  ;;  %v3603_v55 = vmul.f32 %v7576_v2, %v7843_v1 }
 0x1fd   : > { %v4602_v9 = vadd.f32 %v5473_v43, %v4601_v25  ;;  %v7964_v13 = vadd.f32 %v4365_v4, %v9473_v52  ;;  %v3246_v25 = vld [vmem:[#allocation2 + $0x10a] sm:$0xff]  ;;  %v7985_v36 = vmul.f32 %v7612_v59, %v7843_v1  ;;  %v3751_v27 = vmul.f32 %v7581_v46, %v3233_v38 }
 0x1fe   : > { %v7948_v24 = vpop.f32.mrf.mxu3  ;;  %v4591_v17 = vsel %vm4590_vm7, %v5471_v40, %v4587_v53  ;;  %v2989_v40 = vmul.f32 %v7647_v45, %v7946_v21  ;;  %v4366_v39 = vadd.f32 %v7631_v58, %v4267_v3  ;;  %v3267_v53 = vmul.f32 %v7667_v12, %v3233_v38 }
 0x1ff   : > { %v2833_v29 = vpop.f32.mrf.mxu1  ;;  %v4596_v47 = vsel %vm7925_vm1, %v4595_v62, %v4591_v17  ;;  %v4606_v6 = vsel %vm4605_vm8, %v5473_v43, %v4602_v9  ;;  %v3621_v62 = vadd.f32 %v3589_v51, %v3459_v33  ;;  %v4429_v43 = vsub.f32 0.0, %v7964_v13  ;;  %9474 = vst [vmem:[#allocation27_spill] sm:$0xff] %v7985_v36  ;;  %v2942_v3 = vld [vmem:[#allocation2 + $0x78] sm:$0xff] }
 0x200   : > { %v4611_v57 = vsel %vm7939_vm4, %v4610_v60, %v4606_v6  ;;  %v5035_v44 = vmul.f32 %v4596_v47, %v7781_v49  ;;  %v7979_v32 = vadd.f32 %v4366_v39, %v6171_v8  ;;  %v3247_v60 = vld [vmem:[#allocation2 + $0x112] sm:$0xff]  ;;  %v3441_v49 = vmul.f32 %v7555_v48, %v7946_v21 }
 0x201   : > { %v5036_v54 = vmul.f32 %v4611_v57, %v7785_v19  ;;  %v2956_v19 = vld [vmem:[#allocation2 + $0x120] sm:$0xff]  ;;  %v4465_v51 = vmul.f32 1.442695, %v4429_v43  ;;  %v3151_v28 = vadd.f32 %v3119_v31, %v2989_v40  ;;  %v3280_v9 = vmul.f32 %v7667_v12, %v3246_v25 }
 0x202   : > { %5067 = vst [vmem:[%s7805_s21 + $0x10] sm:$0xff] %v5035_v44  ;;  %v3298_v33 = vadd.f32 %v3266_v16, %v7905_v18  ;;  %v7991_v8 = vadd.f32 %v3267_v53, %v3137_v41  ;;  %v3782_v4 = vadd.f32 %v3750_v35, %v7910_v22  ;;  %v4430_v17 = vsub.f32 0.0, %v7979_v32 }
 0x203   : > { %5068 = vst [vmem:[%s7805_s21 + $0x18] sm:$0xff] %v5036_v54  ;;  %v7995_v47 = vadd.f32 %v3751_v27, %v3621_v62  ;;  %5474 = vpow2.f32 %v4465_v51  ;;  %v3281_v1 = vmul.f32 %v7667_v12, %v3247_v60  ;;  %v2990_v38 = vmul.f32 %v7647_v45, %v2956_v19 }
 0x204   : > { %v4467_v31 = vmul.f32 1.442695, %v4430_v17  ;;  %v3473_v52 = vadd.f32 %v3441_v49, %v7875_v10  ;;  %v3764_v18 = vmul.f32 %v7581_v46, %v3246_v25  ;;  %v3120_v16 = vmul.f32 %v7658_v56, %v7902_v11 }
 0x205   : > { %v3312_v22 = vadd.f32 %v3280_v9, %v7922_v61  ;;  %v8004_v35 = vadd.f32 %v3281_v1, %v3151_v28  ;;  %v3428_v40 = vmul.f32 %v7555_v48, %v2942_v3  ;;  %v3442_v57 = vmul.f32 %v7555_v48, %v2956_v19 }
 0x206   : > { %v2875_v6 = vpop.f32.mrf.mxu3  ;;  %5476 = vpow2.f32 %v4467_v31  ;;  %v3912_v44 = vmul.f32 %v7588_v26, %v2942_v3  ;;  %v8009_v41 = vadd.f32 %v3120_v16, %v2990_v38  ;;  %v3926_v10 = vmul.f32 %v7588_v26, %v2956_v19 }
 0x207   : > { %v2836_v39 = vpop.f32.mrf.mxu1  ;;  %v3474_v54 = vadd.f32 %v3442_v57, %v3312_v22  ;;  %v3604_v62 = vmul.f32 %v7576_v2, %v7902_v11  ;;  %v2831_v61 = vadd.f32 %v7464_v5, %v7917_v50  ;;  %v2873_v43 = vadd.f32 %v7464_v5, %v7948_v24 }
 0x208   : > { %v3635_v53 = vadd.f32 %v3603_v55, %v3473_v52  ;;  %v3796_v49 = vadd.f32 %v3764_v18, %v7932_v14  ;;  %v2834_v27 = vadd.f32 %v7464_v5, %v2833_v29  ;;  %v2876_v51 = vadd.f32 %v7464_v5, %v2875_v6 }
 0x209   : > { %v5475_v28 = vpop.eup %5474  ;;  %v2976_v19 = vmul.f32 %v7647_v45, %v2942_v3  ;;  %v3460_v9 = vadd.f32 %v3428_v40, %v3298_v33  ;;  %v8022_v17 = vadd.f32 %v3604_v62, %v3474_v54  ;;  %2909 = vst [vmem:[#allocation2 + $0x81] sm:$0xff] %v2831_v61  ;;  %v8025_v1 = vadd.f32 %v7464_v5, %v2836_v39  ;;  %v8080_v62 = vld [vmem:[%s9303_s5] ss:$0 sm:$0xff] }
 0x20a   : > { %v8027_v50 = vadd.f32 1.0, %v5475_v28  ;;  %v3765_v24 = vmul.f32 %v7581_v46, %v3247_v60  ;;  %v3944_v55 = vadd.f32 %v3912_v44, %v3782_v4  ;;  %v3958_v14 = vadd.f32 %v3926_v10, %v3796_v49  ;;  %2923 = vst [vmem:[#allocation2 + $0x129] sm:$0xff] %v2873_v43 }
 0x20b   : > { %v8032_v29 = vmul.f32 %v7588_v26, %v7946_v21  ;;  %v8035_v3 = vmul.f32 %v7619_v0, %v3246_v25  ;;  %v3106_v33 = vmul.f32 %v7658_v56, %v7899_v34  ;;  %v3590_v5 = vmul.f32 %v7576_v2, %v7899_v34  ;;  %2910 = vst [vmem:[#allocation2 + $0x91] sm:$0xff] %v2834_v27 }
 0x20c   : > { %v5477_v38 = vpop.eup %5476  ;;  %5478 = vrcp.f32 %v8027_v50  ;;  %v8043_v4 = vmul.f32 %v7619_v0, %v3247_v60  ;;  %v4074_v21 = vmul.f32 %v7612_v59, %v7899_v34  ;;  %v4088_v25 = vmul.f32 %v7612_v59, %v7902_v11  ;;  %2924 = vst [vmem:[#allocation2 + $0x139] sm:$0xff] %v2876_v51 }
 0x20d   : > { %9475 = vst [vmem:[#allocation56_spill] sm:$0xff] %v8032_v29  ;;  %v8049_v6 = vadd.f32 1.0, %v5477_v38  ;;  %v8051_v31 = vadd.f32 %v3765_v24, %v3635_v53  ;;  %v8053_v52 = vadd.f32 %v3106_v33, %v2976_v19  ;;  %v8055_v18 = vadd.f32 %v3590_v5, %v3460_v9 }
 0x20e   : > { %9476 = vst [vmem:[#allocation57_spill] sm:$0xff] %v8035_v3  ;;  %v2878_v16 = vpop.f32.mrf.mxu3  ;;  %v4106_v60 = vadd.f32 %v4074_v21, %v3944_v55  ;;  %v8058_v22 = vadd.f32 %v4088_v25, %v3958_v14  ;;  %v8061_v34 = vmul.f32 %v7658_v56, %v2831_v61  ;;  %v8064_v11 = vmul.f32 %v7576_v2, %v2831_v61 }
 0x20f   : > { %9477 = vst [vmem:[#allocation58_spill] sm:$0xff] %v8043_v4  ;;  %v4622_v40 = vand.u32 2147483647, %v8027_v50  ;;  %v4624_v57 = vand.u32 2147483648, %v8027_v50  ;;  %5480 = vrcp.f32 %v8049_v6  ;;  %v4075_v44 = vmul.f32 %v7612_v59, %v2831_v61 }
 0x210   : > { %2911 = vst [vmem:[#allocation2 + $0x99] sm:$0xff] %v8025_v1  ;;  %v3121_v10 = vmul.f32 %v7658_v56, %v2873_v43  ;;  %v8072_v39 = vmul.f32 %v7576_v2, %v2873_v43  ;;  %v8075_v54 = vmul.f32 %v7612_v59, %v2873_v43  ;;  %v8083_v53 = vadd.f32 %v8080_v62, %v2878_v16  ;;  %v2943_v49 = vld [vmem:[#allocation2 + $0x80] sm:$0xff] }
 0x211   : > { %9478 = vst [vmem:[#allocation59_spill] sm:$0xff] %v8080_v62  ;;  %vm4618_vm5 = vweird.f32 %v8027_v50  ;;  %v3234_v61 = vld [vmem:[#allocation2 + $0x7a] sm:$0xff]  ;;  %v8087_v28 = vmul.f32 %v7658_v56, %v2834_v27  ;;  %v8090_v19 = vmul.f32 %v7576_v2, %v2834_v27  ;;  %v8093_v43 = vmul.f32 %v7612_v59, %v2834_v27  ;;  %v8097_v14 = vld [vmem:[#allocation2 + $0x128] sm:$0xff] }
 0x212   : > { %9479 = vst [vmem:[#allocation60_spill] sm:$0xff] %v8083_v53  ;;  %v5479_v9 = vpop.eup %5478  ;;  %v4637_v24 = vand.u32 2147483647, %v8049_v6  ;;  %v4639_v55 = vand.u32 2147483648, %v8049_v6  ;;  %v8100_v33 = vmul.f32 %v7658_v56, %v2876_v51  ;;  %v8103_v5 = vmul.f32 %v7576_v2, %v2876_v51  ;;  %v8116_v3 = vld [vmem:[#allocation2 + $0x122] sm:$0xff] }
 0x213   : > { %2925 = vst [vmem:[#allocation2 + $0x141] sm:$0xff] %v8083_v53  ;;  %v4614_v38 = vmul.f32 %v5479_v9, %v8027_v50  ;;  %vm8107_vm10 = vcmp.eq.f32.partialorder %v4622_v40, 8.507059e+37  ;;  %v4625_v21 = vor.u32 1.1754944e-38, %v4624_v57  ;;  %v8112_v25 = vmul.f32 %v7612_v59, %v2876_v51  ;;  %v3235_v51 = vld [vmem:[#allocation2 + $0x82] sm:$0xff] }
 0x214   : > { %v3913_v16 = vmul.f32 %v7588_v26, %v2943_v49  ;;  %v4236_v4 = vmul.f32 %v7619_v0, %v3234_v61  ;;  %v8120_v36 = vmul.f32 %v7658_v56, %v8025_v1  ;;  %v8124_v40 = vmul.f32 %v7576_v2, %v8025_v1 }
 0x215   : > { %9482 = vst [vmem:[#allocation61_spill] sm:$0xff] %v8112_v25  ;;  %v5481_v29 = vpop.eup %5480  ;;  %v4615_v30 = vsub.f32 1.0, %v4614_v38  ;;  %vm4633_vm9 = vweird.f32 %v8049_v6  ;;  %v2991_v57 = vmul.f32 %v7647_v45, %v8097_v14  ;;  %v8131_v37 = vmul.f32 %v7612_v59, %v8025_v1 }
 0x216   : > { %9483 = vst [vmem:[#allocation62_spill] sm:$0xff] %v8120_v36  ;;  %vm4619_vm11 = vweird.f32 %v5479_v9  ;;  %v4629_v56 = vmul.f32 %v5481_v29, %v8049_v6  ;;  %vm8134_vm12 = vcmp.eq.f32.partialorder %v4637_v24, 8.507059e+37  ;;  %v4640_v2 = vor.u32 1.1754944e-38, %v4639_v55 }
 0x217   : > { %9484 = vst [vmem:[#allocation63_spill] sm:$0xff] %v8131_v37  ;;  %v3945_v38 = vadd.f32 %v3913_v16, %v7995_v47  ;;  %v4616_v7 = vmul.f32 %v5479_v9, %v4615_v30  ;;  %v4268_v15 = vadd.f32 %v4236_v4, %v4106_v60  ;;  %v8139_v62 = vadd.f32 %v3121_v10, %v2991_v57  ;;  %vm4620_vm13 = vmor %vm4618_vm5, %vm4619_vm11 }
 0x218   : > { %v3282_v53 = vmul.f32 %v7667_v12, %v8116_v3  ;;  %v4630_v25 = vsub.f32 1.0, %v4629_v56  ;;  %v2977_v59 = vmul.f32 %v7647_v45, %v2943_v49  ;;  %v4237_v37 = vmul.f32 %v7619_v0, %v3235_v51 }
 0x219   : > { %v4107_v1 = vadd.f32 %v4075_v44, %v3945_v38  ;;  %v4617_v24 = vadd.f32 %v5479_v9, %v4616_v7  ;;  %v3268_v36 = vmul.f32 %v7667_v12, %v3234_v61  ;;  %v4367_v55 = vadd.f32 %v7631_v58, %v4268_v15 }
 0x21a   : > { %v3314_v47 = vadd.f32 %v3282_v53, %v8009_v41  ;;  %v4631_v30 = vmul.f32 %v5481_v29, %v4630_v25  ;;  %vm4634_vm14 = vweird.f32 %v5481_v29  ;;  %v3429_v4 = vmul.f32 %v7555_v48, %v2943_v49  ;;  %v2944_v25 = vld [vmem:[#allocation2 + $0x90] sm:$0xff] }
 0x21b   : > { %v4269_v60 = vadd.f32 %v4237_v37, %v4107_v1  ;;  %v4621_v10 = vsel %vm4620_vm13, %v5479_v9, %v4617_v24  ;;  %v3269_v44 = vmul.f32 %v7667_v12, %v3235_v51  ;;  %v3752_v7 = vmul.f32 %v7581_v46, %v3234_v61  ;;  %vm4635_vm15 = vmor %vm4633_vm9, %vm4634_vm14 }
 0x21c   : > { %v8155_v16 = vadd.f32 %v4367_v55, %v6224_v63  ;;  %v4626_v15 = vsel %vm8107_vm10, %v4625_v21, %v4621_v10  ;;  %v4632_v41 = vadd.f32 %v5481_v29, %v4631_v30  ;;  %v3753_v50 = vmul.f32 %v7581_v46, %v3235_v51  ;;  %v3249_v21 = vld [vmem:[#allocation2 + $0x12a] sm:$0xff] }
 0x21d   : > { %v4368_v53 = vadd.f32 %v7631_v58, %v4269_v60  ;;  %v5037_v48 = vmul.f32 %v4626_v15, %v7964_v13  ;;  %v3139_v37 = vadd.f32 %v8061_v34, %v2977_v59  ;;  %v3927_v63 = vmul.f32 %v7588_v26, %v8097_v14 }
 0x21e   : > { %v4431_v49 = vsub.f32 0.0, %v8155_v16  ;;  %v4636_v61 = vsel %vm4635_vm15, %v5481_v29, %v4632_v41  ;;  %v3461_v9 = vadd.f32 %v3429_v4, %v7991_v8  ;;  %v4250_v6 = vmul.f32 %v7619_v0, %v8116_v3  ;;  %v8180_v29 = vld [vmem:[%s9304_s6 + $0x3] ss:$0 sm:$0xff] }
 0x21f   : > { %v8170_v27 = vadd.f32 %v4368_v53, %v9387_v42  ;;  %v4641_v13 = vsel %vm8134_vm12, %v4640_v2, %v4636_v61  ;;  %5069 = vst [vmem:[%s7805_s21 + $0x20] sm:$0xff] %v5037_v48  ;;  %v3443_v42 = vmul.f32 %v8180_v29, %v8097_v14  ;;  %v3959_v8 = vadd.f32 %v3927_v63, %v8051_v31  ;;  %v2958_v2 = vld [vmem:[#allocation2 + $0x138] sm:$0xff] }
 0x220   : > { %v4469_v34 = vmul.f32 1.442695, %v4431_v49  ;;  %v5038_v51 = vmul.f32 %v4641_v13, %v7979_v32  ;;  %v3300_v57 = vadd.f32 %v3268_v36, %v8053_v52  ;;  %v4282_v56 = vadd.f32 %v4250_v6, %v8058_v22  ;;  %v3236_v48 = vld [vmem:[#allocation2 + $0x92] sm:$0xff] }
 0x221   : > { %v4432_v23 = vsub.f32 0.0, %v8170_v27  ;;  %v4121_v38 = vadd.f32 %v8075_v54, %v3959_v8  ;;  %v4251_v59 = vmul.f32 %v7619_v0, %v3249_v21  ;;  %v3430_v1 = vmul.f32 %v8180_v29, %v2944_v25 }
 0x222   : > { %5482 = vpow2.f32 %v4469_v34  ;;  %5070 = vst [vmem:[%s7805_s21 + $0x28] sm:$0xff] %v5038_v51  ;;  %v3623_v14 = vadd.f32 %v8064_v11, %v3461_v9  ;;  %v3766_v32 = vmul.f32 %v7581_v46, %v8116_v3  ;;  %v4381_v36 = vadd.f32 %v7631_v58, %v4282_v56  ;;  %v2945_v11 = vld [vmem:[#allocation2 + $0x98] sm:$0xff]  ;;  %v8235_v9 = vld [vmem:[%s9304_s6 + $0x5] ss:$0 sm:$0xff] }
 0x223   : > { %v4471_v31 = vmul.f32 1.442695, %v4432_v23  ;;  %v3475_v52 = vadd.f32 %v3443_v42, %v8004_v35  ;;  %v4283_v22 = vadd.f32 %v4251_v59, %v4121_v38  ;;  %v3462_v24 = vadd.f32 %v3430_v1, %v3300_v57  ;;  %v3237_v57 = vld [vmem:[#allocation2 + $0x9a] sm:$0xff] }
 0x224   : > { %v3444_v55 = vmul.f32 %v8180_v29, %v2958_v2  ;;  %v3301_v54 = vadd.f32 %v3269_v44, %v3139_v37  ;;  %v3784_v0 = vadd.f32 %v3752_v7, %v8055_v18  ;;  %v8201_v30 = vadd.f32 %v4381_v36, %v6187_v20  ;;  %v8213_v18 = vld [vmem:[%s9304_s6 + $0x6] ss:$0 sm:$0xff]  ;;  %v9489_v1 = vld [vmem:[#allocation61_spill] sm:$0xff] }
 0x225   : > { %5484 = vpow2.f32 %v4471_v31  ;;  %v4382_v4 = vadd.f32 %v7631_v58, %v4283_v22  ;;  %v8205_v46 = vadd.f32 %v8090_v19, %v3462_v24  ;;  %v3914_v3 = vmul.f32 %v7588_v26, %v2944_v25  ;;  %v9487_v19 = vld [vmem:[#allocation28_spill] sm:$0xff] }
 0x226   : > { %v3476_v35 = vadd.f32 %v3444_v55, %v3314_v47  ;;  %v3785_v60 = vadd.f32 %v3753_v50, %v3623_v14  ;;  %v3798_v10 = vadd.f32 %v3766_v32, %v8022_v17  ;;  %v4445_v44 = vsub.f32 0.0, %v8201_v30 }
 0x227   : > { %v3928_v20 = vmul.f32 %v8213_v18, %v2958_v2  ;;  %v3637_v58 = vadd.f32 %v8072_v39, %v3475_v52  ;;  %v8218_v15 = vadd.f32 %v4382_v4, %v9487_v19  ;;  %v3431_v17 = vmul.f32 %v8180_v29, %v2945_v11 }
 0x228   : > { %v5483_v7 = vpop.eup %5482  ;;  %v8221_v26 = vadd.f32 %v8103_v5, %v3476_v35  ;;  %v4497_v41 = vmul.f32 1.442695, %v4445_v44  ;;  %v2978_v50 = vmul.f32 %v7647_v45, %v2944_v25  ;;  %v2992_v53 = vmul.f32 %v7647_v45, %v2958_v2  ;;  %v9488_v2 = vld [vmem:[#allocation62_spill] sm:$0xff]  ;;  %v9492_v35 = vld [vmem:[#allocation63_spill] sm:$0xff] }
 0x229   : > { %v8224_v47 = vadd.f32 1.0, %v5483_v7  ;;  %v4446_v37 = vsub.f32 0.0, %v8218_v15  ;;  %v3946_v49 = vadd.f32 %v3914_v3, %v3784_v0  ;;  %v2979_v39 = vmul.f32 %v7647_v45, %v2945_v11  ;;  %v8287_v44 = vld [vmem:[#allocation2 + $0x140] sm:$0xff] }
 0x22a   : > { %v3463_v63 = vadd.f32 %v3431_v17, %v3301_v54  ;;  %v3283_v5 = vmul.f32 %v7667_v12, %v3249_v21  ;;  %v3767_v6 = vmul.f32 %v8235_v9, %v3249_v21  ;;  %v3960_v25 = vadd.f32 %v3928_v20, %v3798_v10 }
 0x22b   : > { %v5485_v61 = vpop.eup %5484  ;;  %5486 = vrcp.f32 %v8224_v47  ;;  %v4499_v34 = vmul.f32 1.442695, %v4446_v37  ;;  %v3270_v45 = vmul.f32 %v7667_v12, %v3236_v48  ;;  %v3140_v51 = vadd.f32 %v8087_v28, %v2978_v50  ;;  %v8306_v37 = vld [vmem:[#allocation2 + $0x13a] sm:$0xff] }
 0x22c   : > { %v8238_v13 = vadd.f32 1.0, %v5485_v61  ;;  %5488 = vpow2.f32 %v4497_v41  ;;  %v8242_v42 = vadd.f32 %v3283_v5, %v8139_v62  ;;  %v8244_v8 = vadd.f32 %v3767_v6, %v3637_v58  ;;  %v8296_v58 = vld [vmem:[%s9305_s7] ss:$0 sm:$0xff]  ;;  %v9495_v6 = vld [vmem:[#allocation32_spill] sm:$0xff] }
 0x22d   : > { %v8248_v23 = vadd.f32 %v8124_v40, %v3463_v63  ;;  %v4108_v21 = vadd.f32 %v8093_v43, %v3946_v49  ;;  %v8253_v56 = vadd.f32 %v8100_v33, %v2992_v53  ;;  %v3141_v38 = vadd.f32 %v9488_v2, %v2979_v39  ;;  %v8268_v43 = vld [vmem:[%s9304_s6 + $0x8] ss:$0 sm:$0xff] }
 0x22e   : > { %5490 = vrcp.f32 %v8238_v13  ;;  %v4652_v62 = vand.u32 2147483647, %v8224_v47  ;;  %v4654_v59 = vand.u32 2147483648, %v8224_v47  ;;  %v3915_v28 = vmul.f32 %v8213_v18, %v2945_v11 }
 0x22f   : > { %5492 = vpow2.f32 %v4499_v34  ;;  %v8260_v14 = vadd.f32 %v9489_v1, %v3960_v25  ;;  %v3271_v40 = vmul.f32 %v7667_v12, %v3237_v57  ;;  %v8263_v31 = vadd.f32 %v3270_v45, %v3140_v51  ;;  %v8318_v34 = vld [vmem:[%s9304_s6] ss:$0 sm:$0xff] }
 0x230   : > { %v4238_v33 = vmul.f32 %v8268_v43, %v3236_v48  ;;  %v4667_v36 = vand.u32 2147483647, %v8238_v13  ;;  %v4669_v52 = vand.u32 2147483648, %v8238_v13  ;;  %v8274_v22 = vmul.f32 %v8235_v9, %v3236_v48 }
 0x231   : > { %v5487_v32 = vpop.eup %5486  ;;  %v3947_v24 = vadd.f32 %v3915_v28, %v3785_v60  ;;  %vm4648_vm0 = vweird.f32 %v8224_v47  ;;  %v8278_v54 = vadd.f32 %v3271_v40, %v3141_v38  ;;  %vm8280_vm1 = vcmp.eq.f32.partialorder %v4652_v62, 8.507059e+37  ;;  %v8333_v38 = vld [vmem:[%s9304_s6 + $0x2] ss:$0 sm:$0xff] }
 0x232   : > { %v5489_v55 = vpop.eup %5488  ;;  %v4644_v12 = vmul.f32 %v5487_v32, %v8224_v47  ;;  %v4270_v0 = vadd.f32 %v4238_v33, %v4108_v21  ;;  %v4655_v4 = vor.u32 1.1754944e-38, %v4654_v59  ;;  %vm4663_vm2 = vweird.f32 %v8238_v13  ;;  %v9496_v21 = vld [vmem:[#allocation60_spill] sm:$0xff] }
 0x233   : > { %v8284_v3 = vadd.f32 1.0, %v5489_v55  ;;  %v4109_v10 = vadd.f32 %v9492_v35, %v3947_v24  ;;  %v8291_v7 = vmul.f32 %v8235_v9, %v3237_v57  ;;  %vm8300_vm3 = vcmp.eq.f32.partialorder %v4667_v36, 8.507059e+37  ;;  %v2839_v24 = vpop.f32.mrf.mxu1  ;;  %v8353_v35 = vld [vmem:[%s9304_s6 + $0x4] ss:$0 sm:$0xff] }
 0x234   : > { %v5491_v60 = vpop.eup %5490  ;;  %v4645_v20 = vsub.f32 1.0, %v4644_v12  ;;  %v4369_v19 = vadd.f32 %v8296_v58, %v4270_v0  ;;  %v4670_v53 = vor.u32 1.1754944e-38, %v4669_v52  ;;  %v4239_v48 = vmul.f32 %v8268_v43, %v3237_v57  ;;  %v8326_v57 = vld [vmem:[%s9304_s6 + $0x1] ss:$0 sm:$0xff] }
 0x235   : > { %v5493_v17 = vpop.eup %5492  ;;  %v4659_v41 = vmul.f32 %v5491_v60, %v8238_v13  ;;  %5494 = vrcp.f32 %v8284_v3  ;;  %vm4649_vm4 = vweird.f32 %v5487_v32  ;;  %v3445_v63 = vmul.f32 %v8180_v29, %v8287_v44 }
 0x236   : > { %v4646_v49 = vmul.f32 %v5487_v32, %v4645_v20  ;;  %v8308_v39 = vadd.f32 1.0, %v5493_v17  ;;  %v4271_v5 = vadd.f32 %v4239_v48, %v4109_v10  ;;  %v8313_v25 = vadd.f32 %v4369_v19, %v9495_v6  ;;  %vm4650_vm6 = vmor %vm4648_vm0, %vm4649_vm4  ;;  %v9503_v19 = vld [vmem:[#allocation30_spill] sm:$0xff] }
 0x237   : > { %v4660_v61 = vsub.f32 1.0, %v4659_v41  ;;  %v2993_v45 = vmul.f32 %v8318_v34, %v8287_v44  ;;  %v3123_v2 = vmul.f32 %v8326_v57, %v9496_v21  ;;  %v8337_v62 = vmul.f32 %v8333_v38, %v8306_v37 }
 0x238   : > { %v4647_v51 = vadd.f32 %v5487_v32, %v4646_v49  ;;  %5496 = vrcp.f32 %v8308_v39  ;;  %vm4664_vm7 = vweird.f32 %v5491_v60  ;;  %v4862_v28 = vand.u32 2147483647, %v8284_v3 }
 0x239   : > { %v4661_v59 = vmul.f32 %v5491_v60, %v4660_v61  ;;  %v4864_v1 = vand.u32 2147483648, %v8284_v3  ;;  %v4370_v33 = vadd.f32 %v8296_v58, %v4271_v5  ;;  %v4433_v36 = vsub.f32 0.0, %v8313_v25  ;;  %vm4665_vm8 = vmor %vm4663_vm2, %vm4664_vm7 }
 0x23a   : > { %v4651_v40 = vsel %vm4650_vm6, %v5487_v32, %v4647_v51  ;;  %v3477_v52 = vadd.f32 %v3445_v63, %v8242_v42  ;;  %v8348_v0 = vadd.f32 %v3123_v2, %v2993_v45  ;;  %v3607_v32 = vmul.f32 %v8353_v35, %v9496_v21  ;;  %v2881_v2 = vpop.f32.mrf.mxu3 }
 0x23b   : > { %v5495_v55 = vpop.eup %5494  ;;  %v4656_v12 = vsel %vm8280_vm1, %v4655_v4, %v4651_v40  ;;  %v4662_v47 = vadd.f32 %v5491_v60, %v4661_v59  ;;  %vm4858_vm5 = vweird.f32 %v8284_v3  ;;  %v9497_v4 = vld [vmem:[#allocation33_spill] sm:$0xff]  ;;  %vm8365_vm10 = vcmp.eq.f32.partialorder %v4862_v28, 8.507059e+37 }
 0x23c   : > { %v5039_v42 = vmul.f32 %v4656_v12, %v8155_v16  ;;  %v4854_v11 = vmul.f32 %v5495_v55, %v8284_v3  ;;  %v8363_v10 = vadd.f32 %v4370_v33, %v9497_v4  ;;  %v4473_v17 = vmul.f32 1.442695, %v4433_v36  ;;  %v9500_v33 = vld [vmem:[#allocation59_spill] sm:$0xff] }
 0x23d   : > { %v4666_v20 = vsel %vm4665_vm8, %v5491_v60, %v4662_v47  ;;  %v8369_v41 = vadd.f32 %v3607_v32, %v3477_v52  ;;  %v4865_v49 = vor.u32 1.1754944e-38, %v4864_v1  ;;  %v4877_v5 = vand.u32 2147483647, %v8308_v39  ;;  %v8387_v1 = vld [vmem:[%s9304_s6 + $0x7] ss:$0 sm:$0xff] }
 0x23e   : > { %v5497_v13 = vpop.eup %5496  ;;  %v4671_v16 = vsel %vm8300_vm3, %v4670_v53, %v4666_v20  ;;  %5071 = vst [vmem:[%s7805_s21 + $0x30] sm:$0xff] %v5039_v42  ;;  %v4855_v48 = vsub.f32 1.0, %v4854_v11  ;;  %v4434_v63 = vsub.f32 0.0, %v8363_v10  ;;  %5498 = vpow2.f32 %v4473_v17  ;;  %v3251_v53 = vld [vmem:[#allocation2 + $0x142] sm:$0xff] }
 0x23f   : > { %v5040_v61 = vmul.f32 %v4671_v16, %v8170_v27  ;;  %v4869_v60 = vmul.f32 %v5497_v13, %v8308_v39  ;;  %vm4859_vm9 = vweird.f32 %v5495_v55  ;;  %v4879_v45 = vand.u32 2147483648, %v8308_v39 }
 0x240   : > { %v4856_v6 = vmul.f32 %v5495_v55, %v4855_v48  ;;  %v4475_v51 = vmul.f32 1.442695, %v4434_v63  ;;  %vm4874_vm11 = vweird.f32 %v5497_v13  ;;  %v3929_v59 = vmul.f32 %v8213_v18, %v8287_v44  ;;  %vm4860_vm12 = vmor %vm4858_vm5, %vm4859_vm9 }
 0x241   : > { %5072 = vst [vmem:[%s7805_s21 + $0x38] sm:$0xff] %v5040_v61  ;;  %v4870_v50 = vsub.f32 1.0, %v4869_v60  ;;  %v4252_v27 = vmul.f32 %v8268_v43, %v8306_v37  ;;  %v4091_v40 = vmul.f32 %v8387_v1, %v9496_v21  ;;  %v2840_v36 = vadd.f32 %v9500_v33, %v2839_v24  ;;  %v2842_v24 = vpop.f32.mrf.mxu1 }
 0x242   : > { %v4857_v28 = vadd.f32 %v5495_v55, %v4856_v6  ;;  %5500 = vpow2.f32 %v4475_v51  ;;  %v3961_v52 = vadd.f32 %v3929_v59, %v8244_v8  ;;  %v2882_v47 = vadd.f32 %v9500_v33, %v2881_v2  ;;  %v8442_v2 = vpop.f32.mrf.mxu3  ;;  %v9504_v59 = vld [vmem:[#allocation31_spill] sm:$0xff] }
 0x243   : > { %v4871_v44 = vmul.f32 %v5497_v13, %v4870_v50  ;;  %v4284_v12 = vadd.f32 %v4252_v27, %v8260_v14  ;;  %vm4873_vm13 = vweird.f32 %v8308_v39  ;;  %vm8399_vm14 = vcmp.eq.f32.partialorder %v4877_v5, 8.507059e+37  ;;  %2912 = vst [vmem:[#allocation2 + $0xa9] sm:$0xff] %v2840_v36 }
 0x244   : > { %v4861_v32 = vsel %vm4860_vm12, %v5495_v55, %v4857_v28  ;;  %v4253_v21 = vmul.f32 %v8268_v43, %v3251_v53  ;;  %v5499_v3 = vpop.eup %5498  ;;  %v4123_v14 = vadd.f32 %v4091_v40, %v3961_v52  ;;  %2926 = vst [vmem:[#allocation2 + $0x151] sm:$0xff] %v2882_v47  ;;  %vm4875_vm15 = vmor %vm4873_vm13, %vm4874_vm11  ;;  %v4880_v39 = vor.u32 1.1754944e-38, %v4879_v45 }
 0x245   : > { %v4866_v11 = vsel %vm8365_vm10, %v4865_v49, %v4861_v32  ;;  %v4872_v8 = vadd.f32 %v5497_v13, %v4871_v44  ;;  %v4383_v4 = vadd.f32 %v8296_v58, %v4284_v12  ;;  %v8409_v20 = vadd.f32 1.0, %v5499_v3 }
 0x246   : > { %v5053_v55 = vmul.f32 %v4866_v11, %v8201_v30  ;;  %v3768_v17 = vmul.f32 %v8235_v9, %v8306_v37  ;;  %v4285_v48 = vadd.f32 %v4253_v21, %v4123_v14  ;;  %v8417_v63 = vadd.f32 %v9500_v33, %v2842_v24 }
 0x247   : > { %v4876_v16 = vsel %vm4875_vm15, %v5497_v13, %v4872_v8  ;;  %v8414_v49 = vadd.f32 %v4383_v4, %v9503_v19  ;;  %v3786_v30 = vadd.f32 %v8274_v22, %v8205_v46  ;;  %5502 = vrcp.f32 %v8409_v20 }
 0x248   : > { %v5501_v61 = vpop.eup %5500  ;;  %v4881_v60 = vsel %vm8399_vm14, %v4880_v39, %v4876_v16  ;;  %5085 = vst [vmem:[%s7805_s21 + $0xa0] sm:$0xff] %v5053_v55  ;;  %v3285_v37 = vmul.f32 %v8333_v38, %v3251_v53  ;;  %v3769_v6 = vmul.f32 %v8235_v9, %v3251_v53  ;;  %v4384_v45 = vadd.f32 %v8296_v58, %v4285_v48 }
 0x249   : > { %v5054_v13 = vmul.f32 %v4881_v60, %v8218_v15  ;;  %v8427_v5 = vadd.f32 1.0, %v5501_v61  ;;  %2913 = vst [vmem:[#allocation2 + $0xb1] sm:$0xff] %v8417_v63  ;;  %v8434_v51 = vadd.f32 %v8291_v7, %v8248_v23  ;;  %v3316_v46 = vadd.f32 %v8337_v62, %v8253_v56  ;;  %v8465_v42 = vpop.f32.mrf.mxu1 }
 0x24a   : > { %v8439_v22 = vadd.f32 %v3285_v37, %v8348_v0  ;;  %v4447_v15 = vsub.f32 0.0, %v8414_v49  ;;  %v4682_v50 = vand.u32 2147483647, %v8409_v20  ;;  %v3800_v53 = vadd.f32 %v3768_v17, %v8221_v26  ;;  %v2946_v7 = vld [vmem:[#allocation2 + $0xa8] sm:$0xff] }
 0x24b   : > { %5086 = vst [vmem:[%s7805_s21 + $0xa8] sm:$0xff] %v5054_v13  ;;  %5504 = vrcp.f32 %v8427_v5  ;;  %v8449_v23 = vadd.f32 %v3769_v6, %v8369_v41  ;;  %v8452_v56 = vadd.f32 %v4384_v45, %v9504_v59  ;;  %v3110_v0 = vmul.f32 %v8326_v57, %v2840_v36  ;;  %v3412_v44 = vld [vmem:[#allocation2 + $0x150] sm:$0xff]  ;;  %v8491_v59 = vpop.f32.mrf.mxu3 }
 0x24c   : > { %v4501_v62 = vmul.f32 1.442695, %v4447_v15  ;;  %v3594_v27 = vmul.f32 %v8353_v35, %v2840_v36  ;;  %v4684_v28 = vand.u32 2147483648, %v8409_v20  ;;  %v4078_v40 = vmul.f32 %v8387_v1, %v2840_v36 }
 0x24d   : > { %v3608_v52 = vmul.f32 %v8353_v35, %v2882_v47  ;;  %v8460_v26 = vmul.f32 %v8387_v1, %v2882_v47  ;;  %v5503_v41 = vpop.eup %5502  ;;  %vm4678_vm0 = vweird.f32 %v8409_v20  ;;  %v4448_v12 = vsub.f32 0.0, %v8452_v56 }
 0x24e   : > { %5506 = vpow2.f32 %v4501_v62  ;;  %v3432_v32 = vmul.f32 %v8180_v29, %v2946_v7  ;;  %v4674_v21 = vmul.f32 %v5503_v41, %v8409_v20  ;;  %vm8468_vm1 = vcmp.eq.f32.partialorder %v4682_v50, 8.507059e+37 }
 0x24f   : > { %v4697_v24 = vand.u32 2147483647, %v8427_v5  ;;  %v3111_v47 = vmul.f32 %v8326_v57, %v8417_v63  ;;  %v4699_v3 = vand.u32 2147483648, %v8427_v5  ;;  %v4503_v11 = vmul.f32 1.442695, %v4448_v12 }
 0x250   : > { %v3916_v8 = vmul.f32 %v8213_v18, %v2946_v7  ;;  %v3446_v14 = vmul.f32 %v8180_v29, %v3412_v44  ;;  %v4675_v39 = vsub.f32 1.0, %v4674_v21  ;;  %v4685_v55 = vor.u32 1.1754944e-38, %v4684_v28  ;;  %v2947_v61 = vld [vmem:[#allocation2 + $0xb0] sm:$0xff] }
 0x251   : > { %v5505_v4 = vpop.eup %5504  ;;  %v2980_v17 = vmul.f32 %v8318_v34, %v2946_v7  ;;  %v8481_v16 = vmul.f32 %v8353_v35, %v8417_v63  ;;  %vm4693_vm2 = vweird.f32 %v8427_v5  ;;  %5508 = vpow2.f32 %v4503_v11 }
 0x252   : > { %v4689_v48 = vmul.f32 %v5505_v4, %v8427_v5  ;;  %v3464_v19 = vadd.f32 %v3432_v32, %v8263_v31  ;;  %v4676_v60 = vmul.f32 %v5503_v41, %v4675_v39  ;;  %vm4679_vm3 = vweird.f32 %v5503_v41  ;;  %v2848_v39 = vpop.f32.mrf.mxu1 }
 0x253   : > { %vm8486_vm4 = vcmp.eq.f32.partialorder %v4697_v24, 8.507059e+37  ;;  %v3930_v13 = vmul.f32 %v8213_v18, %v3412_v44  ;;  %v4700_v15 = vor.u32 1.1754944e-38, %v4699_v3  ;;  %v3948_v50 = vadd.f32 %v3916_v8, %v3786_v30  ;;  %vm4680_vm6 = vmor %vm4678_vm0, %vm4679_vm3  ;;  %v3238_v44 = vld [vmem:[#allocation2 + $0xaa] sm:$0xff]  ;;  %v3239_v3 = vld [vmem:[#allocation2 + $0xb2] sm:$0xff] }
 0x254   : > { %v5507_v6 = vpop.eup %5506  ;;  %v4690_v45 = vsub.f32 1.0, %v4689_v48  ;;  %v3478_v7 = vadd.f32 %v3446_v14, %v3316_v46  ;;  %v4677_v62 = vadd.f32 %v5503_v41, %v4676_v60  ;;  %v3142_v31 = vadd.f32 %v3110_v0, %v2980_v17 }
 0x255   : > { %v8493_v28 = vadd.f32 1.0, %v5507_v6  ;;  %v2981_v12 = vmul.f32 %v8318_v34, %v2947_v61  ;;  %vm4694_vm7 = vweird.f32 %v5505_v4  ;;  %v8498_v21 = vadd.f32 %v3594_v27, %v3464_v19 }
 0x256   : > { %v4691_v32 = vmul.f32 %v5505_v4, %v4690_v45  ;;  %v4079_v30 = vmul.f32 %v8387_v1, %v8417_v63  ;;  %v4681_v46 = vsel %vm4680_vm6, %v5503_v41, %v4677_v62  ;;  %v3962_v24 = vadd.f32 %v3930_v13, %v3800_v53  ;;  %vm4695_vm8 = vmor %vm4693_vm2, %vm4694_vm7 }
 0x257   : > { %5510 = vrcp.f32 %v8493_v28  ;;  %v3433_v0 = vmul.f32 %v8180_v29, %v2947_v61  ;;  %v5509_v11 = vpop.eup %5508  ;;  %v4686_v20 = vsel %vm8468_vm1, %v4685_v55, %v4681_v46  ;;  %v4110_v14 = vadd.f32 %v4078_v40, %v3948_v50 }
 0x258   : > { %v4692_v8 = vadd.f32 %v5505_v4, %v4691_v32  ;;  %v8506_v27 = vadd.f32 %v3608_v52, %v3478_v7  ;;  %v5041_v63 = vmul.f32 %v4686_v20, %v8313_v25  ;;  %v8512_v53 = vadd.f32 1.0, %v5509_v11 }
 0x259   : > { %v3143_v41 = vadd.f32 %v3111_v47, %v2981_v12  ;;  %v3272_v17 = vmul.f32 %v8333_v38, %v3238_v44  ;;  %v3273_v36 = vmul.f32 %v8333_v38, %v3239_v3  ;;  %v3756_v55 = vmul.f32 %v8235_v9, %v3238_v44 }
 0x25a   : > { %v4696_v48 = vsel %vm4695_vm8, %v5505_v4, %v4692_v8  ;;  %v3917_v40 = vmul.f32 %v8213_v18, %v2947_v61  ;;  %5073 = vst [vmem:[%s7805_s21 + $0x40] sm:$0xff] %v5041_v63  ;;  %5512 = vrcp.f32 %v8512_v53  ;;  %v8523_v25 = vadd.f32 %v8460_v26, %v3962_v24  ;;  %v2851_v11 = vpop.f32.mrf.mxu1 }
 0x25b   : > { %v4701_v52 = vsel %vm8486_vm4, %v4700_v15, %v4696_v48  ;;  %v3465_v5 = vadd.f32 %v3433_v0, %v8278_v54  ;;  %v4892_v4 = vand.u32 2147483647, %v8493_v28  ;;  %v4240_v60 = vmul.f32 %v8268_v43, %v3238_v44  ;;  %v2890_v15 = vpop.f32.mrf.mxu3  ;;  %v9512_v48 = vld [vmem:[#allocation35_spill] sm:$0xff] }
 0x25c   : > { %v5042_v47 = vmul.f32 %v4701_v52, %v8363_v10  ;;  %v3949_v19 = vadd.f32 %v3917_v40, %v8434_v51  ;;  %v8530_v13 = vadd.f32 %v3272_v17, %v3142_v31  ;;  %v8532_v37 = vadd.f32 %v3273_v36, %v3143_v41 }
 0x25d   : > { %v5511_v61 = vpop.eup %5510  ;;  %v8536_v6 = vadd.f32 %v9500_v33, %v8442_v2  ;;  %v8540_v54 = vadd.f32 %v9500_v33, %v8465_v42  ;;  %v3757_v51 = vmul.f32 %v8235_v9, %v3239_v3  ;;  %v4241_v45 = vmul.f32 %v8268_v43, %v3239_v3 }
 0x25e   : > { %5074 = vst [vmem:[%s7805_s21 + $0x48] sm:$0xff] %v5042_v47  ;;  %v4884_v10 = vmul.f32 %v5511_v61, %v8493_v28  ;;  %v4111_v26 = vadd.f32 %v4079_v30, %v3949_v19  ;;  %vm4888_vm5 = vweird.f32 %v8493_v28  ;;  %v4894_v50 = vand.u32 2147483648, %v8493_v28 }
 0x25f   : > { %v3627_v2 = vadd.f32 %v8481_v16, %v3465_v5  ;;  %v4272_v7 = vadd.f32 %v4240_v60, %v4110_v14  ;;  %2927 = vst [vmem:[#allocation2 + $0x159] sm:$0xff] %v8536_v6  ;;  %vm8550_vm10 = vcmp.eq.f32.partialorder %v4892_v4, 8.507059e+37  ;;  %v4907_v31 = vand.u32 2147483647, %v8512_v53 }
 0x260   : > { %v4885_v42 = vsub.f32 1.0, %v4884_v10  ;;  %v4273_v12 = vadd.f32 %v4241_v45, %v4111_v26  ;;  %2914 = vst [vmem:[#allocation2 + $0xc1] sm:$0xff] %v8540_v54  ;;  %v5513_v32 = vpop.eup %5512  ;;  %v8559_v30 = vadd.f32 %v9500_v33, %v8491_v59  ;;  %v8562_v16 = vadd.f32 %v9500_v33, %v2848_v39  ;;  %v9511_v59 = vld [vmem:[#allocation29_spill] sm:$0xff] }
 0x261   : > { %v4371_v44 = vadd.f32 %v8296_v58, %v4272_v7  ;;  %v8565_v46 = vadd.f32 %v9500_v33, %v2890_v15  ;;  %vm4889_vm9 = vweird.f32 %v5511_v61  ;;  %v4899_v3 = vmul.f32 %v5513_v32, %v8512_v53 }
 0x262   : > { %v4886_v24 = vmul.f32 %v5511_v61, %v4885_v42  ;;  %v4372_v0 = vadd.f32 %v8296_v58, %v4273_v12  ;;  %v4895_v20 = vor.u32 1.1754944e-38, %v4894_v50  ;;  %v4909_v8 = vand.u32 2147483648, %v8512_v53  ;;  %2928 = vst [vmem:[#allocation2 + $0x169] sm:$0xff] %v8559_v30  ;;  %vm4890_vm11 = vmor %vm4888_vm5, %vm4889_vm9 }
 0x263   : > { %v8571_v14 = vadd.f32 %v3756_v55, %v8498_v21  ;;  %v8574_v63 = vadd.f32 %v4371_v44, %v9511_v59  ;;  %v4900_v41 = vsub.f32 1.0, %v4899_v3  ;;  %v8577_v17 = vadd.f32 %v3757_v51, %v3627_v2  ;;  %2915 = vst [vmem:[#allocation2 + $0xc9] sm:$0xff] %v8562_v16 }
 0x264   : > { %v4887_v39 = vadd.f32 %v5511_v61, %v4886_v24  ;;  %v8580_v36 = vadd.f32 %v4372_v0, %v9512_v48  ;;  %vm4903_vm12 = vweird.f32 %v8512_v53  ;;  %vm8586_vm13 = vcmp.eq.f32.partialorder %v4907_v31, 8.507059e+37  ;;  %2929 = vst [vmem:[#allocation2 + $0x171] sm:$0xff] %v8565_v46 }
 0x265   : > { %v4435_v55 = vsub.f32 0.0, %v8574_v63  ;;  %v8593_v40 = vadd.f32 %v9500_v33, %v2851_v11  ;;  %v4901_v5 = vmul.f32 %v5513_v32, %v4900_v41  ;;  %vm4904_vm14 = vweird.f32 %v5513_v32 }
 0x266   : > { %v4891_v52 = vsel %vm4890_vm11, %v5511_v61, %v4887_v39  ;;  %v4436_v47 = vsub.f32 0.0, %v8580_v36  ;;  %v8596_v28 = vld [vmem:[#allocation2 + $0x158] sm:$0xff]  ;;  %v4910_v19 = vor.u32 1.1754944e-38, %v4909_v8  ;;  %v3609_v45 = vmul.f32 %v8353_v35, %v8536_v6  ;;  %vm4905_vm15 = vmor %vm4903_vm12, %vm4904_vm14 }
 0x267   : > { %v4896_v4 = vsel %vm8550_vm10, %v4895_v20, %v4891_v52  ;;  %v4477_v60 = vmul.f32 1.442695, %v4435_v55  ;;  %v3447_v10 = vmul.f32 %v8180_v29, %v8596_v28  ;;  %v8602_v51 = vld [vmem:[#allocation2 + $0x152] sm:$0xff]  ;;  %2916 = vst [vmem:[#allocation2 + $0xd9] sm:$0xff] %v8593_v40  ;;  %v4902_v33 = vadd.f32 %v5513_v32, %v4901_v5  ;;  %v8618_v42 = vld [vmem:[#allocation2 + $0x15a] sm:$0xff] }
 0x268   : > { %v5055_v61 = vmul.f32 %v4896_v4, %v8414_v49  ;;  %v4479_v26 = vmul.f32 1.442695, %v4436_v47  ;;  %v3931_v15 = vmul.f32 %v8213_v18, %v8596_v28  ;;  %v4093_v50 = vmul.f32 %v8387_v1, %v8536_v6  ;;  %v2948_v62 = vld [vmem:[#allocation2 + $0xc0] sm:$0xff] }
 0x269   : > { %5514 = vpow2.f32 %v4477_v60  ;;  %v3112_v2 = vmul.f32 %v8326_v57, %v8540_v54  ;;  %v4906_v7 = vsel %vm4905_vm15, %v5513_v32, %v4902_v33  ;;  %v3479_v49 = vadd.f32 %v3447_v10, %v8439_v22  ;;  %v8629_v24 = vld [vmem:[#allocation2 + $0x168] sm:$0xff]  ;;  %v9515_v60 = vld [vmem:[#allocation18_spill] sm:$0xff] }
 0x26a   : > { %5087 = vst [vmem:[%s7805_s21 + $0xb0] sm:$0xff] %v5055_v61  ;;  %5516 = vpow2.f32 %v4479_v26  ;;  %v4254_v53 = vmul.f32 %v8268_v43, %v8602_v51  ;;  %v4911_v31 = vsel %vm8586_vm13, %v4910_v19, %v4906_v7  ;;  %v3963_v12 = vadd.f32 %v3931_v15, %v8449_v23  ;;  %v2949_v33 = vld [vmem:[#allocation2 + $0xc8] sm:$0xff] }
 0x26b   : > { %v3596_v44 = vmul.f32 %v8353_v35, %v8540_v54  ;;  %v4080_v32 = vmul.f32 %v8387_v1, %v8540_v54  ;;  %v5056_v22 = vmul.f32 %v4911_v31, %v8452_v56  ;;  %v3770_v3 = vmul.f32 %v8235_v9, %v8602_v51  ;;  %v8662_v61 = vld [vmem:[#allocation2 + $0xc2] sm:$0xff] }
 0x26c   : > { %v4286_v0 = vadd.f32 %v4254_v53, %v8523_v25  ;;  %v4094_v11 = vmul.f32 %v8387_v1, %v8559_v30  ;;  %v4125_v20 = vadd.f32 %v4093_v50, %v3963_v12  ;;  %v4255_v23 = vmul.f32 %v8268_v43, %v8618_v42  ;;  %v8669_v50 = vld [vmem:[#allocation2 + $0xca] sm:$0xff]  ;;  %v9516_v31 = vld [vmem:[#allocation34_spill] sm:$0xff] }
 0x26d   : > { %v3434_v8 = vmul.f32 %v8180_v29, %v2948_v62  ;;  %v3918_v54 = vmul.f32 %v8213_v18, %v2948_v62  ;;  %5088 = vst [vmem:[%s7805_s21 + $0xb8] sm:$0xff] %v5056_v22  ;;  %v3641_v59 = vadd.f32 %v3609_v45, %v3479_v49  ;;  %v3932_v39 = vmul.f32 %v8213_v18, %v8629_v24 }
 0x26e   : > { %v4385_v56 = vadd.f32 %v8296_v58, %v4286_v0  ;;  %v3113_v25 = vmul.f32 %v8326_v57, %v8562_v16  ;;  %v4287_v48 = vadd.f32 %v4255_v23, %v4125_v20  ;;  %v2982_v21 = vmul.f32 %v8318_v34, %v2948_v62 }
 0x26f   : > { %v5515_v41 = vpop.eup %5514  ;;  %v8650_v55 = vmul.f32 %v8353_v35, %v8562_v16  ;;  %v4081_v52 = vmul.f32 %v8387_v1, %v8562_v16  ;;  %v3771_v4 = vmul.f32 %v8235_v9, %v8618_v42  ;;  %v3802_v19 = vadd.f32 %v3770_v3, %v8506_v27 }
 0x270   : > { %v5517_v5 = vpop.eup %5516  ;;  %v8654_v47 = vadd.f32 1.0, %v5515_v41  ;;  %v8660_v10 = vadd.f32 %v4385_v56, %v9515_v60  ;;  %v4386_v45 = vadd.f32 %v8296_v58, %v4287_v48  ;;  %v3466_v16 = vadd.f32 %v3434_v8, %v8530_v13 }
 0x271   : > { %v8664_v26 = vadd.f32 1.0, %v5517_v5  ;;  %v3950_v15 = vadd.f32 %v3918_v54, %v8571_v14  ;;  %v3803_v7 = vadd.f32 %v3771_v4, %v3641_v59  ;;  %v3964_v27 = vadd.f32 %v3932_v39, %v3802_v19 }
 0x272   : > { %5518 = vrcp.f32 %v8654_v47  ;;  %v8674_v49 = vmul.f32 %v8387_v1, %v8565_v46  ;;  %v3144_v53 = vadd.f32 %v3112_v2, %v2982_v21  ;;  %v2983_v62 = vmul.f32 %v8318_v34, %v2949_v33 }
 0x273   : > { %5520 = vrcp.f32 %v8664_v26  ;;  %v3274_v13 = vmul.f32 %v8333_v38, %v8662_v61  ;;  %v4714_v14 = vand.u32 2147483648, %v8654_v47  ;;  %v8682_v12 = vadd.f32 %v4386_v45, %v9516_v31 }
 0x274   : > { %v4449_v22 = vsub.f32 0.0, %v8660_v10  ;;  %v3275_v3 = vmul.f32 %v8333_v38, %v8669_v50  ;;  %v4712_v0 = vand.u32 2147483647, %v8654_v47  ;;  %v4729_v20 = vand.u32 2147483648, %v8664_v26 }
 0x275   : > { %v8689_v2 = vadd.f32 %v3596_v44, %v3466_v16  ;;  %v4112_v23 = vadd.f32 %v4080_v32, %v3950_v15  ;;  %v4727_v8 = vand.u32 2147483647, %v8664_v26  ;;  %v4450_v54 = vsub.f32 0.0, %v8682_v12  ;;  %v8698_v32 = vld [vmem:[#allocation2 + $0x170] sm:$0xff] }
 0x276   : > { %v4505_v59 = vmul.f32 1.442695, %v4449_v22  ;;  %v4126_v56 = vadd.f32 %v4094_v11, %v3964_v27  ;;  %vm4708_vm0 = vweird.f32 %v8654_v47  ;;  %v3145_v39 = vadd.f32 %v3113_v25, %v2983_v62  ;;  %v8706_v16 = vld [vmem:[#allocation2 + $0x16a] sm:$0xff] }
 0x277   : > { %v3919_v41 = vmul.f32 %v8213_v18, %v2949_v33  ;;  %v4242_v48 = vmul.f32 %v8268_v43, %v8662_v61  ;;  %v4715_v5 = vor.u32 1.1754944e-38, %v4714_v14  ;;  %vm4723_vm1 = vweird.f32 %v8664_v26  ;;  %v9522_v27 = vld [vmem:[#allocation19_spill] sm:$0xff] }
 0x278   : > { %v5519_v21 = vpop.eup %5518  ;;  %5522 = vpow2.f32 %v4505_v59  ;;  %v4507_v44 = vmul.f32 1.442695, %v4450_v54  ;;  %vm8701_vm2 = vcmp.eq.f32.partialorder %v4712_v0, 8.507059e+37  ;;  %v4730_v25 = vor.u32 1.1754944e-38, %v4729_v20 }
 0x279   : > { %v5521_v4 = vpop.eup %5520  ;;  %v4704_v19 = vmul.f32 %v5519_v21, %v8654_v47  ;;  %v3951_v60 = vadd.f32 %v3919_v41, %v8577_v17  ;;  %v4274_v45 = vadd.f32 %v4242_v48, %v4112_v23  ;;  %vm8709_vm3 = vcmp.eq.f32.partialorder %v4727_v8, 8.507059e+37  ;;  %v8726_v48 = vld [vmem:[#allocation2 + $0x172] sm:$0xff] }
 0x27a   : > { %v4719_v15 = vmul.f32 %v5521_v4, %v8664_v26  ;;  %5524 = vpow2.f32 %v4507_v44  ;;  %v3435_v62 = vmul.f32 %v8180_v29, %v2949_v33  ;;  %v4243_v14 = vmul.f32 %v8268_v43, %v8669_v50  ;;  %v9521_v29 = vld [vmem:[#allocation17_spill] sm:$0xff] }
 0x27b   : > { %v4705_v31 = vsub.f32 1.0, %v4704_v19  ;;  %v4113_v22 = vadd.f32 %v4081_v52, %v3951_v60  ;;  %v4373_v0 = vadd.f32 %v8296_v58, %v4274_v45  ;;  %v3933_v17 = vmul.f32 %v8213_v18, %v8698_v32 }
 0x27c   : > { %vm4709_vm4 = vweird.f32 %v5519_v21  ;;  %v4720_v20 = vsub.f32 1.0, %v4719_v15  ;;  %v8719_v23 = vadd.f32 %v3274_v13, %v3144_v53  ;;  %v4256_v8 = vmul.f32 %v8268_v43, %v8706_v16  ;;  %v8737_v15 = vld [vmem:[#allocation2 + $0xe0] sm:$0xff] }
 0x27d   : > { %v4706_v54 = vmul.f32 %v5519_v21, %v4705_v31  ;;  %v4275_v59 = vadd.f32 %v4243_v14, %v4113_v22  ;;  %v8724_v33 = vadd.f32 %v4373_v0, %v9521_v29  ;;  %v3965_v41 = vadd.f32 %v3933_v17, %v3803_v7  ;;  %vm4710_vm7 = vmor %vm4708_vm0, %vm4709_vm4 }
 0x27e   : > { %v5523_v52 = vpop.eup %5522  ;;  %v4721_v44 = vmul.f32 %v5521_v4, %v4720_v20  ;;  %vm4724_vm6 = vweird.f32 %v5521_v4  ;;  %v8728_v19 = vadd.f32 %v3275_v3, %v3145_v39  ;;  %v4288_v18 = vadd.f32 %v4256_v8, %v4126_v56 }
 0x27f   : > { %v4707_v60 = vadd.f32 %v5519_v21, %v4706_v54  ;;  %v8730_v53 = vadd.f32 1.0, %v5523_v52  ;;  %v3467_v13 = vadd.f32 %v3435_v62, %v8532_v37  ;;  %v8735_v45 = vmul.f32 %v8235_v9, %v8662_v61  ;;  %v8746_v37 = vld [vmem:[#allocation2 + $0xd8] sm:$0xff]  ;;  %vm4725_vm8 = vmor %vm4723_vm1, %vm4724_vm6 }
 0x280   : > { %v5525_v7 = vpop.eup %5524  ;;  %v4722_v14 = vadd.f32 %v5521_v4, %v4721_v44  ;;  %v4374_v3 = vadd.f32 %v8296_v58, %v4275_v59  ;;  %v4437_v56 = vsub.f32 0.0, %v8724_v33  ;;  %v4257_v39 = vmul.f32 %v8268_v43, %v8726_v48  ;;  %v8788_v59 = vld [vmem:[#allocation2 + $0xda] sm:$0xff] }
 0x281   : > { %v4711_v62 = vsel %vm4710_vm7, %v5519_v21, %v4707_v60  ;;  %v8751_v61 = vadd.f32 1.0, %v5525_v7  ;;  %5526 = vrcp.f32 %v8730_v53  ;;  %v4127_v47 = vadd.f32 %v8674_v49, %v3965_v41 }
 0x282   : > { %v4716_v31 = vsel %vm8701_vm2, %v4715_v5, %v4711_v62  ;;  %v4726_v22 = vsel %vm4725_vm8, %v5521_v4, %v4722_v14  ;;  %v4387_v43 = vadd.f32 %v8296_v58, %v4288_v18  ;;  %v2985_v21 = vmul.f32 %v8318_v34, %v8737_v15 }
 0x283   : > { %v4731_v26 = vsel %vm8709_vm3, %v4730_v25, %v4726_v22  ;;  %v5043_v0 = vmul.f32 %v4716_v31, %v8574_v63  ;;  %5528 = vrcp.f32 %v8751_v61  ;;  %v2984_v49 = vmul.f32 %v8318_v34, %v8746_v37 }
 0x284   : > { %v5044_v11 = vmul.f32 %v4731_v26, %v8580_v36  ;;  %v4922_v5 = vand.u32 2147483647, %v8730_v53  ;;  %v4924_v4 = vand.u32 2147483648, %v8730_v53  ;;  %v8771_v17 = vmul.f32 %v8235_v9, %v8669_v50  ;;  %v9523_v36 = vld [vmem:[#allocation36_spill] sm:$0xff] }
 0x285   : > { %5075 = vst [vmem:[%s7805_s21 + $0x50] sm:$0xff] %v5043_v0  ;;  %v8775_v25 = vadd.f32 %v4374_v3, %v9522_v27  ;;  %v4481_v63 = vmul.f32 1.442695, %v4437_v56  ;;  %v4289_v20 = vadd.f32 %v4257_v39, %v4127_v47  ;;  %v3114_v8 = vmul.f32 %v8326_v57, %v8593_v40  ;;  %v9524_v9 = vld [vmem:[#allocation16_spill] sm:$0xff]  ;;  %v9527_v3 = vld [vmem:[#allocation37_spill] sm:$0xff] }
 0x286   : > { %5076 = vst [vmem:[%s7805_s21 + $0x58] sm:$0xff] %v5044_v11  ;;  %vm4918_vm5 = vweird.f32 %v8730_v53  ;;  %v8782_v34 = vadd.f32 %v8650_v55, %v3467_v13  ;;  %v8785_v54 = vadd.f32 %v4387_v43, %v9523_v36  ;;  %v3147_v50 = vadd.f32 %v9524_v9, %v2985_v21  ;;  %v9528_v39 = vld [vmem:[#allocation13_spill] sm:$0xff]  ;;  %v8812_v0 = vld [vmem:[%s9304_s6 + $0x3] ss:$0 sm:$0xff] }
 0x287   : > { %v5527_v29 = vpop.eup %5526  ;;  %v4438_v41 = vsub.f32 0.0, %v8775_v25  ;;  %5530 = vpow2.f32 %v4481_v63  ;;  %v4388_v52 = vadd.f32 %v8296_v58, %v4289_v20  ;;  %v3146_v57 = vadd.f32 %v3114_v8, %v2984_v49  ;;  %v9529_v63 = vld [vmem:[#allocation44_spill] sm:$0xff] }
 0x288   : > { %v4914_v44 = vmul.f32 %v5527_v29, %v8730_v53  ;;  %vm8793_vm10 = vcmp.eq.f32.partialorder %v4922_v5, 8.507059e+37  ;;  %v4925_v55 = vor.u32 1.1754944e-38, %v4924_v4  ;;  %vm4933_vm9 = vweird.f32 %v8751_v61  ;;  %v9530_v8 = vld [vmem:[#allocation48_spill] sm:$0xff] }
 0x289   : > { %v4937_v60 = vand.u32 2147483647, %v8751_v61  ;;  %v4451_v13 = vsub.f32 0.0, %v8785_v54  ;;  %v5529_v7 = vpop.eup %5528  ;;  %v4483_v14 = vmul.f32 1.442695, %v4438_v41  ;;  %v8801_v56 = vadd.f32 %v4388_v52, %v9527_v3 }
 0x28a   : > { %v3276_v58 = vmul.f32 %v8333_v38, %v8788_v59  ;;  %v3309_v62 = vadd.f32 %v9528_v39, %v3147_v50  ;;  %v4915_v47 = vsub.f32 1.0, %v4914_v44  ;;  %v4929_v31 = vmul.f32 %v5529_v7, %v8751_v61 }
 0x28b   : > { %v4939_v22 = vand.u32 2147483648, %v8751_v61  ;;  %v4509_v43 = vmul.f32 1.442695, %v4451_v13  ;;  %5532 = vpow2.f32 %v4483_v14  ;;  %v4452_v21 = vsub.f32 0.0, %v8801_v56  ;;  %v9532_v13 = vld [vmem:[#allocation46_spill] sm:$0xff] }
 0x28c   : > { %v3308_v26 = vadd.f32 %v3276_v58, %v3146_v57  ;;  %v3436_v38 = vmul.f32 %v8812_v0, %v8746_v37  ;;  %v4916_v49 = vmul.f32 %v5527_v29, %v4915_v47  ;;  %vm4919_vm11 = vweird.f32 %v5527_v29  ;;  %v9531_v57 = vld [vmem:[#allocation14_spill] sm:$0xff] }
 0x28d   : > { %v4930_v11 = vsub.f32 1.0, %v4929_v31  ;;  %5534 = vpow2.f32 %v4509_v43  ;;  %v5531_v5 = vpop.eup %5530  ;;  %v4511_v4 = vmul.f32 1.442695, %v4452_v21  ;;  %v3437_v27 = vmul.f32 %v8812_v0, %v8737_v15  ;;  %vm4920_vm13 = vmor %vm4918_vm5, %vm4919_vm11 }
 0x28e   : > { %v3470_v20 = vadd.f32 %v9529_v63, %v3308_v26  ;;  %v3471_v36 = vadd.f32 %v9530_v8, %v3309_v62  ;;  %v4917_v9 = vadd.f32 %v5527_v29, %v4916_v49  ;;  %vm4934_vm12 = vweird.f32 %v5529_v7 }
 0x28f   : > { %v4931_v50 = vmul.f32 %v5529_v7, %v4930_v11  ;;  %v8820_v41 = vadd.f32 1.0, %v5531_v5  ;;  %5536 = vpow2.f32 %v4511_v4  ;;  %v3468_v52 = vadd.f32 %v3436_v38, %v8719_v23  ;;  %vm4935_vm15 = vmor %vm4933_vm9, %vm4934_vm12  ;;  %v9533_v38 = vld [vmem:[#allocation23_spill] sm:$0xff] }
 0x290   : > { %v3632_v44 = vadd.f32 %v9531_v57, %v3470_v20  ;;  %v3633_v14 = vadd.f32 %v9532_v13, %v3471_v36  ;;  %v4921_v3 = vsel %vm4920_vm13, %v5527_v29, %v4917_v9  ;;  %vm4938_vm14 = vcmp.eq.f32.partialorder %v4937_v60, 8.507059e+37  ;;  %v9537_v13 = vld [vmem:[#allocation49_spill] sm:$0xff] }
 0x291   : > { %v4932_v58 = vadd.f32 %v5529_v7, %v4931_v50  ;;  %5538 = vrcp.f32 %v8820_v41  ;;  %v5533_v39 = vpop.eup %5532  ;;  %v4926_v62 = vsel %vm8793_vm10, %v4925_v55, %v4921_v3  ;;  %v4940_v53 = vor.u32 1.1754944e-38, %v4939_v22 }
 0x292   : > { %v3469_v23 = vadd.f32 %v3437_v27, %v8728_v19  ;;  %v3598_v47 = vmul.f32 %v8353_v35, %v8593_v40  ;;  %v5057_v60 = vmul.f32 %v4926_v62, %v8660_v10  ;;  %v8836_v43 = vadd.f32 1.0, %v5533_v39  ;;  %v9538_v62 = vld [vmem:[#allocation50_spill] sm:$0xff] }
 0x293   : > { %v5535_v31 = vpop.eup %5534  ;;  %v4936_v29 = vsel %vm4935_vm15, %v5529_v7, %v4932_v58  ;;  %v4744_v21 = vand.u32 2147483648, %v8820_v41  ;;  %v4742_v55 = vand.u32 2147483647, %v8820_v41  ;;  %v3790_v35 = vadd.f32 %v8735_v45, %v8689_v2 }
 0x294   : > { %v4941_v18 = vsel %vm4938_vm14, %v4940_v53, %v4936_v29  ;;  %v8840_v61 = vadd.f32 1.0, %v5535_v31  ;;  %v3630_v22 = vadd.f32 %v3598_v47, %v3468_v52  ;;  %5089 = vst [vmem:[%s7805_s21 + $0xc0] sm:$0xff] %v5057_v60  ;;  %v3791_v10 = vadd.f32 %v8771_v17, %v8782_v34  ;;  %v9536_v52 = vld [vmem:[#allocation42_spill] sm:$0xff] }
 0x295   : > { %v5058_v19 = vmul.f32 %v4941_v18, %v8682_v12  ;;  %5540 = vrcp.f32 %v8836_v43  ;;  %v5537_v7 = vpop.eup %5536  ;;  %v4759_v26 = vand.u32 2147483648, %v8836_v43  ;;  %v3631_v49 = vadd.f32 %v9533_v38, %v3469_v23  ;;  %v8855_v12 = vld [vmem:[%s9304_s6 + $0x5] ss:$0 sm:$0xff]  ;;  %v8886_v23 = vld [vmem:[%s9304_s6 + $0x6] ss:$0 sm:$0xff]  ;;  %v9544_v38 = vld [vmem:[#allocation51_spill] sm:$0xff] }
 0x296   : > { %5542 = vrcp.f32 %v8840_v61  ;;  %v3760_v2 = vmul.f32 %v8855_v12, %v8788_v59  ;;  %vm4738_vm0 = vweird.f32 %v8820_v41  ;;  %v4745_v17 = vor.u32 1.1754944e-38, %v4744_v21 }
 0x297   : > { %v5539_v45 = vpop.eup %5538  ;;  %5090 = vst [vmem:[%s7805_s21 + $0xc8] sm:$0xff] %v5058_v19  ;;  %v8861_v34 = vadd.f32 1.0, %v5537_v7  ;;  %v4954_v11 = vand.u32 2147483648, %v8840_v61  ;;  %vm8865_vm1 = vcmp.eq.f32.partialorder %v4742_v55, 8.507059e+37  ;;  %v4757_v27 = vand.u32 2147483647, %v8836_v43 }
 0x298   : > { %v4734_v5 = vmul.f32 %v5539_v45, %v8820_v41  ;;  %v4952_v63 = vand.u32 2147483647, %v8840_v61  ;;  %v3792_v20 = vadd.f32 %v3760_v2, %v3630_v22  ;;  %vm4739_vm2 = vweird.f32 %v5539_v45  ;;  %v9543_v7 = vld [vmem:[#allocation45_spill] sm:$0xff] }
 0x299   : > { %v8871_v8 = vor.u32 1.1754944e-38, %v4759_v26  ;;  %v8873_v36 = vor.u32 1.1754944e-38, %v4954_v11  ;;  %5544 = vrcp.f32 %v8861_v34  ;;  %vm4753_vm3 = vweird.f32 %v8836_v43  ;;  %vm4740_vm9 = vmor %vm4738_vm0, %vm4739_vm2 }
 0x29a   : > { %v4735_v9 = vsub.f32 1.0, %v4734_v5  ;;  %v4969_v50 = vand.u32 2147483648, %v8861_v34  ;;  %v3793_v57 = vadd.f32 %v9536_v52, %v3631_v49  ;;  %v3794_v3 = vadd.f32 %v9537_v13, %v3632_v44  ;;  %v9545_v5 = vld [vmem:[#allocation55_spill] sm:$0xff] }
 0x29b   : > { %v5541_v58 = vpop.eup %5540  ;;  %vm4948_vm4 = vweird.f32 %v8840_v61  ;;  %v4967_v39 = vand.u32 2147483647, %v8861_v34  ;;  %v3795_v53 = vadd.f32 %v9538_v62, %v3633_v14  ;;  %v3920_v47 = vmul.f32 %v8886_v23, %v8746_v37 }
 0x29c   : > { %v3921_v31 = vmul.f32 %v8886_v23, %v8737_v15  ;;  %v5543_v29 = vpop.eup %5542  ;;  %v4736_v44 = vmul.f32 %v5539_v45, %v4735_v9  ;;  %v4749_v60 = vmul.f32 %v5541_v58, %v8836_v43  ;;  %vm4754_vm6 = vweird.f32 %v5541_v58 }
 0x29d   : > { %vm8893_vm7 = vcmp.eq.f32.partialorder %v4757_v27, 8.507059e+37  ;;  %v8897_v14 = vor.u32 1.1754944e-38, %v4969_v50  ;;  %v4944_v18 = vmul.f32 %v5543_v29, %v8840_v61  ;;  %vm4949_vm8 = vweird.f32 %v5543_v29  ;;  %vm4755_vm13 = vmor %vm4753_vm3, %vm4754_vm6 }
 0x29e   : > { %vm8900_vm5 = vcmp.eq.f32.partialorder %v4952_v63, 8.507059e+37  ;;  %v3952_v37 = vadd.f32 %v3920_v47, %v3790_v35  ;;  %v3953_v15 = vadd.f32 %v3921_v31, %v3791_v10  ;;  %v4737_v22 = vadd.f32 %v5539_v45, %v4736_v44  ;;  %v9546_v63 = vld [vmem:[#allocation56_spill] sm:$0xff]  ;;  %v9551_v31 = vld [vmem:[#allocation47_spill] sm:$0xff]  ;;  %vm4950_vm14 = vmor %vm4948_vm4, %vm4949_vm8 }
 0x29f   : > { %v4750_v19 = vsub.f32 1.0, %v4749_v60  ;;  %vm4963_vm10 = vweird.f32 %v8861_v34  ;;  %v3954_v26 = vadd.f32 %v9543_v7, %v3792_v20  ;;  %v3955_v49 = vadd.f32 %v9544_v38, %v3793_v57  ;;  %v5545_v2 = vpop.eup %5544  ;;  %v9552_v60 = vld [vmem:[#allocation54_spill] sm:$0xff]  ;;  %v9556_v38 = vld [vmem:[#allocation53_spill] sm:$0xff] }
 0x2a0   : > { %v4945_v11 = vsub.f32 1.0, %v4944_v18  ;;  %v3956_v27 = vadd.f32 %v9545_v5, %v3794_v3  ;;  %v3957_v9 = vadd.f32 %v9546_v63, %v3795_v53  ;;  %v4082_v35 = vmul.f32 %v8387_v1, %v8593_v40  ;;  %v9549_v3 = vld [vmem:[#allocation12_spill] sm:$0xff]  ;;  %v2893_v63 = vpop.f32.mrf.mxu3 }
 0x2a1   : > { %v4741_v10 = vsel %vm4740_vm9, %v5539_v45, %v4737_v22  ;;  %v4751_v50 = vmul.f32 %v5541_v58, %v4750_v19  ;;  %v4959_v52 = vmul.f32 %v5545_v2, %v8861_v34  ;;  %vm4964_vm11 = vweird.f32 %v5545_v2  ;;  %v9550_v45 = vld [vmem:[#allocation15_spill] sm:$0xff] }
 0x2a2   : > { %vm8915_vm12 = vcmp.eq.f32.partialorder %v4967_v39, 8.507059e+37  ;;  %v4746_v41 = vsel %vm8865_vm1, %v4745_v17, %v4741_v10  ;;  %v4946_v57 = vmul.f32 %v5543_v29, %v4945_v11  ;;  %v4114_v13 = vadd.f32 %v4082_v35, %v3952_v37  ;;  %v9553_v17 = vld [vmem:[#allocation27_spill] sm:$0xff]  ;;  %vm4965_vm15 = vmor %vm4963_vm10, %vm4964_vm11 }
 0x2a3   : > { %v4115_v62 = vadd.f32 %v9549_v3, %v3953_v15  ;;  %v4752_v53 = vadd.f32 %v5541_v58, %v4751_v50  ;;  %v5045_v1 = vmul.f32 %v4746_v41, %v8724_v33  ;;  %v4960_v40 = vsub.f32 1.0, %v4959_v52  ;;  %v8937_v15 = vld [vmem:[%s9304_s6 + $0x8] ss:$0 sm:$0xff]  ;;  %v9561_v3 = vld [vmem:[#allocation20_spill] sm:$0xff] }
 0x2a4   : > { %v4116_v47 = vadd.f32 %v9550_v45, %v3954_v26  ;;  %v4947_v39 = vadd.f32 %v5543_v29, %v4946_v57  ;;  %v4117_v44 = vadd.f32 %v9551_v31, %v3955_v49  ;;  %v4118_v4 = vadd.f32 %v9552_v60, %v3956_v27  ;;  %v9554_v22 = vld [vmem:[#allocation43_spill] sm:$0xff]  ;;  %v9555_v26 = vld [vmem:[#allocation52_spill] sm:$0xff]  ;;  %v9560_v57 = vld [vmem:[#allocation21_spill] sm:$0xff] }
 0x2a5   : > { %v4119_v18 = vadd.f32 %v9553_v17, %v3957_v9  ;;  %v4756_v37 = vsel %vm4755_vm13, %v5541_v58, %v4752_v53  ;;  %5077 = vst [vmem:[%s7805_s21 + $0x60] sm:$0xff] %v5045_v1  ;;  %v4961_v33 = vmul.f32 %v5545_v2, %v4960_v40  ;;  %v4244_v43 = vmul.f32 %v8937_v15, %v8788_v59  ;;  %v9558_v9 = vld [vmem:[#allocation58_spill] sm:$0xff]  ;;  %v9563_v40 = vld [vmem:[#allocation24_spill] sm:$0xff]  ;;  %v9564_v45 = vld [vmem:[#allocation25_spill] sm:$0xff] }
 0x2a6   : > { %v4277_v19 = vadd.f32 %v9554_v22, %v4115_v62  ;;  %v4761_v58 = vsel %vm8893_vm7, %v8871_v8, %v4756_v37  ;;  %v4951_v7 = vsel %vm4950_vm14, %v5543_v29, %v4947_v39  ;;  %v4278_v61 = vadd.f32 %v9555_v26, %v4116_v47  ;;  %v9557_v29 = vld [vmem:[#allocation57_spill] sm:$0xff]  ;;  %v9562_v53 = vld [vmem:[#allocation22_spill] sm:$0xff] }
 0x2a7   : > { %v4279_v49 = vadd.f32 %v9556_v38, %v4117_v44  ;;  %v5046_v11 = vmul.f32 %v4761_v58, %v8775_v25  ;;  %v4956_v5 = vsel %vm8900_vm5, %v8873_v36, %v4951_v7  ;;  %v4962_v59 = vadd.f32 %v5545_v2, %v4961_v33  ;;  %v8960_v25 = vld [vmem:[%s9305_s7] ss:$0 sm:$0xff]  ;;  %v5618_v38 = vld [vmem:[%s9304_s6 + $0x1] ss:$0 sm:$0xff] }
 0x2a8   : > { %v4276_v27 = vadd.f32 %v4244_v43, %v4114_v13  ;;  %v5059_v8 = vmul.f32 %v4956_v5, %v8785_v54  ;;  %v4280_v21 = vadd.f32 %v9557_v29, %v4118_v4  ;;  %v4281_v35 = vadd.f32 %v9558_v9, %v4119_v18  ;;  %9559 = vst [vmem:[#allocation28_spill] sm:$0xff] %v8960_v25  ;;  %v9565_v39 = vld [vmem:[#allocation26_spill] sm:$0xff]  ;;  %v3090_v4 = vld [vmem:[#allocation2 + $0x151] sm:$0xff] }
 0x2a9   : > { %v4376_v36 = vadd.f32 %v8960_v25, %v4277_v19  ;;  %5078 = vst [vmem:[%s7805_s21 + $0x68] sm:$0xff] %v5046_v11  ;;  %v4966_v55 = vsel %vm4965_vm15, %v5545_v2, %v4962_v59  ;;  %v4377_v34 = vadd.f32 %v8960_v25, %v4278_v61  ;;  %v4378_v50 = vadd.f32 %v8960_v25, %v4279_v49  ;;  %v5617_v19 = vld [vmem:[%s9304_s6] ss:$0 sm:$0xff] }
 0x2aa   : > { %v4375_v10 = vadd.f32 %v8960_v25, %v4276_v27  ;;  %v4971_v54 = vsel %vm8915_vm12, %v8897_v14, %v4966_v55  ;;  %5091 = vst [vmem:[%s7805_s21 + $0xd0] sm:$0xff] %v5059_v8  ;;  %v4379_v52 = vadd.f32 %v8960_v25, %v4280_v21  ;;  %v4380_v41 = vadd.f32 %v8960_v25, %v4281_v35  ;;  %v2960_v14 = vld [vmem:[#allocation2 + $0x150] sm:$0xff]  ;;  %v5619_v27 = vld [vmem:[%s9304_s6 + $0x2] ss:$0 sm:$0xff]  ;;  %v2896_v8 = vpop.f32.mrf.mxu3 }
 0x2ab   : > { %v8974_v13 = vadd.f32 %v4376_v36, %v9560_v57  ;;  %v5060_v2 = vmul.f32 %v4971_v54, %v8801_v56  ;;  %v8981_v1 = vadd.f32 %v4377_v34, %v9562_v53  ;;  %v8984_v20 = vadd.f32 %v4378_v50, %v9563_v40  ;;  %v5616_v56 = vld [vmem:[%s9303_s5] ss:$0 sm:$0xff]  ;;  %v9033_v57 = vld [vmem:[%s9304_s6 + $0x4] ss:$0 sm:$0xff] }
 0x2ac   : > { %v8978_v62 = vadd.f32 %v4375_v10, %v9561_v3  ;;  %v8987_v47 = vadd.f32 %v4379_v52, %v9564_v45  ;;  %v8990_v31 = vadd.f32 %v4380_v41, %v9565_v39  ;;  %v2894_v60 = vadd.f32 %v5616_v56, %v2893_v63  ;;  %v5620_v50 = vld [vmem:[#allocation2] sm:$0xff] }
 0x2ad   : > { %v4440_v44 = vsub.f32 0.0, %v8974_v13  ;;  %5092 = vst [vmem:[%s7805_s21 + $0xd8] sm:$0xff] %v5060_v2  ;;  %v4441_v18 = vsub.f32 0.0, %v8981_v1  ;;  %v4442_v37 = vsub.f32 0.0, %v8984_v20  ;;  %v2994_v58 = vmul.f32 %v5617_v19, %v2960_v14  ;;  %v5621_v54 = vld [vmem:[#allocation2 + $0x199] sm:$0xff] }
 0x2ae   : > { %v4439_v17 = vsub.f32 0.0, %v8978_v62  ;;  %v4443_v33 = vsub.f32 0.0, %v8987_v47  ;;  %v4444_v43 = vsub.f32 0.0, %v8990_v31  ;;  %2930 = vst [vmem:[#allocation2 + $0x181] sm:$0xff] %v2894_v60  ;;  %v3124_v49 = vmul.f32 %v5618_v38, %v3090_v4  ;;  %v9025_v52 = vld [vmem:[%s9304_s6 + $0x7] ss:$0 sm:$0xff] }
 0x2af   : > { %v4487_v22 = vmul.f32 1.442695, %v4440_v44  ;;  %v4489_v26 = vmul.f32 1.442695, %v4441_v18  ;;  %v4491_v61 = vmul.f32 1.442695, %v4442_v37  ;;  %v2996_v59 = vmul.f32 %v5617_v19, %v8629_v24 }
 0x2b0   : > { %v4485_v7 = vmul.f32 1.442695, %v4439_v17  ;;  %v4493_v11 = vmul.f32 1.442695, %v4443_v33  ;;  %v4495_v5 = vmul.f32 1.442695, %v4444_v43  ;;  %v3286_v63 = vmul.f32 %v5619_v27, %v8602_v51 }
 0x2b1   : > { %5546 = vpow2.f32 %v4487_v22  ;;  %v3126_v29 = vmul.f32 %v5618_v38, %v8559_v30  ;;  %v3156_v21 = vadd.f32 %v3124_v49, %v2994_v58  ;;  %v3288_v9 = vmul.f32 %v5619_v27, %v8706_v16 }
 0x2b2   : > { %5548 = vpow2.f32 %v4485_v7  ;;  %v3448_v35 = vmul.f32 %v8812_v0, %v8629_v24  ;;  %v9017_v36 = vadd.f32 %v5616_v56, %v2896_v8  ;;  %v9020_v51 = vmul.f32 %v5620_v50, %v8886_v23 }
 0x2b3   : > { %5550 = vpow2.f32 %v4489_v26  ;;  %v3158_v55 = vadd.f32 %v3126_v29, %v2996_v59  ;;  %v3318_v10 = vadd.f32 %v3286_v63, %v3156_v21  ;;  %v9028_v41 = vmul.f32 %v9025_v52, %v5621_v54 }
 0x2b4   : > { %5552 = vpow2.f32 %v4491_v61  ;;  %v3610_v2 = vmul.f32 %v9033_v57, %v8559_v30  ;;  %v9038_v3 = vmul.f32 %v9033_v57, %v2894_v60  ;;  %2931 = vst [vmem:[#allocation2 + $0x189] sm:$0xff] %v9017_v36  ;;  %v9045_v39 = vmul.f32 %v8855_v12, %v8706_v16 }
 0x2b5   : > { %5554 = vpow2.f32 %v4493_v11  ;;  %v3416_v24 = vld [vmem:[#allocation2 + $0x180] sm:$0xff]  ;;  %v3320_v14 = vadd.f32 %v3288_v9, %v3158_v55  ;;  %v3480_v45 = vadd.f32 %v3448_v35, %v3318_v10  ;;  %v9050_v4 = vmul.f32 %v9025_v52, %v2894_v60 }
 0x2b6   : > { %5556 = vpow2.f32 %v4495_v5  ;;  %v2995_v30 = vmul.f32 %v5617_v19, %v8596_v28  ;;  %v2997_v17 = vmul.f32 %v5617_v19, %v8698_v32  ;;  %v3450_v33 = vmul.f32 %v8812_v0, %v3416_v24 }
 0x2b7   : > { %v5547_v34 = vpop.eup %5546  ;;  %v9059_v16 = vmul.f32 %v8886_v23, %v3416_v24  ;;  %v3125_v60 = vmul.f32 %v5618_v38, %v8536_v6  ;;  %v3127_v28 = vmul.f32 %v5618_v38, %v8565_v46  ;;  %v9068_v7 = vadd.f32 %v3610_v2, %v3480_v45 }
 0x2b8   : > { %v5549_v53 = vpop.eup %5548  ;;  %v9041_v40 = vadd.f32 1.0, %v5547_v34  ;;  %v9071_v26 = vmul.f32 %v5619_v27, %v8618_v42  ;;  %v9074_v61 = vmul.f32 %v5619_v27, %v8726_v48  ;;  %v3482_v38 = vadd.f32 %v3450_v33, %v3320_v14 }
 0x2b9   : > { %v5551_v44 = vpop.eup %5550  ;;  %v9047_v56 = vadd.f32 1.0, %v5549_v53  ;;  %v9082_v59 = vadd.f32 %v3125_v60, %v2995_v30  ;;  %v9088_v27 = vadd.f32 %v3127_v28, %v2997_v17 }
 0x2ba   : > { %v5553_v18 = vpop.eup %5552  ;;  %v9054_v37 = vadd.f32 1.0, %v5551_v44  ;;  %5558 = vrcp.f32 %v9041_v40  ;;  %v4787_v11 = vand.u32 2147483647, %v9041_v40  ;;  %v4789_v5 = vand.u32 2147483648, %v9041_v40 }
 0x2bb   : > { %v5555_v43 = vpop.eup %5554  ;;  %v9061_v22 = vadd.f32 1.0, %v5553_v18  ;;  %5560 = vrcp.f32 %v9047_v56  ;;  %v4774_v49 = vand.u32 2147483648, %v9047_v56  ;;  %v4772_v6 = vand.u32 2147483647, %v9047_v56 }
 0x2bc   : > { %v5557_v19 = vpop.eup %5556  ;;  %v9066_v58 = vadd.f32 1.0, %v5555_v43  ;;  %5562 = vrcp.f32 %v9054_v37  ;;  %v4804_v46 = vand.u32 2147483648, %v9054_v37  ;;  %vm4783_vm0 = vweird.f32 %v9041_v40 }
 0x2bd   : > { %v9084_v42 = vadd.f32 1.0, %v5557_v19  ;;  %5564 = vrcp.f32 %v9061_v22  ;;  %vm4768_vm1 = vweird.f32 %v9047_v56  ;;  %v4802_v8 = vand.u32 2147483647, %v9054_v37 }
 0x2be   : > { %v4819_v29 = vand.u32 2147483648, %v9061_v22  ;;  %5566 = vrcp.f32 %v9066_v58  ;;  %v4775_v9 = vor.u32 1.1754944e-38, %v4774_v49  ;;  %vm9095_vm2 = vcmp.eq.f32.partialorder %v4787_v11, 8.507059e+37 }
 0x2bf   : > { %v4790_v10 = vor.u32 1.1754944e-38, %v4789_v5  ;;  %vm9100_vm3 = vcmp.eq.f32.partialorder %v4772_v6, 8.507059e+37  ;;  %vm4798_vm4 = vweird.f32 %v9054_v37  ;;  %v4805_v54 = vor.u32 1.1754944e-38, %v4804_v46  ;;  %v5624_v6 = vld [vmem:[#allocation2 + $0x171] sm:$0xff] }
 0x2c0   : > { %v5559_v63 = vpop.eup %5558  ;;  %v4817_v24 = vand.u32 2147483647, %v9061_v22  ;;  %v4834_v2 = vand.u32 2147483648, %v9066_v58  ;;  %v4832_v45 = vand.u32 2147483647, %v9066_v58  ;;  %5568 = vrcp.f32 %v9084_v42 }
 0x2c1   : > { %v5561_v21 = vpop.eup %5560  ;;  %v4779_v35 = vmul.f32 %v5559_v63, %v9041_v40  ;;  %vm4784_vm6 = vweird.f32 %v5559_v63  ;;  %vm9110_vm8 = vcmp.eq.f32.partialorder %v4802_v8, 8.507059e+37  ;;  %vm4813_vm5 = vweird.f32 %v9061_v22 }
 0x2c2   : > { %v4764_v34 = vmul.f32 %v5561_v21, %v9047_v56  ;;  %v5563_v53 = vpop.eup %5562  ;;  %vm4769_vm7 = vweird.f32 %v5561_v21  ;;  %v4820_v18 = vor.u32 1.1754944e-38, %v4819_v29  ;;  %v4847_v60 = vand.u32 2147483647, %v9084_v42  ;;  %vm4785_vm15 = vmor %vm4783_vm0, %vm4784_vm6 }
 0x2c3   : > { %v4780_v14 = vsub.f32 1.0, %v4779_v35  ;;  %v4794_v30 = vmul.f32 %v5563_v53, %v9054_v37  ;;  %v5565_v33 = vpop.eup %5564  ;;  %vm4799_vm10 = vweird.f32 %v5563_v53  ;;  %v4849_v28 = vand.u32 2147483648, %v9084_v42  ;;  %vm4770_vm9 = vmor %vm4768_vm1, %vm4769_vm7 }
 0x2c4   : > { %v4765_v44 = vsub.f32 1.0, %v4764_v34  ;;  %v5567_v19 = vpop.eup %5566  ;;  %v4809_v5 = vmul.f32 %v5565_v33, %v9061_v22  ;;  %vm9119_vm11 = vcmp.eq.f32.partialorder %v4817_v24, 8.507059e+37  ;;  %v4835_v46 = vor.u32 1.1754944e-38, %v4834_v2  ;;  %vm4800_vm0 = vmor %vm4798_vm4, %vm4799_vm10 }
 0x2c5   : > { %v4781_v43 = vmul.f32 %v5559_v63, %v4780_v14  ;;  %v4795_v11 = vsub.f32 1.0, %v4794_v30  ;;  %vm4814_vm12 = vweird.f32 %v5565_v33  ;;  %v4824_v29 = vmul.f32 %v5567_v19, %v9066_v58 }
 0x2c6   : > { %v4766_v49 = vmul.f32 %v5561_v21, %v4765_v44  ;;  %vm9124_vm14 = vcmp.eq.f32.partialorder %v4832_v45, 8.507059e+37  ;;  %v4810_v24 = vsub.f32 1.0, %v4809_v5  ;;  %v9131_v44 = vor.u32 1.1754944e-38, %v4849_v28  ;;  %v9133_v30 = vpop.eup %5568 }
 0x2c7   : > { %v4782_v8 = vadd.f32 %v5559_v63, %v4781_v43  ;;  %v4796_v14 = vmul.f32 %v5563_v53, %v4795_v11  ;;  %v4825_v45 = vsub.f32 1.0, %v4824_v29  ;;  %vm4843_vm13 = vweird.f32 %v9084_v42 }
 0x2c8   : > { %v4767_v34 = vadd.f32 %v5561_v21, %v4766_v49  ;;  %v3644_v43 = vadd.f32 %v9038_v3, %v3482_v38  ;;  %v3804_v40 = vadd.f32 %v9045_v39, %v9068_v7  ;;  %v4811_v5 = vmul.f32 %v5565_v33, %v4810_v24 }
 0x2c9   : > { %v4786_v2 = vsel %vm4785_vm15, %v5559_v63, %v4782_v8  ;;  %v4797_v11 = vadd.f32 %v5563_v53, %v4796_v14  ;;  %v4826_v56 = vmul.f32 %v5567_v19, %v4825_v45  ;;  %v4839_v3 = vmul.f32 %v9133_v30, %v9084_v42 }
 0x2ca   : > { %v4771_v49 = vsel %vm4770_vm9, %v5561_v21, %v4767_v34  ;;  %v4791_v28 = vsel %vm9095_vm2, %v4790_v10, %v4786_v2  ;;  %vm9151_vm1 = vcmp.eq.f32.partialorder %v4847_v60, 8.507059e+37  ;;  %v3319_v39 = vadd.f32 %v9071_v26, %v9082_v59  ;;  %vm4815_vm2 = vmor %vm4813_vm5, %vm4814_vm12  ;;  %v3417_v26 = vld [vmem:[#allocation2 + $0x188] sm:$0xff] }
 0x2cb   : > { %v4776_v25 = vsel %vm9100_vm3, %v4775_v9, %v4771_v49  ;;  %v4801_v7 = vsel %vm4800_vm0, %v5563_v53, %v4797_v11  ;;  %v4812_v63 = vadd.f32 %v5565_v33, %v4811_v5  ;;  %v5048_v9 = vmul.f32 %v4791_v28, %v8974_v13  ;;  %v5626_v2 = vld [vmem:[#allocation2 + $0x1a1] sm:$0xff]  ;;  %v9580_v5 = vld [vmem:[#allocation28_spill] sm:$0xff] }
 0x2cc   : > { %v5047_v21 = vmul.f32 %v4776_v25, %v8978_v62  ;;  %v4806_v37 = vsel %vm9110_vm8, %v4805_v54, %v4801_v7  ;;  %v4827_v55 = vadd.f32 %v5567_v19, %v4826_v56  ;;  %v4840_v10 = vsub.f32 1.0, %v4839_v3  ;;  %v3740_v54 = vld [vmem:[#allocation2 + $0x182] sm:$0xff] }
 0x2cd   : > { %v3966_v50 = vadd.f32 %v9059_v16, %v3804_v40  ;;  %v4816_v59 = vsel %vm4815_vm2, %v5565_v33, %v4812_v63  ;;  %vm9578_vm3 = vweird.f32 %v5567_v19  ;;  %vm9579_vm4 = vweird.f32 %v9066_v58  ;;  %5080 = vst [vmem:[%s7805_s21 + $0x78] sm:$0xff] %v5048_v9  ;;  %v9581_v63 = vld [vmem:[#allocation38_spill] sm:$0xff] }
 0x2ce   : > { %vm4830_vm6 = vmor %vm9579_vm4, %vm9578_vm3  ;;  %vm4844_vm7 = vweird.f32 %v9133_v30  ;;  %v5049_v25 = vmul.f32 %v4806_v37, %v8981_v1  ;;  %5079 = vst [vmem:[%s7805_s21 + $0x70] sm:$0xff] %v5047_v21  ;;  %v3449_v13 = vmul.f32 %v8812_v0, %v8698_v32  ;;  %v4821_v62 = vsel %vm9119_vm11, %v4820_v18, %v4816_v59  ;;  %v3741_v18 = vld [vmem:[#allocation2 + $0x18a] sm:$0xff]  ;;  %v9584_v59 = vld [vmem:[#allocation41_spill] sm:$0xff] }
 0x2cf   : > { %v4831_v22 = vsel %vm4830_vm6, %v5567_v19, %v4827_v55  ;;  %v4841_v16 = vmul.f32 %v9133_v30, %v4840_v10  ;;  %v3321_v58 = vadd.f32 %v9074_v61, %v9088_v27  ;;  %v5050_v1 = vmul.f32 %v4821_v62, %v8984_v20  ;;  %vm4845_vm8 = vmor %vm4843_vm13, %vm4844_vm7  ;;  %v9582_v55 = vld [vmem:[#allocation40_spill] sm:$0xff] }
 0x2d0   : > { %v4836_v53 = vsel %vm9124_vm14, %v4835_v46, %v4831_v22  ;;  %5081 = vst [vmem:[%s7805_s21 + $0x80] sm:$0xff] %v5049_v25  ;;  %v3451_v32 = vmul.f32 %v8812_v0, %v3417_v26  ;;  %v3481_v17 = vadd.f32 %v3449_v13, %v3319_v39  ;;  %v4128_v19 = vadd.f32 %v9050_v4, %v3966_v50 }
 0x2d1   : > { %v4842_v33 = vadd.f32 %v9133_v30, %v4841_v16  ;;  %v5051_v60 = vmul.f32 %v4836_v53, %v8987_v47  ;;  %v3611_v61 = vmul.f32 %v5624_v6, %v9033_v57  ;;  %5082 = vst [vmem:[%s7805_s21 + $0x88] sm:$0xff] %v5050_v1  ;;  %v3613_v0 = vmul.f32 %v9033_v57, %v9017_v36 }
 0x2d2   : > { %v3483_v20 = vadd.f32 %v3451_v32, %v3321_v58  ;;  %v3773_v27 = vmul.f32 %v8855_v12, %v8726_v48  ;;  %v3774_v47 = vmul.f32 %v8855_v12, %v3740_v54  ;;  %v3775_v8 = vmul.f32 %v8855_v12, %v3741_v18  ;;  %v5625_v48 = vld [vmem:[#allocation2 + $0x19a] sm:$0xff] }
 0x2d3   : > { %v4846_v4 = vsel %vm4845_vm8, %v9133_v30, %v4842_v33  ;;  %5083 = vst [vmem:[%s7805_s21 + $0x90] sm:$0xff] %v5051_v60  ;;  %v3643_v46 = vadd.f32 %v3611_v61, %v3481_v17  ;;  %v3935_v42 = vmul.f32 %v8886_v23, %v3417_v26  ;;  %v4258_v34 = vmul.f32 %v8937_v15, %v3740_v54 }
 0x2d4   : > { %v4851_v29 = vsel %vm9151_vm1, %v9131_v44, %v4846_v4  ;;  %v3645_v35 = vadd.f32 %v3613_v0, %v3483_v20  ;;  %v3806_v57 = vadd.f32 %v3774_v47, %v3644_v43  ;;  %v4260_v14 = vmul.f32 %v5625_v48, %v8937_v15  ;;  %v5627_v43 = vld [vmem:[#allocation2 + $0x1a2] sm:$0xff] }
 0x2d5   : > { %v5052_v24 = vmul.f32 %v4851_v29, %v8990_v31  ;;  %v3805_v30 = vadd.f32 %v3773_v27, %v3643_v46  ;;  %v4099_v45 = vmul.f32 %v5626_v2, %v9025_v52  ;;  %v4290_v40 = vadd.f32 %v4258_v34, %v4128_v19 }
 0x2d6   : > { %v3807_v12 = vadd.f32 %v3775_v8, %v3645_v35  ;;  %v3968_v23 = vadd.f32 %v9020_v51, %v3806_v57  ;;  %v4097_v44 = vmul.f32 %v9025_v52, %v9017_v36  ;;  %v4261_v28 = vmul.f32 %v5627_v43, %v8937_v15 }
 0x2d7   : > { %5084 = vst [vmem:[%s7805_s21 + $0x98] sm:$0xff] %v5052_v24  ;;  %v3967_v49 = vadd.f32 %v3935_v42, %v3805_v30  ;;  %v4389_v56 = vadd.f32 %v9580_v5, %v4290_v40  ;;  %v4259_v38 = vmul.f32 %v8937_v15, %v3741_v18  ;;  %v9583_v15 = vld [vmem:[#allocation39_spill] sm:$0xff] }
 0x2d8   : > { %v3969_v11 = vadd.f32 %v9020_v51, %v3807_v12  ;;  %v4130_v31 = vadd.f32 %v9028_v41, %v3968_v23 }
 0x2d9   : > { %v4129_v3 = vadd.f32 %v4097_v44, %v3967_v49  ;;  %v9219_v21 = vadd.f32 %v4389_v56, %v9581_v63 }
 0x2da   : > { %v4131_v39 = vadd.f32 %v4099_v45, %v3969_v11  ;;  %v4292_v7 = vadd.f32 %v4260_v14, %v4130_v31 }
 0x2db   : > { %v4291_v9 = vadd.f32 %v4259_v38, %v4129_v3  ;;  %v4453_v52 = vsub.f32 0.0, %v9219_v21 }
 0x2dc   : > { %v4293_v37 = vadd.f32 %v4261_v28, %v4131_v39  ;;  %v4391_v36 = vadd.f32 %v9580_v5, %v4292_v7 }
 0x2dd   : > { %v4390_v51 = vadd.f32 %v9580_v5, %v4291_v9  ;;  %v4513_v50 = vmul.f32 1.442695, %v4453_v52 }
 0x2de   : > { %v4392_v41 = vadd.f32 %v9580_v5, %v4293_v37  ;;  %v9226_v10 = vadd.f32 %v4391_v36, %v9582_v55 }
 0x2df   : > { %v9229_v26 = vadd.f32 %v4390_v51, %v9583_v15  ;;  %5570 = vpow2.f32 %v4513_v50 }
 0x2e0   : > { %v9232_v25 = vadd.f32 %v4392_v41, %v9584_v59  ;;  %v4455_v13 = vsub.f32 0.0, %v9226_v10 }
 0x2e1   : > { %v4454_v62 = vsub.f32 0.0, %v9229_v26 }
 0x2e2   : > { %v4456_v22 = vsub.f32 0.0, %v9232_v25  ;;  %v4517_v16 = vmul.f32 1.442695, %v4455_v13 }
 0x2e3   : > { %v4515_v58 = vmul.f32 1.442695, %v4454_v62 }
 0x2e4   : > { %5572 = vpow2.f32 %v4517_v16  ;;  %v4519_v54 = vmul.f32 1.442695, %v4456_v22 }
 0x2e5   : > { %5574 = vpow2.f32 %v4515_v58  ;;  %v5571_v53 = vpop.eup %5570 }
 0x2e6   : > { %5576 = vpow2.f32 %v4519_v54  ;;  %v4549_v1 = vadd.f32 1.0, %v5571_v53 }
 0x2e8   : > { %5578 = vrcp.f32 %v4549_v1  ;;  %v4982_v20 = vand.u32 2147483647, %v4549_v1  ;;  %v4984_v0 = vand.u32 2147483648, %v4549_v1  ;;  %vm4978_vm5 = vweird.f32 %v4549_v1 }
 0x2ea   : > { %v5573_v32 = vpop.eup %5572  ;;  %vm9240_vm9 = vcmp.eq.f32.partialorder %v4982_v20, 8.507059e+37  ;;  %v4985_v35 = vor.u32 1.1754944e-38, %v4984_v0 }
 0x2eb   : > { %v5575_v17 = vpop.eup %5574  ;;  %v4551_v18 = vadd.f32 1.0, %v5573_v32 }
 0x2ec   : > { %v5577_v33 = vpop.eup %5576  ;;  %v4550_v60 = vadd.f32 1.0, %v5575_v17 }
 0x2ed   : > { %v9237_v19 = vadd.f32 1.0, %v5577_v33  ;;  %5580 = vrcp.f32 %v4551_v18  ;;  %vm5008_vm11 = vweird.f32 %v4551_v18  ;;  %v5012_v34 = vand.u32 2147483647, %v4551_v18 }
 0x2ee   : > { %5582 = vrcp.f32 %v4550_v60  ;;  %v5579_v6 = vpop.eup %5578  ;;  %v4997_v14 = vand.u32 2147483647, %v4550_v60  ;;  %v4999_v45 = vand.u32 2147483648, %v4550_v60  ;;  %v5014_v12 = vand.u32 2147483648, %v4551_v18 }
 0x2ef   : > { %5584 = vrcp.f32 %v9237_v19  ;;  %v4974_v61 = vmul.f32 %v5579_v6, %v4549_v1  ;;  %vm4979_vm10 = vweird.f32 %v5579_v6  ;;  %v5027_v23 = vand.u32 2147483647, %v9237_v19 }
 0x2f0   : > { %vm4980_vm12 = vmor %vm4978_vm5, %vm4979_vm10  ;;  %v5029_v11 = vand.u32 2147483648, %v9237_v19  ;;  %vm4993_vm0 = vweird.f32 %v4550_v60  ;;  %vm5013_vm2 = vcmp.eq.f32.partialorder %v5012_v34, 8.507059e+37  ;;  %v5015_v38 = vor.u32 1.1754944e-38, %v5014_v12 }
 0x2f1   : > { %v4975_v27 = vsub.f32 1.0, %v4974_v61  ;;  %v5000_v39 = vor.u32 1.1754944e-38, %v4999_v45  ;;  %vm5023_vm4 = vweird.f32 %v9237_v19  ;;  %vm4998_vm6 = vcmp.eq.f32.partialorder %v4997_v14, 8.507059e+37 }
 0x2f2   : > { %v5030_v37 = vor.u32 1.1754944e-38, %v5029_v11  ;;  %vm5028_vm8 = vcmp.eq.f32.partialorder %v5027_v23, 8.507059e+37 }
 0x2f3   : > { %v5581_v47 = vpop.eup %5580  ;;  %v4976_v46 = vmul.f32 %v5579_v6, %v4975_v27 }
 0x2f4   : > { %v5583_v4 = vpop.eup %5582  ;;  %v5004_v42 = vmul.f32 %v5581_v47, %v4551_v18  ;;  %vm5009_vm13 = vweird.f32 %v5581_v47 }
 0x2f5   : > { %v5585_v29 = vpop.eup %5584  ;;  %v4989_v57 = vmul.f32 %v5583_v4, %v4550_v60  ;;  %v4977_v48 = vadd.f32 %v5579_v6, %v4976_v46  ;;  %vm4994_vm14 = vweird.f32 %v5583_v4  ;;  %vm5010_vm1 = vmor %vm5008_vm11, %vm5009_vm13 }
 0x2f6   : > { %v5005_v24 = vsub.f32 1.0, %v5004_v42  ;;  %v5019_v30 = vmul.f32 %v5585_v29, %v9237_v19  ;;  %vm5024_vm15 = vweird.f32 %v5585_v29  ;;  %vm4995_vm3 = vmor %vm4993_vm0, %vm4994_vm14 }
 0x2f7   : > { %v4990_v2 = vsub.f32 1.0, %v4989_v57  ;;  %v4981_v40 = vsel %vm4980_vm12, %v5579_v6, %v4977_v48  ;;  %vm5025_vm7 = vmor %vm5023_vm4, %vm5024_vm15 }
 0x2f8   : > { %v5006_v49 = vmul.f32 %v5581_v47, %v5005_v24  ;;  %v5020_v44 = vsub.f32 1.0, %v5019_v30  ;;  %v4986_v43 = vsel %vm9240_vm9, %v4985_v35, %v4981_v40 }
 0x2f9   : > { %v4991_v28 = vmul.f32 %v5583_v4, %v4990_v2  ;;  %v5061_v56 = vmul.f32 %v4986_v43, %v9219_v21 }
 0x2fa   : > { %v5007_v31 = vadd.f32 %v5581_v47, %v5006_v49  ;;  %v5021_v5 = vmul.f32 %v5585_v29, %v5020_v44 }
 0x2fb   : > { %v4992_v3 = vadd.f32 %v5583_v4, %v4991_v28  ;;  %5093 = vst [vmem:[%s7805_s21 + $0xe0] sm:$0xff] %v5061_v56 }
 0x2fc   : > { %v5011_v7 = vsel %vm5010_vm1, %v5581_v47, %v5007_v31  ;;  %v5022_v63 = vadd.f32 %v5585_v29, %v5021_v5 }
 0x2fd   : > { %v4996_v9 = vsel %vm4995_vm3, %v5583_v4, %v4992_v3  ;;  %v5016_v21 = vsel %vm5013_vm2, %v5015_v38, %v5011_v7 }
 0x2fe   : > { %v5001_v36 = vsel %vm4998_vm6, %v5000_v39, %v4996_v9  ;;  %v5026_v52 = vsel %vm5025_vm7, %v5585_v29, %v5022_v63  ;;  %v5063_v51 = vmul.f32 %v5016_v21, %v9226_v10 }
 0x2ff   : > { %v5031_v41 = vsel %vm5028_vm8, %v5030_v37, %v5026_v52  ;;  %v5062_v55 = vmul.f32 %v5001_v36, %v9229_v26 }
 0x300   : > { %v5064_v50 = vmul.f32 %v5031_v41, %v9232_v25  ;;  %5095 = vst [vmem:[%s7805_s21 + $0xf0] sm:$0xff] %v5063_v51 }
 0x301   : > { %5094 = vst [vmem:[%s7805_s21 + $0xe8] sm:$0xff] %v5062_v55 }
 0x302   : > { %5096 = vst [vmem:[%s7805_s21 + $0xf8] sm:$0xff] %v5064_v50 }
 0x303   : > { %5685 = shalt.err (!%p5682_p4)
}
 0x304   : > { %s5729_s26 = smov 128   ;;  %s5730_s21 = smov 8  }
 0x305   : > { %5260 = dma.vmem_to_hbm [thread:$0]  (%p5826_p11), %s5111_s25, 4096, %s5113_s10, %s5098_s12, %s5729_s26, %s5729_s26, %s5730_s21  }
 0x306 PF: > { %s5127_s19 = sand.u32 1, %s5712_s27   ;;  %p9587_p7 = scmp.ge.s32.totalorder %s5724_s30, 2 }
 0x307   : > { %s5128_s24 = scalar_lea.sflag [#allocation6], %s5127_s19 }
 0x308   : > { %p5267_p5 = pnand %p9587_p7, %p5830_p12 }
 0x30a   : > { %p5268_p8 = pneg %p5267_p5 }
 0x30c   : > { %5707 = dma.done.wait (%p5268_p8), %s5128_s24, 4096  }
 0x30d   : > { %5709 = vsyncadd (%p5268_p8), %s5128_s24, 4294963200  ;;  %s9588_s9 = sld [smem:[#allocation10_spill]]  ;;  %p21_p10 = scmp.ge.s32.totalorder %s5801_s11, 4  }
 0x30e   : > { %s9589_s29 = sld [smem:[#allocation11_spill]]  ;;  %s9590_s27 = smov %s5716_s28 }
 0x30f   : > { %s9592_s30 = smov %s5801_s11  ;;  %23 = sbr.rel (!%p21_p10) target bundleno = 5 (0x5), region = 99 }
 0x313   : > { %s9591_s28 = smov %s9588_s9 }
 0x314   :  { %5134 = vsyncpa [#allocation5], 1 }
 0x315   :  { %5136 = vsyncpa [#allocation5 + $0x1], 1 }
 0x316   :  { %5137 = vsyncpa [#allocation6], 1 }
 0x317   :  { %5139 = vsyncpa [#allocation6 + $0x1], 1 }

</bundles_post_ra>
